<compile_context>
chip_gen: v7x
topology: tpu7x:2x2x1
jax: 0.10.0
libtpu: 0.0.40
codegen_flags: <defaults>
</compile_context>

<pallas_src>
from typing import Dict, List

import jax
import jax.numpy as jnp
import numpy as np
from jax import lax
from jax.experimental import pallas as pl
from jax.experimental.pallas import tpu as pltpu


# ----------------------------------------------------------------------------
# In-kernel building blocks (activations live in registers/VMEM, (C, L) layout)
# ----------------------------------------------------------------------------
def _downsample_cols(y, stride, l_out):
    """Select columns 0, stride, 2*stride, ... of y:(C, Lf) -> (C, l_out).

    Exact 0/1 selection matmul on the MXU; avoids any strided lane access.
    """
    l_f = y.shape[1]
    src = lax.broadcasted_iota(jnp.int32, (l_f, l_out), 0)   # source column
    dst = lax.broadcasted_iota(jnp.int32, (l_f, l_out), 1)   # output column
    sel = (src == stride * dst).astype(jnp.float32)          # (Lf, l_out)
    return jnp.dot(y, sel, preferred_element_type=jnp.float32)


def _avgpool1d_k4s2p2(a, sig_ref):
    """nn.AvgPool1d(kernel_size=4, stride=2, padding=2) as VPU shift-and-add.

    a: (C, Lin) -> (C, Lin//2 + 1).  count_include_pad=True semantics.
    """
    c, l_in = a.shape
    pad, k, stride = 2, 4, 2
    l_p = l_in + 2 * pad
    l_full = l_p - k + 1
    l_out = (l_p - k) // stride + 1
    sig_ref[:c, :l_p] = jnp.zeros((c, l_p), jnp.float32)     # zero pad in VMEM
    sig_ref[:c, pad:pad + l_in] = a
    full = 0.25 * (sig_ref[:c, 0:l_full] + sig_ref[:c, 1:1 + l_full]
                   + sig_ref[:c, 2:2 + l_full] + sig_ref[:c, 3:3 + l_full])
    return _downsample_cols(full, stride, l_out)


def _conv1d_block(a, wmat, k, stride, pad, lrelu_slope, im_ref):
    """One Conv1d (+bias, +optional leaky-relu, +stride) as a single fused dot.

    a:    (Cin, Lin) f32 activation (unpadded)
    wmat: (Cout, Cin*K + 1) block-diagonal im2col weight, bias in last column.
    """
    c_in, l_in = a.shape
    l_p = l_in + 2 * pad
    l_full = l_p - k + 1                     # stride-1 output length
    l_out = (l_p - k) // stride + 1          # torch Conv1d output length
    n_rows = c_in * k + 1

    # Assemble im2col patch matrix in VMEM scratch: rows are tap-major input
    # channels, plus one trailing ones-row so the bias folds into the matmul.
    im_ref[:n_rows, :l_full] = jnp.zeros((n_rows, l_full), jnp.float32)
    for t in range(k):
        j0 = max(0, pad - t)                 # zero-padding handled by the memset
        j1 = min(l_full, l_in + pad - t)
        im_ref[t * c_in:(t + 1) * c_in, j0:j1] = a[:, j0 + t - pad:j1 + t - pad]
    im_ref[c_in * k:n_rows, :l_full] = jnp.ones((1, l_full), jnp.float32)

    y = jnp.dot(wmat, im_ref[:n_rows, :l_full],
                preferred_element_type=jnp.float32)          # (Cout, Lfull)
    if lrelu_slope is not None:
        y = jnp.where(y > 0, y, lrelu_slope * y)
    if stride > 1:
        y = _downsample_cols(y, stride, l_out)               # stride in-kernel
    return y


def _make_scale_kernel(num_pools, kernel_sizes, strides, lrelu_slope):
    """Fused kernel: [AvgPool1d]*num_pools + 3 convs + out_conv, per batch row."""
    n_layers = len(kernel_sizes) + 1
    layer_cfg = [(k, s, k // 2, lrelu_slope)
                 for k, s in zip(kernel_sizes, strides)]
    layer_cfg.append((3, 1, 1, None))                        # out_conv, no act

    def kernel(*refs):
        x_ref = refs[0]
        w_refs = refs[1:1 + n_layers]
        f_refs = refs[1 + n_layers:1 + 2 * n_layers]
        im_scr = refs[1 + 2 * n_layers]
        sig_scr = refs[2 + 2 * n_layers]

        a = x_ref[...]                                       # (1, L) raw audio
        for _ in range(num_pools):                           # fused pool cascade
            a = _avgpool1d_k4s2p2(a, sig_scr)
        for (k, s, p, act), w_ref, f_ref in zip(layer_cfg, w_refs, f_refs):
            a = _conv1d_block(a, w_ref[...], k, s, p, act, im_scr)
            f_ref[...] = a                                   # feature map
    return kernel


# ----------------------------------------------------------------------------
# Wrapper: weight re-layout + pallas_call per ScaleDiscriminator
# ----------------------------------------------------------------------------
def _build_im2col_weight(w, b, groups):
    """(Cout, Cin//g, K), (Cout,) -> block-diagonal (Cout, Cin*K + 1) matrix.

    Column order is tap-major / global-input-channel-minor (matches the
    in-kernel im2col); the bias becomes the last column (ones-row trick).
    """
    c_out, cin_g, k = w.shape
    cout_g = c_out // groups
    c_in = cin_g * groups
    wt = jnp.transpose(w.astype(jnp.float32), (0, 2, 1))     # (Cout, K, cin_g)
    rows = []
    for g in range(groups):
        blk = wt[g * cout_g:(g + 1) * cout_g]                # (cout_g, K, cin_g)
        left = jnp.zeros((cout_g, k, g * cin_g), jnp.float32)
        right = jnp.zeros((cout_g, k, (groups - 1 - g) * cin_g), jnp.float32)
        rows.append(jnp.concatenate([left, blk, right], axis=2))
    wm = jnp.concatenate(rows, axis=0).reshape(c_out, k * c_in)
    return jnp.concatenate([wm, b.reshape(c_out, 1).astype(jnp.float32)], axis=1)


def _conv_out_len(l_in, k, stride, pad):
    return (l_in + 2 * pad - k) // stride + 1


def scale_discriminator_forward(params, x, *, num_pools, cfg) -> List[jnp.ndarray]:
    """Fused forward of [AvgPool1d]*num_pools + ScaleDiscriminator.

    x: (N, 1, L) stacked (real & fake) audio.  Returns the 4 feature maps
    (N, C_l, L_l); the last one is the out_conv output.
    """
    n, c0, l = x.shape
    ks, st, gr = cfg["msd_kernel_sizes"], cfg["msd_strides"], cfg["msd_groups"]
    channels = cfg["msd_channels"]
    slope = cfg["lrelu_slope"]

    wmats = [_build_im2col_weight(w, b, gr[i])
             for i, (w, b) in enumerate(params["convs"])]
    wmats.append(_build_im2col_weight(params["out_conv"][0],
                                      params["out_conv"][1], 1))

    # Output shapes (same length arithmetic as the kernel).
    cur = l
    for _ in range(num_pools):
        cur = _conv_out_len(cur, 4, 2, 2)
    chans, lens = [], []
    for i in range(len(ks)):
        cur = _conv_out_len(cur, ks[i], st[i], ks[i] // 2)
        chans.append(channels[i + 1])
        lens.append(cur)
    cur = _conv_out_len(cur, 3, 1, 1)
    chans.append(1)
    lens.append(cur)

    # Scratch sizing (VMEM is plentiful at these shapes on all generations).
    k_all = list(ks) + [3]
    cin_all = [channels[i] for i in range(len(ks))] + [channels[-1]]
    max_rows = max(c * kk + 1 for c, kk in zip(cin_all, k_all))

    out_shape = [jax.ShapeDtypeStruct((n, c, ll), jnp.float32)
                 for c, ll in zip(chans, lens)]
    in_specs = [pl.BlockSpec((None, c0, l), lambda i: (i, 0, 0))]
    in_specs += [pl.BlockSpec(wm.shape, lambda i: (0, 0)) for wm in wmats]
    out_specs = [pl.BlockSpec((None, c, ll), lambda i: (i, 0, 0))
                 for c, ll in zip(chans, lens)]

    kernel = _make_scale_kernel(num_pools, tuple(ks), tuple(st), slope)
    feats = pl.pallas_call(
        kernel,
        out_shape=out_shape,
        grid=(n,),                                   # 2B >= 2 parallel rows
        in_specs=in_specs,
        out_specs=out_specs,
        scratch_shapes=[
            pltpu.VMEM((max_rows, l), jnp.float32),  # im2col assembly buffer
            pltpu.VMEM((1, l + 4), jnp.float32),     # padded-signal buffer (pool)
        ],
        compiler_params=pltpu.CompilerParams(dimension_semantics=("parallel",)),
    )(x.astype(jnp.float32), *wmats)
    return list(feats)


def multi_scale_discriminator_forward(all_params, real, fake, cfg) -> Dict[str, List]:
    """MultiScaleDiscriminator.forward.  Real & fake are stacked along batch so
    each scale is a single fused pallas_call (pool cascade recomputed in-kernel)."""
    b = real.shape[0]
    x = jnp.concatenate([real, fake], axis=0).astype(jnp.float32)   # (2B, 1, L)
    real_outs, fake_outs, real_feats, fake_feats = [], [], [], []
    for scale, params in enumerate(all_params):
        feats = scale_discriminator_forward(params, x, num_pools=scale, cfg=cfg)
        out = feats[-1].reshape(feats[-1].shape[0], -1)
        real_outs.append(out[:b])
        fake_outs.append(out[b:])
        real_feats.append([f[:b] for f in feats])
        fake_feats.append([f[b:] for f in feats])
    return {"msd_real_outs": real_outs, "msd_fake_outs": fake_outs,
            "msd_real_features": real_feats, "msd_fake_features": fake_feats}


# ----------------------------------------------------------------------------
# Pure-JAX reference (lax.conv_general_dilated) for correctness check
# ----------------------------------------------------------------------------
def _conv1d_ref(x, w, b, *, stride, padding, groups, lrelu_slope=None):
    y = lax.conv_general_dilated(
        x, w, window_strides=(stride,), padding=[(padding, padding)],
        dimension_numbers=("NCH", "OIH", "NCH"), feature_group_count=groups)
    y = y + b.reshape(1, -1, 1)
    if lrelu_slope is not None:
        y = jnp.where(y > 0, y, lrelu_slope * y)
    return y


def _msd_forward_ref(all_params, real, fake, cfg):
    ks, st, gr, sl = (cfg["msd_kernel_sizes"], cfg["msd_strides"],
                      cfg["msd_groups"], cfg["lrelu_slope"])

    def pool(x):
        c = x.shape[1]
        return _conv1d_ref(x, jnp.full((c, 1, 4), 0.25), jnp.zeros((c,)),
                           stride=2, padding=2, groups=c)

    def disc(params, x):
        feats = []
        for i, (w, b) in enumerate(params["convs"]):
            x = _conv1d_ref(x, w, b, stride=st[i], padding=ks[i] // 2,
                            groups=gr[i], lrelu_slope=sl)
            feats.append(x)
        w, b = params["out_conv"]
        x = _conv1d_ref(x, w, b, stride=1, padding=1, groups=1)
        feats.append(x)
        return x.reshape(x.shape[0], -1), feats

    ref = {"msd_real_outs": [], "msd_fake_outs": [],
           "msd_real_features": [], "msd_fake_features": []}
    for i, params in enumerate(all_params):
        if i > 0:
            real, fake = pool(real), pool(fake)
        ro, rf = disc(params, real)
        fo, ff = disc(params, fake)
        ref["msd_real_outs"].append(ro)
        ref["msd_fake_outs"].append(fo)
        ref["msd_real_features"].append(rf)
        ref["msd_fake_features"].append(ff)
    return ref


# ----------------------------------------------------------------------------
# Deterministic parameter construction (shapes from ScaleDiscriminator.__init__)
# ----------------------------------------------------------------------------
def init_params(key, cfg):
    ch, ks, gr = cfg["msd_channels"], cfg["msd_kernel_sizes"], cfg["msd_groups"]
    all_params = []
    for _ in range(3):  # 3 ScaleDiscriminators
        convs = []
        for i in range(len(ch) - 1):
            key, kw, kb = jax.random.split(key, 3)
            w = 0.1 * jax.random.normal(kw, (ch[i + 1], ch[i] // gr[i], ks[i]),
                                        jnp.float32)
            b = 0.05 * jax.random.normal(kb, (ch[i + 1],), jnp.float32)
            convs.append((w, b))
        key, kw, kb = jax.random.split(key, 3)
        w_out = 0.1 * jax.random.normal(kw, (1, ch[-1], 3), jnp.float32)
        b_out = 0.05 * jax.random.normal(kb, (1,), jnp.float32)
        all_params.append({"convs": convs, "out_conv": (w_out, b_out)})
    return all_params


if __name__ == "__main__":
    cfg = dict(
        msd_channels=[1, 8, 16, 16],
        msd_kernel_sizes=[5, 5, 5],
        msd_strides=[1, 2, 2],
        msd_groups=[1, 2, 4],
        lrelu_slope=0.1,
    )

    key = jax.random.PRNGKey(0)
    key, k_real, k_fake = jax.random.split(key, 3)
    B, L = 2, 256
    real = jax.random.normal(k_real, (B, 1, L), jnp.float32)  # NCL audio
    fake = jax.random.normal(k_fake, (B, 1, L), jnp.float32)

    params = init_params(key, cfg)

    fwd = jax.jit(lambda p, r, f: multi_scale_discriminator_forward(p, r, f, cfg))
    out = fwd(params, real, fake)
    jax.block_until_ready(out)

    # Correctness check against a pure-JAX reference (outputs AND feature maps).
    ref = _msd_forward_ref(params, real, fake, cfg)
    for name in ("msd_real_outs", "msd_fake_outs"):
        for got, want in zip(out[name], ref[name]):
            np.testing.assert_allclose(np.asarray(got), np.asarray(want),
                                       rtol=1e-3, atol=1e-3)
    for name in ("msd_real_features", "msd_fake_features"):
        for got_list, want_list in zip(out[name], ref[name]):
            for got, want in zip(got_list, want_list):
                np.testing.assert_allclose(np.asarray(got), np.asarray(want),
                                           rtol=1e-3, atol=1e-3)

    print("KERNEL_OK")
</pallas_src>

<mosaic_0001>
module attributes {stable_mosaic.version = 11 : i64} {
  func.func @kernel(%arg0: i32, %arg1: memref<1x1x256xf32, #tpu.memory_space<vmem>>, %arg2: memref<8x6xf32, #tpu.memory_space<vmem>>, %arg3: memref<16x41xf32, #tpu.memory_space<vmem>>, %arg4: memref<16x81xf32, #tpu.memory_space<vmem>>, %arg5: memref<1x49xf32, #tpu.memory_space<vmem>>, %arg6: memref<1x8x65xf32, #tpu.memory_space<vmem>>, %arg7: memref<1x16x33xf32, #tpu.memory_space<vmem>>, %arg8: memref<1x16x17xf32, #tpu.memory_space<vmem>>, %arg9: memref<1x1x17xf32, #tpu.memory_space<vmem>>, %arg10: memref<81x256xf32, #tpu.memory_space<vmem>>, %arg11: memref<1x260xf32, #tpu.memory_space<vmem>>) attributes {dimension_semantics = [#tpu.dimension_semantics<parallel>], iteration_bounds = array<i64: 4>, scalar_prefetch = 0 : i64, scratch_operands = 2 : i64, tpu.core_type = #tpu.core_type<tc>, window_params = [{transform_indices = @transform_0, window_bounds = array<i64: 1, 1, 256>}, {pipeline_mode = #tpu.pipeline_mode<synchronous>, transform_indices = @transform_1, window_bounds = array<i64: 8, 6>}, {pipeline_mode = #tpu.pipeline_mode<synchronous>, transform_indices = @transform_2, window_bounds = array<i64: 16, 41>}, {pipeline_mode = #tpu.pipeline_mode<synchronous>, transform_indices = @transform_3, window_bounds = array<i64: 16, 81>}, {pipeline_mode = #tpu.pipeline_mode<synchronous>, transform_indices = @transform_4, window_bounds = array<i64: 1, 49>}, {transform_indices = @transform_5, window_bounds = array<i64: 1, 8, 65>}, {transform_indices = @transform_6, window_bounds = array<i64: 1, 16, 33>}, {transform_indices = @transform_7, window_bounds = array<i64: 1, 16, 17>}, {transform_indices = @transform_8, window_bounds = array<i64: 1, 1, 17>}]} {
    %c0 = arith.constant 0 : index
    %c0_0 = arith.constant 0 : index
    %c0_1 = arith.constant 0 : index
    %0 = vector.load %arg1[%c0, %c0_0, %c0_1] : memref<1x1x256xf32, #tpu.memory_space<vmem>>, vector<1x1x256xf32>
    %1 = vector.shape_cast %0 : vector<1x1x256xf32> to vector<1x256xf32>
    %cst = arith.constant 0.000000e+00 : f32
    %2 = vector.broadcast %cst : f32 to vector<1x260xf32>
    %c0_2 = arith.constant 0 : index
    %c0_3 = arith.constant 0 : index
    %3 = vector.load %arg11[%c0_2, %c0_3] : memref<1x260xf32, #tpu.memory_space<vmem>>, vector<1x260xf32>
    tpu.vector_store %arg11[%c0_2, %c0_3], %2 {strides = array<i32>} : memref<1x260xf32, #tpu.memory_space<vmem>>, vector<1x260xf32>,
    %c0_4 = arith.constant 0 : index
    %c2 = arith.constant 2 : index
    %4 = vector.load %arg11[%c0_4, %c2] : memref<1x260xf32, #tpu.memory_space<vmem>>, vector<1x256xf32>
    tpu.vector_store %arg11[%c0_4, %c2], %1 {strides = array<i32>} : memref<1x260xf32, #tpu.memory_space<vmem>>, vector<1x256xf32>,
    %c0_5 = arith.constant 0 : index
    %c0_6 = arith.constant 0 : index
    %5 = vector.load %arg11[%c0_5, %c0_6] : memref<1x260xf32, #tpu.memory_space<vmem>>, vector<1x257xf32>
    %c0_7 = arith.constant 0 : index
    %c1 = arith.constant 1 : index
    %6 = vector.load %arg11[%c0_7, %c1] : memref<1x260xf32, #tpu.memory_space<vmem>>, vector<1x257xf32>
    %7 = arith.addf %5, %6 : vector<1x257xf32>
    %c0_8 = arith.constant 0 : index
    %c2_9 = arith.constant 2 : index
    %8 = vector.load %arg11[%c0_8, %c2_9] : memref<1x260xf32, #tpu.memory_space<vmem>>, vector<1x257xf32>
    %9 = arith.addf %7, %8 : vector<1x257xf32>
    %c0_10 = arith.constant 0 : index
    %c3 = arith.constant 3 : index
    %10 = vector.load %arg11[%c0_10, %c3] : memref<1x260xf32, #tpu.memory_space<vmem>>, vector<1x257xf32>
    %11 = arith.addf %9, %10 : vector<1x257xf32>
    %cst_11 = arith.constant 2.500000e-01 : f32
    %12 = vector.broadcast %cst_11 : f32 to vector<1x257xf32>
    %13 = arith.mulf %12, %11 : vector<1x257xf32>
    %14 = tpu.iota {dimensions = array<i32: 0>} : vector<257x129xi32>
    %15 = tpu.iota {dimensions = array<i32: 1>} : vector<257x129xi32>
    %c2_i32 = arith.constant 2 : i32
    %16 = vector.broadcast %c2_i32 : i32 to vector<257x129xi32>
    %17 = arith.muli %16, %15 : vector<257x129xi32>
    %18 = arith.cmpi eq, %14, %17 : vector<257x129xi32>
    %19 = arith.extui %18 : vector<257x129xi1> to vector<257x129xi32>
    %20 = arith.sitofp %19 : vector<257x129xi32> to vector<257x129xf32>
    %cst_12 = arith.constant dense<0.000000e+00> : vector<1x129xf32>
    %21 = tpu.matmul %13, %20, %cst_12 {dimension_numbers = #tpu.dot_dimension_numbers<[1], [0], [0], [1], [0, 0, 1, 1], [], []>} : vector<1x257xf32>, vector<257x129xf32>, vector<1x129xf32> -> vector<1x129xf32>
    %cst_13 = arith.constant 0.000000e+00 : f32
    %22 = vector.broadcast %cst_13 : f32 to vector<1x133xf32>
    %c0_14 = arith.constant 0 : index
    %c0_15 = arith.constant 0 : index
    %23 = vector.load %arg11[%c0_14, %c0_15] : memref<1x260xf32, #tpu.memory_space<vmem>>, vector<1x133xf32>
    tpu.vector_store %arg11[%c0_14, %c0_15], %22 {strides = array<i32>} : memref<1x260xf32, #tpu.memory_space<vmem>>, vector<1x133xf32>,
    %c0_16 = arith.constant 0 : index
    %c2_17 = arith.constant 2 : index
    %24 = vector.load %arg11[%c0_16, %c2_17] : memref<1x260xf32, #tpu.memory_space<vmem>>, vector<1x129xf32>
    tpu.vector_store %arg11[%c0_16, %c2_17], %21 {strides = array<i32>} : memref<1x260xf32, #tpu.memory_space<vmem>>, vector<1x129xf32>,
    %c0_18 = arith.constant 0 : index
    %c0_19 = arith.constant 0 : index
    %25 = vector.load %arg11[%c0_18, %c0_19] : memref<1x260xf32, #tpu.memory_space<vmem>>, vector<1x130xf32>
    %c0_20 = arith.constant 0 : index
    %c1_21 = arith.constant 1 : index
    %26 = vector.load %arg11[%c0_20, %c1_21] : memref<1x260xf32, #tpu.memory_space<vmem>>, vector<1x130xf32>
    %27 = arith.addf %25, %26 : vector<1x130xf32>
    %c0_22 = arith.constant 0 : index
    %c2_23 = arith.constant 2 : index
    %28 = vector.load %arg11[%c0_22, %c2_23] : memref<1x260xf32, #tpu.memory_space<vmem>>, vector<1x130xf32>
    %29 = arith.addf %27, %28 : vector<1x130xf32>
    %c0_24 = arith.constant 0 : index
    %c3_25 = arith.constant 3 : index
    %30 = vector.load %arg11[%c0_24, %c3_25] : memref<1x260xf32, #tpu.memory_space<vmem>>, vector<1x130xf32>
    %31 = arith.addf %29, %30 : vector<1x130xf32>
    %cst_26 = arith.constant 2.500000e-01 : f32
    %32 = vector.broadcast %cst_26 : f32 to vector<1x130xf32>
    %33 = arith.mulf %32, %31 : vector<1x130xf32>
    %34 = tpu.iota {dimensions = array<i32: 0>} : vector<130x65xi32>
    %35 = tpu.iota {dimensions = array<i32: 1>} : vector<130x65xi32>
    %c2_i32_27 = arith.constant 2 : i32
    %36 = vector.broadcast %c2_i32_27 : i32 to vector<130x65xi32>
    %37 = arith.muli %36, %35 : vector<130x65xi32>
    %38 = arith.cmpi eq, %34, %37 : vector<130x65xi32>
    %39 = arith.extui %38 : vector<130x65xi1> to vector<130x65xi32>
    %40 = arith.sitofp %39 : vector<130x65xi32> to vector<130x65xf32>
    %cst_28 = arith.constant dense<0.000000e+00> : vector<1x65xf32>
    %41 = tpu.matmul %33, %40, %cst_28 {dimension_numbers = #tpu.dot_dimension_numbers<[1], [0], [0], [1], [0, 0, 1, 1], [], []>} : vector<1x130xf32>, vector<130x65xf32>, vector<1x65xf32> -> vector<1x65xf32>
    %c0_29 = arith.constant 0 : index
    %c0_30 = arith.constant 0 : index
    %42 = vector.load %arg2[%c0_29, %c0_30] : memref<8x6xf32, #tpu.memory_space<vmem>>, vector<8x6xf32>
    %cst_31 = arith.constant 0.000000e+00 : f32
    %43 = vector.broadcast %cst_31 : f32 to vector<6x65xf32>
    %c0_32 = arith.constant 0 : index
    %c0_33 = arith.constant 0 : index
    %44 = vector.load %arg10[%c0_32, %c0_33] : memref<81x256xf32, #tpu.memory_space<vmem>>, vector<6x65xf32>
    tpu.vector_store %arg10[%c0_32, %c0_33], %43 {strides = array<i32>} : memref<81x256xf32, #tpu.memory_space<vmem>>, vector<6x65xf32>,
    %45 = vector.extract_strided_slice %41 {offsets = [0, 0], sizes = [1, 63], strides = [1, 1]} : vector<1x65xf32> to vector<1x63xf32>
    %c0_34 = arith.constant 0 : index
    %c2_35 = arith.constant 2 : index
    %46 = vector.load %arg10[%c0_34, %c2_35] : memref<81x256xf32, #tpu.memory_space<vmem>>, vector<1x63xf32>
    tpu.vector_store %arg10[%c0_34, %c2_35], %45 {strides = array<i32>} : memref<81x256xf32, #tpu.memory_space<vmem>>, vector<1x63xf32>,
    %47 = vector.extract_strided_slice %41 {offsets = [0, 0], sizes = [1, 64], strides = [1, 1]} : vector<1x65xf32> to vector<1x64xf32>
    %c1_36 = arith.constant 1 : index
    %c1_37 = arith.constant 1 : index
    %48 = vector.load %arg10[%c1_36, %c1_37] : memref<81x256xf32, #tpu.memory_space<vmem>>, vector<1x64xf32>
    tpu.vector_store %arg10[%c1_36, %c1_37], %47 {strides = array<i32>} : memref<81x256xf32, #tpu.memory_space<vmem>>, vector<1x64xf32>,
    %c2_38 = arith.constant 2 : index
    %c0_39 = arith.constant 0 : index
    %49 = vector.load %arg10[%c2_38, %c0_39] : memref<81x256xf32, #tpu.memory_space<vmem>>, vector<1x65xf32>
    tpu.vector_store %arg10[%c2_38, %c0_39], %41 {strides = array<i32>} : memref<81x256xf32, #tpu.memory_space<vmem>>, vector<1x65xf32>,
    %50 = vector.extract_strided_slice %41 {offsets = [0, 1], sizes = [1, 64], strides = [1, 1]} : vector<1x65xf32> to vector<1x64xf32>
    %c3_40 = arith.constant 3 : index
    %c0_41 = arith.constant 0 : index
    %51 = vector.load %arg10[%c3_40, %c0_41] : memref<81x256xf32, #tpu.memory_space<vmem>>, vector<1x64xf32>
    tpu.vector_store %arg10[%c3_40, %c0_41], %50 {strides = array<i32>} : memref<81x256xf32, #tpu.memory_space<vmem>>, vector<1x64xf32>,
    %52 = vector.extract_strided_slice %41 {offsets = [0, 2], sizes = [1, 63], strides = [1, 1]} : vector<1x65xf32> to vector<1x63xf32>
    %c4 = arith.constant 4 : index
    %c0_42 = arith.constant 0 : index
    %53 = vector.load %arg10[%c4, %c0_42] : memref<81x256xf32, #tpu.memory_space<vmem>>, vector<1x63xf32>
    tpu.vector_store %arg10[%c4, %c0_42], %52 {strides = array<i32>} : memref<81x256xf32, #tpu.memory_space<vmem>>, vector<1x63xf32>,
    %cst_43 = arith.constant 1.000000e+00 : f32
    %54 = vector.broadcast %cst_43 : f32 to vector<1x65xf32>
    %c5 = arith.constant 5 : index
    %c0_44 = arith.constant 0 : index
    %55 = vector.load %arg10[%c5, %c0_44] : memref<81x256xf32, #tpu.memory_space<vmem>>, vector<1x65xf32>
    tpu.vector_store %arg10[%c5, %c0_44], %54 {strides = array<i32>} : memref<81x256xf32, #tpu.memory_space<vmem>>, vector<1x65xf32>,
    %c0_45 = arith.constant 0 : index
    %c0_46 = arith.constant 0 : index
    %56 = vector.load %arg10[%c0_45, %c0_46] : memref<81x256xf32, #tpu.memory_space<vmem>>, vector<6x65xf32>
    %cst_47 = arith.constant dense<0.000000e+00> : vector<8x65xf32>
    %57 = tpu.matmul %42, %56, %cst_47 {dimension_numbers = #tpu.dot_dimension_numbers<[1], [0], [0], [1], [0, 0, 1, 1], [], []>} : vector<8x6xf32>, vector<6x65xf32>, vector<8x65xf32> -> vector<8x65xf32>
    %cst_48 = arith.constant 0.000000e+00 : f32
    %58 = vector.broadcast %cst_48 : f32 to vector<8x65xf32>
    %59 = arith.cmpf ogt, %57, %58 : vector<8x65xf32>
    %cst_49 = arith.constant 1.000000e-01 : f32
    %60 = vector.broadcast %cst_49 : f32 to vector<8x65xf32>
    %61 = arith.mulf %60, %57 : vector<8x65xf32>
    %62 = arith.select %59, %57, %61 : vector<8x65xi1>, vector<8x65xf32>
    %c0_50 = arith.constant 0 : index
    %c0_51 = arith.constant 0 : index
    %c0_52 = arith.constant 0 : index
    %63 = vector.load %arg6[%c0_50, %c0_51, %c0_52] : memref<1x8x65xf32, #tpu.memory_space<vmem>>, vector<1x8x65xf32>
    %64 = vector.shape_cast %63 : vector<1x8x65xf32> to vector<8x65xf32>
    %65 = vector.shape_cast %62 : vector<8x65xf32> to vector<1x8x65xf32>
    tpu.vector_store %arg6[%c0_50, %c0_51, %c0_52], %65 {strides = array<i32>} : memref<1x8x65xf32, #tpu.memory_space<vmem>>, vector<1x8x65xf32>,
    %c0_53 = arith.constant 0 : index
    %c0_54 = arith.constant 0 : index
    %66 = vector.load %arg3[%c0_53, %c0_54] : memref<16x41xf32, #tpu.memory_space<vmem>>, vector<16x41xf32>
    %cst_55 = arith.constant 0.000000e+00 : f32
    %67 = vector.broadcast %cst_55 : f32 to vector<41x65xf32>
    %c0_56 = arith.constant 0 : index
    %c0_57 = arith.constant 0 : index
    %68 = vector.load %arg10[%c0_56, %c0_57] : memref<81x256xf32, #tpu.memory_space<vmem>>, vector<41x65xf32>
    tpu.vector_store %arg10[%c0_56, %c0_57], %67 {strides = array<i32>} : memref<81x256xf32, #tpu.memory_space<vmem>>, vector<41x65xf32>,
    %69 = vector.extract_strided_slice %62 {offsets = [0, 0], sizes = [8, 63], strides = [1, 1]} : vector<8x65xf32> to vector<8x63xf32>
    %c0_58 = arith.constant 0 : index
    %c2_59 = arith.constant 2 : index
    %70 = vector.load %arg10[%c0_58, %c2_59] : memref<81x256xf32, #tpu.memory_space<vmem>>, vector<8x63xf32>
    tpu.vector_store %arg10[%c0_58, %c2_59], %69 {strides = array<i32>} : memref<81x256xf32, #tpu.memory_space<vmem>>, vector<8x63xf32>,
    %71 = vector.extract_strided_slice %62 {offsets = [0, 0], sizes = [8, 64], strides = [1, 1]} : vector<8x65xf32> to vector<8x64xf32>
    %c8 = arith.constant 8 : index
    %c1_60 = arith.constant 1 : index
    %72 = vector.load %arg10[%c8, %c1_60] : memref<81x256xf32, #tpu.memory_space<vmem>>, vector<8x64xf32>
    tpu.vector_store %arg10[%c8, %c1_60], %71 {strides = array<i32>} : memref<81x256xf32, #tpu.memory_space<vmem>>, vector<8x64xf32>,
    %c16 = arith.constant 16 : index
    %c0_61 = arith.constant 0 : index
    %73 = vector.load %arg10[%c16, %c0_61] : memref<81x256xf32, #tpu.memory_space<vmem>>, vector<8x65xf32>
    tpu.vector_store %arg10[%c16, %c0_61], %62 {strides = array<i32>} : memref<81x256xf32, #tpu.memory_space<vmem>>, vector<8x65xf32>,
    %74 = vector.extract_strided_slice %62 {offsets = [0, 1], sizes = [8, 64], strides = [1, 1]} : vector<8x65xf32> to vector<8x64xf32>
    %c24 = arith.constant 24 : index
    %c0_62 = arith.constant 0 : index
    %75 = vector.load %arg10[%c24, %c0_62] : memref<81x256xf32, #tpu.memory_space<vmem>>, vector<8x64xf32>
    tpu.vector_store %arg10[%c24, %c0_62], %74 {strides = array<i32>} : memref<81x256xf32, #tpu.memory_space<vmem>>, vector<8x64xf32>,
    %76 = vector.extract_strided_slice %62 {offsets = [0, 2], sizes = [8, 63], strides = [1, 1]} : vector<8x65xf32> to vector<8x63xf32>
    %c32 = arith.constant 32 : index
    %c0_63 = arith.constant 0 : index
    %77 = vector.load %arg10[%c32, %c0_63] : memref<81x256xf32, #tpu.memory_space<vmem>>, vector<8x63xf32>
    tpu.vector_store %arg10[%c32, %c0_63], %76 {strides = array<i32>} : memref<81x256xf32, #tpu.memory_space<vmem>>, vector<8x63xf32>,
    %cst_64 = arith.constant 1.000000e+00 : f32
    %78 = vector.broadcast %cst_64 : f32 to vector<1x65xf32>
    %c40 = arith.constant 40 : index
    %c0_65 = arith.constant 0 : index
    %79 = vector.load %arg10[%c40, %c0_65] : memref<81x256xf32, #tpu.memory_space<vmem>>, vector<1x65xf32>
    tpu.vector_store %arg10[%c40, %c0_65], %78 {strides = array<i32>} : memref<81x256xf32, #tpu.memory_space<vmem>>, vector<1x65xf32>,
    %c0_66 = arith.constant 0 : index
    %c0_67 = arith.constant 0 : index
    %80 = vector.load %arg10[%c0_66, %c0_67] : memref<81x256xf32, #tpu.memory_space<vmem>>, vector<41x65xf32>
    %cst_68 = arith.constant dense<0.000000e+00> : vector<16x65xf32>
    %81 = tpu.matmul %66, %80, %cst_68 {dimension_numbers = #tpu.dot_dimension_numbers<[1], [0], [0], [1], [0, 0, 1, 1], [], []>} : vector<16x41xf32>, vector<41x65xf32>, vector<16x65xf32> -> vector<16x65xf32>
    %cst_69 = arith.constant 0.000000e+00 : f32
    %82 = vector.broadcast %cst_69 : f32 to vector<16x65xf32>
    %83 = arith.cmpf ogt, %81, %82 : vector<16x65xf32>
    %cst_70 = arith.constant 1.000000e-01 : f32
    %84 = vector.broadcast %cst_70 : f32 to vector<16x65xf32>
    %85 = arith.mulf %84, %81 : vector<16x65xf32>
    %86 = arith.select %83, %81, %85 : vector<16x65xi1>, vector<16x65xf32>
    %87 = tpu.iota {dimensions = array<i32: 0>} : vector<65x33xi32>
    %88 = tpu.iota {dimensions = array<i32: 1>} : vector<65x33xi32>
    %c2_i32_71 = arith.constant 2 : i32
    %89 = vector.broadcast %c2_i32_71 : i32 to vector<65x33xi32>
    %90 = arith.muli %89, %88 : vector<65x33xi32>
    %91 = arith.cmpi eq, %87, %90 : vector<65x33xi32>
    %92 = arith.extui %91 : vector<65x33xi1> to vector<65x33xi32>
    %93 = arith.sitofp %92 : vector<65x33xi32> to vector<65x33xf32>
    %cst_72 = arith.constant dense<0.000000e+00> : vector<16x33xf32>
    %94 = tpu.matmul %86, %93, %cst_72 {dimension_numbers = #tpu.dot_dimension_numbers<[1], [0], [0], [1], [0, 0, 1, 1], [], []>} : vector<16x65xf32>, vector<65x33xf32>, vector<16x33xf32> -> vector<16x33xf32>
    %c0_73 = arith.constant 0 : index
    %c0_74 = arith.constant 0 : index
    %c0_75 = arith.constant 0 : index
    %95 = vector.load %arg7[%c0_73, %c0_74, %c0_75] : memref<1x16x33xf32, #tpu.memory_space<vmem>>, vector<1x16x33xf32>
    %96 = vector.shape_cast %95 : vector<1x16x33xf32> to vector<16x33xf32>
    %97 = vector.shape_cast %94 : vector<16x33xf32> to vector<1x16x33xf32>
    tpu.vector_store %arg7[%c0_73, %c0_74, %c0_75], %97 {strides = array<i32>} : memref<1x16x33xf32, #tpu.memory_space<vmem>>, vector<1x16x33xf32>,
    %c0_76 = arith.constant 0 : index
    %c0_77 = arith.constant 0 : index
    %98 = vector.load %arg4[%c0_76, %c0_77] : memref<16x81xf32, #tpu.memory_space<vmem>>, vector<16x81xf32>
    %cst_78 = arith.constant 0.000000e+00 : f32
    %99 = vector.broadcast %cst_78 : f32 to vector<81x33xf32>
    %c0_79 = arith.constant 0 : index
    %c0_80 = arith.constant 0 : index
    %100 = vector.load %arg10[%c0_79, %c0_80] : memref<81x256xf32, #tpu.memory_space<vmem>>, vector<81x33xf32>
    tpu.vector_store %arg10[%c0_79, %c0_80], %99 {strides = array<i32>} : memref<81x256xf32, #tpu.memory_space<vmem>>, vector<81x33xf32>,
    %101 = vector.extract_strided_slice %94 {offsets = [0, 0], sizes = [16, 31], strides = [1, 1]} : vector<16x33xf32> to vector<16x31xf32>
    %c0_81 = arith.constant 0 : index
    %c2_82 = arith.constant 2 : index
    %102 = vector.load %arg10[%c0_81, %c2_82] : memref<81x256xf32, #tpu.memory_space<vmem>>, vector<16x31xf32>
    tpu.vector_store %arg10[%c0_81, %c2_82], %101 {strides = array<i32>} : memref<81x256xf32, #tpu.memory_space<vmem>>, vector<16x31xf32>,
    %103 = vector.extract_strided_slice %94 {offsets = [0, 0], sizes = [16, 32], strides = [1, 1]} : vector<16x33xf32> to vector<16x32xf32>
    %c16_83 = arith.constant 16 : index
    %c1_84 = arith.constant 1 : index
    %104 = vector.load %arg10[%c16_83, %c1_84] : memref<81x256xf32, #tpu.memory_space<vmem>>, vector<16x32xf32>
    tpu.vector_store %arg10[%c16_83, %c1_84], %103 {strides = array<i32>} : memref<81x256xf32, #tpu.memory_space<vmem>>, vector<16x32xf32>,
    %c32_85 = arith.constant 32 : index
    %c0_86 = arith.constant 0 : index
    %105 = vector.load %arg10[%c32_85, %c0_86] : memref<81x256xf32, #tpu.memory_space<vmem>>, vector<16x33xf32>
    tpu.vector_store %arg10[%c32_85, %c0_86], %94 {strides = array<i32>} : memref<81x256xf32, #tpu.memory_space<vmem>>, vector<16x33xf32>,
    %106 = vector.extract_strided_slice %94 {offsets = [0, 1], sizes = [16, 32], strides = [1, 1]} : vector<16x33xf32> to vector<16x32xf32>
    %c48 = arith.constant 48 : index
    %c0_87 = arith.constant 0 : index
    %107 = vector.load %arg10[%c48, %c0_87] : memref<81x256xf32, #tpu.memory_space<vmem>>, vector<16x32xf32>
    tpu.vector_store %arg10[%c48, %c0_87], %106 {strides = array<i32>} : memref<81x256xf32, #tpu.memory_space<vmem>>, vector<16x32xf32>,
    %108 = vector.extract_strided_slice %94 {offsets = [0, 2], sizes = [16, 31], strides = [1, 1]} : vector<16x33xf32> to vector<16x31xf32>
    %c64 = arith.constant 64 : index
    %c0_88 = arith.constant 0 : index
    %109 = vector.load %arg10[%c64, %c0_88] : memref<81x256xf32, #tpu.memory_space<vmem>>, vector<16x31xf32>
    tpu.vector_store %arg10[%c64, %c0_88], %108 {strides = array<i32>} : memref<81x256xf32, #tpu.memory_space<vmem>>, vector<16x31xf32>,
    %cst_89 = arith.constant 1.000000e+00 : f32
    %110 = vector.broadcast %cst_89 : f32 to vector<1x33xf32>
    %c80 = arith.constant 80 : index
    %c0_90 = arith.constant 0 : index
    %111 = vector.load %arg10[%c80, %c0_90] : memref<81x256xf32, #tpu.memory_space<vmem>>, vector<1x33xf32>
    tpu.vector_store %arg10[%c80, %c0_90], %110 {strides = array<i32>} : memref<81x256xf32, #tpu.memory_space<vmem>>, vector<1x33xf32>,
    %c0_91 = arith.constant 0 : index
    %c0_92 = arith.constant 0 : index
    %112 = vector.load %arg10[%c0_91, %c0_92] : memref<81x256xf32, #tpu.memory_space<vmem>>, vector<81x33xf32>
    %cst_93 = arith.constant dense<0.000000e+00> : vector<16x33xf32>
    %113 = tpu.matmul %98, %112, %cst_93 {dimension_numbers = #tpu.dot_dimension_numbers<[1], [0], [0], [1], [0, 0, 1, 1], [], []>} : vector<16x81xf32>, vector<81x33xf32>, vector<16x33xf32> -> vector<16x33xf32>
    %cst_94 = arith.constant 0.000000e+00 : f32
    %114 = vector.broadcast %cst_94 : f32 to vector<16x33xf32>
    %115 = arith.cmpf ogt, %113, %114 : vector<16x33xf32>
    %cst_95 = arith.constant 1.000000e-01 : f32
    %116 = vector.broadcast %cst_95 : f32 to vector<16x33xf32>
    %117 = arith.mulf %116, %113 : vector<16x33xf32>
    %118 = arith.select %115, %113, %117 : vector<16x33xi1>, vector<16x33xf32>
    %119 = tpu.iota {dimensions = array<i32: 0>} : vector<33x17xi32>
    %120 = tpu.iota {dimensions = array<i32: 1>} : vector<33x17xi32>
    %c2_i32_96 = arith.constant 2 : i32
    %121 = vector.broadcast %c2_i32_96 : i32 to vector<33x17xi32>
    %122 = arith.muli %121, %120 : vector<33x17xi32>
    %123 = arith.cmpi eq, %119, %122 : vector<33x17xi32>
    %124 = arith.extui %123 : vector<33x17xi1> to vector<33x17xi32>
    %125 = arith.sitofp %124 : vector<33x17xi32> to vector<33x17xf32>
    %cst_97 = arith.constant dense<0.000000e+00> : vector<16x17xf32>
    %126 = tpu.matmul %118, %125, %cst_97 {dimension_numbers = #tpu.dot_dimension_numbers<[1], [0], [0], [1], [0, 0, 1, 1], [], []>} : vector<16x33xf32>, vector<33x17xf32>, vector<16x17xf32> -> vector<16x17xf32>
    %c0_98 = arith.constant 0 : index
    %c0_99 = arith.constant 0 : index
    %c0_100 = arith.constant 0 : index
    %127 = vector.load %arg8[%c0_98, %c0_99, %c0_100] : memref<1x16x17xf32, #tpu.memory_space<vmem>>, vector<1x16x17xf32>
    %128 = vector.shape_cast %127 : vector<1x16x17xf32> to vector<16x17xf32>
    %129 = vector.shape_cast %126 : vector<16x17xf32> to vector<1x16x17xf32>
    tpu.vector_store %arg8[%c0_98, %c0_99, %c0_100], %129 {strides = array<i32>} : memref<1x16x17xf32, #tpu.memory_space<vmem>>, vector<1x16x17xf32>,
    %c0_101 = arith.constant 0 : index
    %c0_102 = arith.constant 0 : index
    %130 = vector.load %arg5[%c0_101, %c0_102] : memref<1x49xf32, #tpu.memory_space<vmem>>, vector<1x49xf32>
    %cst_103 = arith.constant 0.000000e+00 : f32
    %131 = vector.broadcast %cst_103 : f32 to vector<49x17xf32>
    %c0_104 = arith.constant 0 : index
    %c0_105 = arith.constant 0 : index
    %132 = vector.load %arg10[%c0_104, %c0_105] : memref<81x256xf32, #tpu.memory_space<vmem>>, vector<49x17xf32>
    tpu.vector_store %arg10[%c0_104, %c0_105], %131 {strides = array<i32>} : memref<81x256xf32, #tpu.memory_space<vmem>>, vector<49x17xf32>,
    %133 = vector.extract_strided_slice %126 {offsets = [0, 0], sizes = [16, 16], strides = [1, 1]} : vector<16x17xf32> to vector<16x16xf32>
    %c0_106 = arith.constant 0 : index
    %c1_107 = arith.constant 1 : index
    %134 = vector.load %arg10[%c0_106, %c1_107] : memref<81x256xf32, #tpu.memory_space<vmem>>, vector<16x16xf32>
    tpu.vector_store %arg10[%c0_106, %c1_107], %133 {strides = array<i32>} : memref<81x256xf32, #tpu.memory_space<vmem>>, vector<16x16xf32>,
    %c16_108 = arith.constant 16 : index
    %c0_109 = arith.constant 0 : index
    %135 = vector.load %arg10[%c16_108, %c0_109] : memref<81x256xf32, #tpu.memory_space<vmem>>, vector<16x17xf32>
    tpu.vector_store %arg10[%c16_108, %c0_109], %126 {strides = array<i32>} : memref<81x256xf32, #tpu.memory_space<vmem>>, vector<16x17xf32>,
    %136 = vector.extract_strided_slice %126 {offsets = [0, 1], sizes = [16, 16], strides = [1, 1]} : vector<16x17xf32> to vector<16x16xf32>
    %c32_110 = arith.constant 32 : index
    %c0_111 = arith.constant 0 : index
    %137 = vector.load %arg10[%c32_110, %c0_111] : memref<81x256xf32, #tpu.memory_space<vmem>>, vector<16x16xf32>
    tpu.vector_store %arg10[%c32_110, %c0_111], %136 {strides = array<i32>} : memref<81x256xf32, #tpu.memory_space<vmem>>, vector<16x16xf32>,
    %cst_112 = arith.constant 1.000000e+00 : f32
    %138 = vector.broadcast %cst_112 : f32 to vector<1x17xf32>
    %c48_113 = arith.constant 48 : index
    %c0_114 = arith.constant 0 : index
    %139 = vector.load %arg10[%c48_113, %c0_114] : memref<81x256xf32, #tpu.memory_space<vmem>>, vector<1x17xf32>
    tpu.vector_store %arg10[%c48_113, %c0_114], %138 {strides = array<i32>} : memref<81x256xf32, #tpu.memory_space<vmem>>, vector<1x17xf32>,
    %c0_115 = arith.constant 0 : index
    %c0_116 = arith.constant 0 : index
    %140 = vector.load %arg10[%c0_115, %c0_116] : memref<81x256xf32, #tpu.memory_space<vmem>>, vector<49x17xf32>
    %cst_117 = arith.constant dense<0.000000e+00> : vector<1x17xf32>
    %141 = tpu.matmul %130, %140, %cst_117 {dimension_numbers = #tpu.dot_dimension_numbers<[1], [0], [0], [1], [0, 0, 1, 1], [], []>} : vector<1x49xf32>, vector<49x17xf32>, vector<1x17xf32> -> vector<1x17xf32>
    %c0_118 = arith.constant 0 : index
    %c0_119 = arith.constant 0 : index
    %c0_120 = arith.constant 0 : index
    %142 = vector.load %arg9[%c0_118, %c0_119, %c0_120] : memref<1x1x17xf32, #tpu.memory_space<vmem>>, vector<1x1x17xf32>
    %143 = vector.shape_cast %142 : vector<1x1x17xf32> to vector<1x17xf32>
    %144 = vector.shape_cast %141 : vector<1x17xf32> to vector<1x1x17xf32>
    tpu.vector_store %arg9[%c0_118, %c0_119, %c0_120], %144 {strides = array<i32>} : memref<1x1x17xf32, #tpu.memory_space<vmem>>, vector<1x1x17xf32>,
    return
  }
  func.func @transform_0(%arg0: i32) -> (i32, i32, i32) {
    %c0_i32 = arith.constant 0 : i32
    %c0_i32_0 = arith.constant 0 : i32
    %c0_i32_1 = arith.constant 0 : i32
    return %arg0, %c0_i32, %c0_i32_0 : i32, i32, i32
  }
  func.func @transform_1(%arg0: i32) -> (i32, i32) {
    %c0_i32 = arith.constant 0 : i32
    %c0_i32_0 = arith.constant 0 : i32
    %c0_i32_1 = arith.constant 0 : i32
    return %c0_i32, %c0_i32_0 : i32, i32
  }
  func.func @transform_2(%arg0: i32) -> (i32, i32) {
    %c0_i32 = arith.constant 0 : i32
    %c0_i32_0 = arith.constant 0 : i32
    %c0_i32_1 = arith.constant 0 : i32
    return %c0_i32, %c0_i32_0 : i32, i32
  }
  func.func @transform_3(%arg0: i32) -> (i32, i32) {
    %c0_i32 = arith.constant 0 : i32
    %c0_i32_0 = arith.constant 0 : i32
    %c0_i32_1 = arith.constant 0 : i32
    return %c0_i32, %c0_i32_0 : i32, i32
  }
  func.func @transform_4(%arg0: i32) -> (i32, i32) {
    %c0_i32 = arith.constant 0 : i32
    %c0_i32_0 = arith.constant 0 : i32
    %c0_i32_1 = arith.constant 0 : i32
    return %c0_i32, %c0_i32_0 : i32, i32
  }
  func.func @transform_5(%arg0: i32) -> (i32, i32, i32) {
    %c0_i32 = arith.constant 0 : i32
    %c0_i32_0 = arith.constant 0 : i32
    %c0_i32_1 = arith.constant 0 : i32
    return %arg0, %c0_i32, %c0_i32_0 : i32, i32, i32
  }
  func.func @transform_6(%arg0: i32) -> (i32, i32, i32) {
    %c0_i32 = arith.constant 0 : i32
    %c0_i32_0 = arith.constant 0 : i32
    %c0_i32_1 = arith.constant 0 : i32
    return %arg0, %c0_i32, %c0_i32_0 : i32, i32, i32
  }
  func.func @transform_7(%arg0: i32) -> (i32, i32, i32) {
    %c0_i32 = arith.constant 0 : i32
    %c0_i32_0 = arith.constant 0 : i32
    %c0_i32_1 = arith.constant 0 : i32
    return %arg0, %c0_i32, %c0_i32_0 : i32, i32, i32
  }
  func.func @transform_8(%arg0: i32) -> (i32, i32, i32) {
    %c0_i32 = arith.constant 0 : i32
    %c0_i32_0 = arith.constant 0 : i32
    %c0_i32_1 = arith.constant 0 : i32
    return %arg0, %c0_i32, %c0_i32_0 : i32, i32, i32
  }
}

module attributes {stable_mosaic.version = 11 : i64} {
  func.func @kernel(%arg0: i32, %arg1: memref<1x1x256xf32, #tpu.memory_space<vmem>>, %arg2: memref<8x6xf32, #tpu.memory_space<vmem>>, %arg3: memref<16x41xf32, #tpu.memory_space<vmem>>, %arg4: memref<16x81xf32, #tpu.memory_space<vmem>>, %arg5: memref<1x49xf32, #tpu.memory_space<vmem>>, %arg6: memref<1x8x256xf32, #tpu.memory_space<vmem>>, %arg7: memref<1x16x128xf32, #tpu.memory_space<vmem>>, %arg8: memref<1x16x64xf32, #tpu.memory_space<vmem>>, %arg9: memref<1x1x64xf32, #tpu.memory_space<vmem>>, %arg10: memref<81x256xf32, #tpu.memory_space<vmem>>, %arg11: memref<1x260xf32, #tpu.memory_space<vmem>>) attributes {dimension_semantics = [#tpu.dimension_semantics<parallel>], iteration_bounds = array<i64: 4>, scalar_prefetch = 0 : i64, scratch_operands = 2 : i64, tpu.core_type = #tpu.core_type<tc>, window_params = [{transform_indices = @transform_0, window_bounds = array<i64: 1, 1, 256>}, {pipeline_mode = #tpu.pipeline_mode<synchronous>, transform_indices = @transform_1, window_bounds = array<i64: 8, 6>}, {pipeline_mode = #tpu.pipeline_mode<synchronous>, transform_indices = @transform_2, window_bounds = array<i64: 16, 41>}, {pipeline_mode = #tpu.pipeline_mode<synchronous>, transform_indices = @transform_3, window_bounds = array<i64: 16, 81>}, {pipeline_mode = #tpu.pipeline_mode<synchronous>, transform_indices = @transform_4, window_bounds = array<i64: 1, 49>}, {transform_indices = @transform_5, window_bounds = array<i64: 1, 8, 256>}, {transform_indices = @transform_6, window_bounds = array<i64: 1, 16, 128>}, {transform_indices = @transform_7, window_bounds = array<i64: 1, 16, 64>}, {transform_indices = @transform_8, window_bounds = array<i64: 1, 1, 64>}]} {
    %c0 = arith.constant 0 : index
    %c0_0 = arith.constant 0 : index
    %c0_1 = arith.constant 0 : index
    %0 = vector.load %arg1[%c0, %c0_0, %c0_1] : memref<1x1x256xf32, #tpu.memory_space<vmem>>, vector<1x1x256xf32>
    %1 = vector.shape_cast %0 : vector<1x1x256xf32> to vector<1x256xf32>
    %c0_2 = arith.constant 0 : index
    %c0_3 = arith.constant 0 : index
    %2 = vector.load %arg2[%c0_2, %c0_3] : memref<8x6xf32, #tpu.memory_space<vmem>>, vector<8x6xf32>
    %cst = arith.constant 0.000000e+00 : f32
    %3 = vector.broadcast %cst : f32 to vector<6x256xf32>
    %c0_4 = arith.constant 0 : index
    %c0_5 = arith.constant 0 : index
    %4 = vector.load %arg10[%c0_4, %c0_5] : memref<81x256xf32, #tpu.memory_space<vmem>>, vector<6x256xf32>
    tpu.vector_store %arg10[%c0_4, %c0_5], %3 {strides = array<i32>} : memref<81x256xf32, #tpu.memory_space<vmem>>, vector<6x256xf32>,
    %5 = vector.extract_strided_slice %1 {offsets = [0, 0], sizes = [1, 254], strides = [1, 1]} : vector<1x256xf32> to vector<1x254xf32>
    %c0_6 = arith.constant 0 : index
    %c2 = arith.constant 2 : index
    %6 = vector.load %arg10[%c0_6, %c2] : memref<81x256xf32, #tpu.memory_space<vmem>>, vector<1x254xf32>
    tpu.vector_store %arg10[%c0_6, %c2], %5 {strides = array<i32>} : memref<81x256xf32, #tpu.memory_space<vmem>>, vector<1x254xf32>,
    %7 = vector.extract_strided_slice %1 {offsets = [0, 0], sizes = [1, 255], strides = [1, 1]} : vector<1x256xf32> to vector<1x255xf32>
    %c1 = arith.constant 1 : index
    %c1_7 = arith.constant 1 : index
    %8 = vector.load %arg10[%c1, %c1_7] : memref<81x256xf32, #tpu.memory_space<vmem>>, vector<1x255xf32>
    tpu.vector_store %arg10[%c1, %c1_7], %7 {strides = array<i32>} : memref<81x256xf32, #tpu.memory_space<vmem>>, vector<1x255xf32>,
    %c2_8 = arith.constant 2 : index
    %c0_9 = arith.constant 0 : index
    %9 = vector.load %arg10[%c2_8, %c0_9] : memref<81x256xf32, #tpu.memory_space<vmem>>, vector<1x256xf32>
    tpu.vector_store %arg10[%c2_8, %c0_9], %1 {strides = array<i32>} : memref<81x256xf32, #tpu.memory_space<vmem>>, vector<1x256xf32>,
    %10 = vector.extract_strided_slice %1 {offsets = [0, 1], sizes = [1, 255], strides = [1, 1]} : vector<1x256xf32> to vector<1x255xf32>
    %c3 = arith.constant 3 : index
    %c0_10 = arith.constant 0 : index
    %11 = vector.load %arg10[%c3, %c0_10] : memref<81x256xf32, #tpu.memory_space<vmem>>, vector<1x255xf32>
    tpu.vector_store %arg10[%c3, %c0_10], %10 {strides = array<i32>} : memref<81x256xf32, #tpu.memory_space<vmem>>, vector<1x255xf32>,
    %12 = vector.extract_strided_slice %1 {offsets = [0, 2], sizes = [1, 254], strides = [1, 1]} : vector<1x256xf32> to vector<1x254xf32>
    %c4 = arith.constant 4 : index
    %c0_11 = arith.constant 0 : index
    %13 = vector.load %arg10[%c4, %c0_11] : memref<81x256xf32, #tpu.memory_space<vmem>>, vector<1x254xf32>
    tpu.vector_store %arg10[%c4, %c0_11], %12 {strides = array<i32>} : memref<81x256xf32, #tpu.memory_space<vmem>>, vector<1x254xf32>,
    %cst_12 = arith.constant 1.000000e+00 : f32
    %14 = vector.broadcast %cst_12 : f32 to vector<1x256xf32>
    %c5 = arith.constant 5 : index
    %c0_13 = arith.constant 0 : index
    %15 = vector.load %arg10[%c5, %c0_13] : memref<81x256xf32, #tpu.memory_space<vmem>>, vector<1x256xf32>
    tpu.vector_store %arg10[%c5, %c0_13], %14 {strides = array<i32>} : memref<81x256xf32, #tpu.memory_space<vmem>>, vector<1x256xf32>,
    %c0_14 = arith.constant 0 : index
    %c0_15 = arith.constant 0 : index
    %16 = vector.load %arg10[%c0_14, %c0_15] : memref<81x256xf32, #tpu.memory_space<vmem>>, vector<6x256xf32>
    %cst_16 = arith.constant dense<0.000000e+00> : vector<8x256xf32>
    %17 = tpu.matmul %2, %16, %cst_16 {dimension_numbers = #tpu.dot_dimension_numbers<[1], [0], [0], [1], [0, 0, 1, 1], [], []>} : vector<8x6xf32>, vector<6x256xf32>, vector<8x256xf32> -> vector<8x256xf32>
    %cst_17 = arith.constant 0.000000e+00 : f32
    %18 = vector.broadcast %cst_17 : f32 to vector<8x256xf32>
    %19 = arith.cmpf ogt, %17, %18 : vector<8x256xf32>
    %cst_18 = arith.constant 1.000000e-01 : f32
    %20 = vector.broadcast %cst_18 : f32 to vector<8x256xf32>
    %21 = arith.mulf %20, %17 : vector<8x256xf32>
    %22 = arith.select %19, %17, %21 : vector<8x256xi1>, vector<8x256xf32>
    %c0_19 = arith.constant 0 : index
    %c0_20 = arith.constant 0 : index
    %c0_21 = arith.constant 0 : index
    %23 = vector.load %arg6[%c0_19, %c0_20, %c0_21] : memref<1x8x256xf32, #tpu.memory_space<vmem>>, vector<1x8x256xf32>
    %24 = vector.shape_cast %23 : vector<1x8x256xf32> to vector<8x256xf32>
    %25 = vector.shape_cast %22 : vector<8x256xf32> to vector<1x8x256xf32>
    tpu.vector_store %arg6[%c0_19, %c0_20, %c0_21], %25 {strides = array<i32>} : memref<1x8x256xf32, #tpu.memory_space<vmem>>, vector<1x8x256xf32>,
    %c0_22 = arith.constant 0 : index
    %c0_23 = arith.constant 0 : index
    %26 = vector.load %arg3[%c0_22, %c0_23] : memref<16x41xf32, #tpu.memory_space<vmem>>, vector<16x41xf32>
    %cst_24 = arith.constant 0.000000e+00 : f32
    %27 = vector.broadcast %cst_24 : f32 to vector<41x256xf32>
    %c0_25 = arith.constant 0 : index
    %c0_26 = arith.constant 0 : index
    %28 = vector.load %arg10[%c0_25, %c0_26] : memref<81x256xf32, #tpu.memory_space<vmem>>, vector<41x256xf32>
    tpu.vector_store %arg10[%c0_25, %c0_26], %27 {strides = array<i32>} : memref<81x256xf32, #tpu.memory_space<vmem>>, vector<41x256xf32>,
    %29 = vector.extract_strided_slice %22 {offsets = [0, 0], sizes = [8, 254], strides = [1, 1]} : vector<8x256xf32> to vector<8x254xf32>
    %c0_27 = arith.constant 0 : index
    %c2_28 = arith.constant 2 : index
    %30 = vector.load %arg10[%c0_27, %c2_28] : memref<81x256xf32, #tpu.memory_space<vmem>>, vector<8x254xf32>
    tpu.vector_store %arg10[%c0_27, %c2_28], %29 {strides = array<i32>} : memref<81x256xf32, #tpu.memory_space<vmem>>, vector<8x254xf32>,
    %31 = vector.extract_strided_slice %22 {offsets = [0, 0], sizes = [8, 255], strides = [1, 1]} : vector<8x256xf32> to vector<8x255xf32>
    %c8 = arith.constant 8 : index
    %c1_29 = arith.constant 1 : index
    %32 = vector.load %arg10[%c8, %c1_29] : memref<81x256xf32, #tpu.memory_space<vmem>>, vector<8x255xf32>
    tpu.vector_store %arg10[%c8, %c1_29], %31 {strides = array<i32>} : memref<81x256xf32, #tpu.memory_space<vmem>>, vector<8x255xf32>,
    %c16 = arith.constant 16 : index
    %c0_30 = arith.constant 0 : index
    %33 = vector.load %arg10[%c16, %c0_30] : memref<81x256xf32, #tpu.memory_space<vmem>>, vector<8x256xf32>
    tpu.vector_store %arg10[%c16, %c0_30], %22 {strides = array<i32>} : memref<81x256xf32, #tpu.memory_space<vmem>>, vector<8x256xf32>,
    %34 = vector.extract_strided_slice %22 {offsets = [0, 1], sizes = [8, 255], strides = [1, 1]} : vector<8x256xf32> to vector<8x255xf32>
    %c24 = arith.constant 24 : index
    %c0_31 = arith.constant 0 : index
    %35 = vector.load %arg10[%c24, %c0_31] : memref<81x256xf32, #tpu.memory_space<vmem>>, vector<8x255xf32>
    tpu.vector_store %arg10[%c24, %c0_31], %34 {strides = array<i32>} : memref<81x256xf32, #tpu.memory_space<vmem>>, vector<8x255xf32>,
    %36 = vector.extract_strided_slice %22 {offsets = [0, 2], sizes = [8, 254], strides = [1, 1]} : vector<8x256xf32> to vector<8x254xf32>
    %c32 = arith.constant 32 : index
    %c0_32 = arith.constant 0 : index
    %37 = vector.load %arg10[%c32, %c0_32] : memref<81x256xf32, #tpu.memory_space<vmem>>, vector<8x254xf32>
    tpu.vector_store %arg10[%c32, %c0_32], %36 {strides = array<i32>} : memref<81x256xf32, #tpu.memory_space<vmem>>, vector<8x254xf32>,
    %cst_33 = arith.constant 1.000000e+00 : f32
    %38 = vector.broadcast %cst_33 : f32 to vector<1x256xf32>
    %c40 = arith.constant 40 : index
    %c0_34 = arith.constant 0 : index
    %39 = vector.load %arg10[%c40, %c0_34] : memref<81x256xf32, #tpu.memory_space<vmem>>, vector<1x256xf32>
    tpu.vector_store %arg10[%c40, %c0_34], %38 {strides = array<i32>} : memref<81x256xf32, #tpu.memory_space<vmem>>, vector<1x256xf32>,
    %c0_35 = arith.constant 0 : index
    %c0_36 = arith.constant 0 : index
    %40 = vector.load %arg10[%c0_35, %c0_36] : memref<81x256xf32, #tpu.memory_space<vmem>>, vector<41x256xf32>
    %cst_37 = arith.constant dense<0.000000e+00> : vector<16x256xf32>
    %41 = tpu.matmul %26, %40, %cst_37 {dimension_numbers = #tpu.dot_dimension_numbers<[1], [0], [0], [1], [0, 0, 1, 1], [], []>} : vector<16x41xf32>, vector<41x256xf32>, vector<16x256xf32> -> vector<16x256xf32>
    %cst_38 = arith.constant 0.000000e+00 : f32
    %42 = vector.broadcast %cst_38 : f32 to vector<16x256xf32>
    %43 = arith.cmpf ogt, %41, %42 : vector<16x256xf32>
    %cst_39 = arith.constant 1.000000e-01 : f32
    %44 = vector.broadcast %cst_39 : f32 to vector<16x256xf32>
    %45 = arith.mulf %44, %41 : vector<16x256xf32>
    %46 = arith.select %43, %41, %45 : vector<16x256xi1>, vector<16x256xf32>
    %47 = tpu.iota {dimensions = array<i32: 0>} : vector<256x128xi32>
    %48 = tpu.iota {dimensions = array<i32: 1>} : vector<256x128xi32>
    %c2_i32 = arith.constant 2 : i32
    %49 = vector.broadcast %c2_i32 : i32 to vector<256x128xi32>
    %50 = arith.muli %49, %48 : vector<256x128xi32>
    %51 = arith.cmpi eq, %47, %50 : vector<256x128xi32>
    %52 = arith.extui %51 : vector<256x128xi1> to vector<256x128xi32>
    %53 = arith.sitofp %52 : vector<256x128xi32> to vector<256x128xf32>
    %cst_40 = arith.constant dense<0.000000e+00> : vector<16x128xf32>
    %54 = tpu.matmul %46, %53, %cst_40 {dimension_numbers = #tpu.dot_dimension_numbers<[1], [0], [0], [1], [0, 0, 1, 1], [], []>} : vector<16x256xf32>, vector<256x128xf32>, vector<16x128xf32> -> vector<16x128xf32>
    %c0_41 = arith.constant 0 : index
    %c0_42 = arith.constant 0 : index
    %c0_43 = arith.constant 0 : index
    %55 = vector.load %arg7[%c0_41, %c0_42, %c0_43] : memref<1x16x128xf32, #tpu.memory_space<vmem>>, vector<1x16x128xf32>
    %56 = vector.shape_cast %55 : vector<1x16x128xf32> to vector<16x128xf32>
    %57 = vector.shape_cast %54 : vector<16x128xf32> to vector<1x16x128xf32>
    tpu.vector_store %arg7[%c0_41, %c0_42, %c0_43], %57 {strides = array<i32>} : memref<1x16x128xf32, #tpu.memory_space<vmem>>, vector<1x16x128xf32>,
    %c0_44 = arith.constant 0 : index
    %c0_45 = arith.constant 0 : index
    %58 = vector.load %arg4[%c0_44, %c0_45] : memref<16x81xf32, #tpu.memory_space<vmem>>, vector<16x81xf32>
    %cst_46 = arith.constant 0.000000e+00 : f32
    %59 = vector.broadcast %cst_46 : f32 to vector<81x128xf32>
    %c0_47 = arith.constant 0 : index
    %c0_48 = arith.constant 0 : index
    %60 = vector.load %arg10[%c0_47, %c0_48] : memref<81x256xf32, #tpu.memory_space<vmem>>, vector<81x128xf32>
    tpu.vector_store %arg10[%c0_47, %c0_48], %59 {strides = array<i32>} : memref<81x256xf32, #tpu.memory_space<vmem>>, vector<81x128xf32>,
    %61 = vector.extract_strided_slice %54 {offsets = [0, 0], sizes = [16, 126], strides = [1, 1]} : vector<16x128xf32> to vector<16x126xf32>
    %c0_49 = arith.constant 0 : index
    %c2_50 = arith.constant 2 : index
    %62 = vector.load %arg10[%c0_49, %c2_50] : memref<81x256xf32, #tpu.memory_space<vmem>>, vector<16x126xf32>
    tpu.vector_store %arg10[%c0_49, %c2_50], %61 {strides = array<i32>} : memref<81x256xf32, #tpu.memory_space<vmem>>, vector<16x126xf32>,
    %63 = vector.extract_strided_slice %54 {offsets = [0, 0], sizes = [16, 127], strides = [1, 1]} : vector<16x128xf32> to vector<16x127xf32>
    %c16_51 = arith.constant 16 : index
    %c1_52 = arith.constant 1 : index
    %64 = vector.load %arg10[%c16_51, %c1_52] : memref<81x256xf32, #tpu.memory_space<vmem>>, vector<16x127xf32>
    tpu.vector_store %arg10[%c16_51, %c1_52], %63 {strides = array<i32>} : memref<81x256xf32, #tpu.memory_space<vmem>>, vector<16x127xf32>,
    %c32_53 = arith.constant 32 : index
    %c0_54 = arith.constant 0 : index
    %65 = vector.load %arg10[%c32_53, %c0_54] : memref<81x256xf32, #tpu.memory_space<vmem>>, vector<16x128xf32>
    tpu.vector_store %arg10[%c32_53, %c0_54], %54 {strides = array<i32>} : memref<81x256xf32, #tpu.memory_space<vmem>>, vector<16x128xf32>,
    %66 = vector.extract_strided_slice %54 {offsets = [0, 1], sizes = [16, 127], strides = [1, 1]} : vector<16x128xf32> to vector<16x127xf32>
    %c48 = arith.constant 48 : index
    %c0_55 = arith.constant 0 : index
    %67 = vector.load %arg10[%c48, %c0_55] : memref<81x256xf32, #tpu.memory_space<vmem>>, vector<16x127xf32>
    tpu.vector_store %arg10[%c48, %c0_55], %66 {strides = array<i32>} : memref<81x256xf32, #tpu.memory_space<vmem>>, vector<16x127xf32>,
    %68 = vector.extract_strided_slice %54 {offsets = [0, 2], sizes = [16, 126], strides = [1, 1]} : vector<16x128xf32> to vector<16x126xf32>
    %c64 = arith.constant 64 : index
    %c0_56 = arith.constant 0 : index
    %69 = vector.load %arg10[%c64, %c0_56] : memref<81x256xf32, #tpu.memory_space<vmem>>, vector<16x126xf32>
    tpu.vector_store %arg10[%c64, %c0_56], %68 {strides = array<i32>} : memref<81x256xf32, #tpu.memory_space<vmem>>, vector<16x126xf32>,
    %cst_57 = arith.constant 1.000000e+00 : f32
    %70 = vector.broadcast %cst_57 : f32 to vector<1x128xf32>
    %c80 = arith.constant 80 : index
    %c0_58 = arith.constant 0 : index
    %71 = vector.load %arg10[%c80, %c0_58] : memref<81x256xf32, #tpu.memory_space<vmem>>, vector<1x128xf32>
    tpu.vector_store %arg10[%c80, %c0_58], %70 {strides = array<i32>} : memref<81x256xf32, #tpu.memory_space<vmem>>, vector<1x128xf32>,
    %c0_59 = arith.constant 0 : index
    %c0_60 = arith.constant 0 : index
    %72 = vector.load %arg10[%c0_59, %c0_60] : memref<81x256xf32, #tpu.memory_space<vmem>>, vector<81x128xf32>
    %cst_61 = arith.constant dense<0.000000e+00> : vector<16x128xf32>
    %73 = tpu.matmul %58, %72, %cst_61 {dimension_numbers = #tpu.dot_dimension_numbers<[1], [0], [0], [1], [0, 0, 1, 1], [], []>} : vector<16x81xf32>, vector<81x128xf32>, vector<16x128xf32> -> vector<16x128xf32>
    %cst_62 = arith.constant 0.000000e+00 : f32
    %74 = vector.broadcast %cst_62 : f32 to vector<16x128xf32>
    %75 = arith.cmpf ogt, %73, %74 : vector<16x128xf32>
    %cst_63 = arith.constant 1.000000e-01 : f32
    %76 = vector.broadcast %cst_63 : f32 to vector<16x128xf32>
    %77 = arith.mulf %76, %73 : vector<16x128xf32>
    %78 = arith.select %75, %73, %77 : vector<16x128xi1>, vector<16x128xf32>
    %79 = tpu.iota {dimensions = array<i32: 0>} : vector<128x64xi32>
    %80 = tpu.iota {dimensions = array<i32: 1>} : vector<128x64xi32>
    %c2_i32_64 = arith.constant 2 : i32
    %81 = vector.broadcast %c2_i32_64 : i32 to vector<128x64xi32>
    %82 = arith.muli %81, %80 : vector<128x64xi32>
    %83 = arith.cmpi eq, %79, %82 : vector<128x64xi32>
    %84 = arith.extui %83 : vector<128x64xi1> to vector<128x64xi32>
    %85 = arith.sitofp %84 : vector<128x64xi32> to vector<128x64xf32>
    %cst_65 = arith.constant dense<0.000000e+00> : vector<16x64xf32>
    %86 = tpu.matmul %78, %85, %cst_65 {dimension_numbers = #tpu.dot_dimension_numbers<[1], [0], [0], [1], [0, 0, 1, 1], [], []>} : vector<16x128xf32>, vector<128x64xf32>, vector<16x64xf32> -> vector<16x64xf32>
    %c0_66 = arith.constant 0 : index
    %c0_67 = arith.constant 0 : index
    %c0_68 = arith.constant 0 : index
    %87 = vector.load %arg8[%c0_66, %c0_67, %c0_68] : memref<1x16x64xf32, #tpu.memory_space<vmem>>, vector<1x16x64xf32>
    %88 = vector.shape_cast %87 : vector<1x16x64xf32> to vector<16x64xf32>
    %89 = vector.shape_cast %86 : vector<16x64xf32> to vector<1x16x64xf32>
    tpu.vector_store %arg8[%c0_66, %c0_67, %c0_68], %89 {strides = array<i32>} : memref<1x16x64xf32, #tpu.memory_space<vmem>>, vector<1x16x64xf32>,
    %c0_69 = arith.constant 0 : index
    %c0_70 = arith.constant 0 : index
    %90 = vector.load %arg5[%c0_69, %c0_70] : memref<1x49xf32, #tpu.memory_space<vmem>>, vector<1x49xf32>
    %cst_71 = arith.constant 0.000000e+00 : f32
    %91 = vector.broadcast %cst_71 : f32 to vector<49x64xf32>
    %c0_72 = arith.constant 0 : index
    %c0_73 = arith.constant 0 : index
    %92 = vector.load %arg10[%c0_72, %c0_73] : memref<81x256xf32, #tpu.memory_space<vmem>>, vector<49x64xf32>
    tpu.vector_store %arg10[%c0_72, %c0_73], %91 {strides = array<i32>} : memref<81x256xf32, #tpu.memory_space<vmem>>, vector<49x64xf32>,
    %93 = vector.extract_strided_slice %86 {offsets = [0, 0], sizes = [16, 63], strides = [1, 1]} : vector<16x64xf32> to vector<16x63xf32>
    %c0_74 = arith.constant 0 : index
    %c1_75 = arith.constant 1 : index
    %94 = vector.load %arg10[%c0_74, %c1_75] : memref<81x256xf32, #tpu.memory_space<vmem>>, vector<16x63xf32>
    tpu.vector_store %arg10[%c0_74, %c1_75], %93 {strides = array<i32>} : memref<81x256xf32, #tpu.memory_space<vmem>>, vector<16x63xf32>,
    %c16_76 = arith.constant 16 : index
    %c0_77 = arith.constant 0 : index
    %95 = vector.load %arg10[%c16_76, %c0_77] : memref<81x256xf32, #tpu.memory_space<vmem>>, vector<16x64xf32>
    tpu.vector_store %arg10[%c16_76, %c0_77], %86 {strides = array<i32>} : memref<81x256xf32, #tpu.memory_space<vmem>>, vector<16x64xf32>,
    %96 = vector.extract_strided_slice %86 {offsets = [0, 1], sizes = [16, 63], strides = [1, 1]} : vector<16x64xf32> to vector<16x63xf32>
    %c32_78 = arith.constant 32 : index
    %c0_79 = arith.constant 0 : index
    %97 = vector.load %arg10[%c32_78, %c0_79] : memref<81x256xf32, #tpu.memory_space<vmem>>, vector<16x63xf32>
    tpu.vector_store %arg10[%c32_78, %c0_79], %96 {strides = array<i32>} : memref<81x256xf32, #tpu.memory_space<vmem>>, vector<16x63xf32>,
    %cst_80 = arith.constant 1.000000e+00 : f32
    %98 = vector.broadcast %cst_80 : f32 to vector<1x64xf32>
    %c48_81 = arith.constant 48 : index
    %c0_82 = arith.constant 0 : index
    %99 = vector.load %arg10[%c48_81, %c0_82] : memref<81x256xf32, #tpu.memory_space<vmem>>, vector<1x64xf32>
    tpu.vector_store %arg10[%c48_81, %c0_82], %98 {strides = array<i32>} : memref<81x256xf32, #tpu.memory_space<vmem>>, vector<1x64xf32>,
    %c0_83 = arith.constant 0 : index
    %c0_84 = arith.constant 0 : index
    %100 = vector.load %arg10[%c0_83, %c0_84] : memref<81x256xf32, #tpu.memory_space<vmem>>, vector<49x64xf32>
    %cst_85 = arith.constant dense<0.000000e+00> : vector<1x64xf32>
    %101 = tpu.matmul %90, %100, %cst_85 {dimension_numbers = #tpu.dot_dimension_numbers<[1], [0], [0], [1], [0, 0, 1, 1], [], []>} : vector<1x49xf32>, vector<49x64xf32>, vector<1x64xf32> -> vector<1x64xf32>
    %c0_86 = arith.constant 0 : index
    %c0_87 = arith.constant 0 : index
    %c0_88 = arith.constant 0 : index
    %102 = vector.load %arg9[%c0_86, %c0_87, %c0_88] : memref<1x1x64xf32, #tpu.memory_space<vmem>>, vector<1x1x64xf32>
    %103 = vector.shape_cast %102 : vector<1x1x64xf32> to vector<1x64xf32>
    %104 = vector.shape_cast %101 : vector<1x64xf32> to vector<1x1x64xf32>
    tpu.vector_store %arg9[%c0_86, %c0_87, %c0_88], %104 {strides = array<i32>} : memref<1x1x64xf32, #tpu.memory_space<vmem>>, vector<1x1x64xf32>,
    return
  }
  func.func @transform_0(%arg0: i32) -> (i32, i32, i32) {
    %c0_i32 = arith.constant 0 : i32
    %c0_i32_0 = arith.constant 0 : i32
    %c0_i32_1 = arith.constant 0 : i32
    return %arg0, %c0_i32, %c0_i32_0 : i32, i32, i32
  }
  func.func @transform_1(%arg0: i32) -> (i32, i32) {
    %c0_i32 = arith.constant 0 : i32
    %c0_i32_0 = arith.constant 0 : i32
    %c0_i32_1 = arith.constant 0 : i32
    return %c0_i32, %c0_i32_0 : i32, i32
  }
  func.func @transform_2(%arg0: i32) -> (i32, i32) {
    %c0_i32 = arith.constant 0 : i32
    %c0_i32_0 = arith.constant 0 : i32
    %c0_i32_1 = arith.constant 0 : i32
    return %c0_i32, %c0_i32_0 : i32, i32
  }
  func.func @transform_3(%arg0: i32) -> (i32, i32) {
    %c0_i32 = arith.constant 0 : i32
    %c0_i32_0 = arith.constant 0 : i32
    %c0_i32_1 = arith.constant 0 : i32
    return %c0_i32, %c0_i32_0 : i32, i32
  }
  func.func @transform_4(%arg0: i32) -> (i32, i32) {
    %c0_i32 = arith.constant 0 : i32
    %c0_i32_0 = arith.constant 0 : i32
    %c0_i32_1 = arith.constant 0 : i32
    return %c0_i32, %c0_i32_0 : i32, i32
  }
  func.func @transform_5(%arg0: i32) -> (i32, i32, i32) {
    %c0_i32 = arith.constant 0 : i32
    %c0_i32_0 = arith.constant 0 : i32
    %c0_i32_1 = arith.constant 0 : i32
    return %arg0, %c0_i32, %c0_i32_0 : i32, i32, i32
  }
  func.func @transform_6(%arg0: i32) -> (i32, i32, i32) {
    %c0_i32 = arith.constant 0 : i32
    %c0_i32_0 = arith.constant 0 : i32
    %c0_i32_1 = arith.constant 0 : i32
    return %arg0, %c0_i32, %c0_i32_0 : i32, i32, i32
  }
  func.func @transform_7(%arg0: i32) -> (i32, i32, i32) {
    %c0_i32 = arith.constant 0 : i32
    %c0_i32_0 = arith.constant 0 : i32
    %c0_i32_1 = arith.constant 0 : i32
    return %arg0, %c0_i32, %c0_i32_0 : i32, i32, i32
  }
  func.func @transform_8(%arg0: i32) -> (i32, i32, i32) {
    %c0_i32 = arith.constant 0 : i32
    %c0_i32_0 = arith.constant 0 : i32
    %c0_i32_1 = arith.constant 0 : i32
    return %arg0, %c0_i32, %c0_i32_0 : i32, i32, i32
  }
}

module attributes {stable_mosaic.version = 11 : i64} {
  func.func @kernel(%arg0: i32, %arg1: memref<1x1x256xf32, #tpu.memory_space<vmem>>, %arg2: memref<8x6xf32, #tpu.memory_space<vmem>>, %arg3: memref<16x41xf32, #tpu.memory_space<vmem>>, %arg4: memref<16x81xf32, #tpu.memory_space<vmem>>, %arg5: memref<1x49xf32, #tpu.memory_space<vmem>>, %arg6: memref<1x8x129xf32, #tpu.memory_space<vmem>>, %arg7: memref<1x16x65xf32, #tpu.memory_space<vmem>>, %arg8: memref<1x16x33xf32, #tpu.memory_space<vmem>>, %arg9: memref<1x1x33xf32, #tpu.memory_space<vmem>>, %arg10: memref<81x256xf32, #tpu.memory_space<vmem>>, %arg11: memref<1x260xf32, #tpu.memory_space<vmem>>) attributes {dimension_semantics = [#tpu.dimension_semantics<parallel>], iteration_bounds = array<i64: 4>, scalar_prefetch = 0 : i64, scratch_operands = 2 : i64, tpu.core_type = #tpu.core_type<tc>, window_params = [{transform_indices = @transform_0, window_bounds = array<i64: 1, 1, 256>}, {pipeline_mode = #tpu.pipeline_mode<synchronous>, transform_indices = @transform_1, window_bounds = array<i64: 8, 6>}, {pipeline_mode = #tpu.pipeline_mode<synchronous>, transform_indices = @transform_2, window_bounds = array<i64: 16, 41>}, {pipeline_mode = #tpu.pipeline_mode<synchronous>, transform_indices = @transform_3, window_bounds = array<i64: 16, 81>}, {pipeline_mode = #tpu.pipeline_mode<synchronous>, transform_indices = @transform_4, window_bounds = array<i64: 1, 49>}, {transform_indices = @transform_5, window_bounds = array<i64: 1, 8, 129>}, {transform_indices = @transform_6, window_bounds = array<i64: 1, 16, 65>}, {transform_indices = @transform_7, window_bounds = array<i64: 1, 16, 33>}, {transform_indices = @transform_8, window_bounds = array<i64: 1, 1, 33>}]} {
    %c0 = arith.constant 0 : index
    %c0_0 = arith.constant 0 : index
    %c0_1 = arith.constant 0 : index
    %0 = vector.load %arg1[%c0, %c0_0, %c0_1] : memref<1x1x256xf32, #tpu.memory_space<vmem>>, vector<1x1x256xf32>
    %1 = vector.shape_cast %0 : vector<1x1x256xf32> to vector<1x256xf32>
    %cst = arith.constant 0.000000e+00 : f32
    %2 = vector.broadcast %cst : f32 to vector<1x260xf32>
    %c0_2 = arith.constant 0 : index
    %c0_3 = arith.constant 0 : index
    %3 = vector.load %arg11[%c0_2, %c0_3] : memref<1x260xf32, #tpu.memory_space<vmem>>, vector<1x260xf32>
    tpu.vector_store %arg11[%c0_2, %c0_3], %2 {strides = array<i32>} : memref<1x260xf32, #tpu.memory_space<vmem>>, vector<1x260xf32>,
    %c0_4 = arith.constant 0 : index
    %c2 = arith.constant 2 : index
    %4 = vector.load %arg11[%c0_4, %c2] : memref<1x260xf32, #tpu.memory_space<vmem>>, vector<1x256xf32>
    tpu.vector_store %arg11[%c0_4, %c2], %1 {strides = array<i32>} : memref<1x260xf32, #tpu.memory_space<vmem>>, vector<1x256xf32>,
    %c0_5 = arith.constant 0 : index
    %c0_6 = arith.constant 0 : index
    %5 = vector.load %arg11[%c0_5, %c0_6] : memref<1x260xf32, #tpu.memory_space<vmem>>, vector<1x257xf32>
    %c0_7 = arith.constant 0 : index
    %c1 = arith.constant 1 : index
    %6 = vector.load %arg11[%c0_7, %c1] : memref<1x260xf32, #tpu.memory_space<vmem>>, vector<1x257xf32>
    %7 = arith.addf %5, %6 : vector<1x257xf32>
    %c0_8 = arith.constant 0 : index
    %c2_9 = arith.constant 2 : index
    %8 = vector.load %arg11[%c0_8, %c2_9] : memref<1x260xf32, #tpu.memory_space<vmem>>, vector<1x257xf32>
    %9 = arith.addf %7, %8 : vector<1x257xf32>
    %c0_10 = arith.constant 0 : index
    %c3 = arith.constant 3 : index
    %10 = vector.load %arg11[%c0_10, %c3] : memref<1x260xf32, #tpu.memory_space<vmem>>, vector<1x257xf32>
    %11 = arith.addf %9, %10 : vector<1x257xf32>
    %cst_11 = arith.constant 2.500000e-01 : f32
    %12 = vector.broadcast %cst_11 : f32 to vector<1x257xf32>
    %13 = arith.mulf %12, %11 : vector<1x257xf32>
    %14 = tpu.iota {dimensions = array<i32: 0>} : vector<257x129xi32>
    %15 = tpu.iota {dimensions = array<i32: 1>} : vector<257x129xi32>
    %c2_i32 = arith.constant 2 : i32
    %16 = vector.broadcast %c2_i32 : i32 to vector<257x129xi32>
    %17 = arith.muli %16, %15 : vector<257x129xi32>
    %18 = arith.cmpi eq, %14, %17 : vector<257x129xi32>
    %19 = arith.extui %18 : vector<257x129xi1> to vector<257x129xi32>
    %20 = arith.sitofp %19 : vector<257x129xi32> to vector<257x129xf32>
    %cst_12 = arith.constant dense<0.000000e+00> : vector<1x129xf32>
    %21 = tpu.matmul %13, %20, %cst_12 {dimension_numbers = #tpu.dot_dimension_numbers<[1], [0], [0], [1], [0, 0, 1, 1], [], []>} : vector<1x257xf32>, vector<257x129xf32>, vector<1x129xf32> -> vector<1x129xf32>
    %c0_13 = arith.constant 0 : index
    %c0_14 = arith.constant 0 : index
    %22 = vector.load %arg2[%c0_13, %c0_14] : memref<8x6xf32, #tpu.memory_space<vmem>>, vector<8x6xf32>
    %cst_15 = arith.constant 0.000000e+00 : f32
    %23 = vector.broadcast %cst_15 : f32 to vector<6x129xf32>
    %c0_16 = arith.constant 0 : index
    %c0_17 = arith.constant 0 : index
    %24 = vector.load %arg10[%c0_16, %c0_17] : memref<81x256xf32, #tpu.memory_space<vmem>>, vector<6x129xf32>
    tpu.vector_store %arg10[%c0_16, %c0_17], %23 {strides = array<i32>} : memref<81x256xf32, #tpu.memory_space<vmem>>, vector<6x129xf32>,
    %25 = vector.extract_strided_slice %21 {offsets = [0, 0], sizes = [1, 127], strides = [1, 1]} : vector<1x129xf32> to vector<1x127xf32>
    %c0_18 = arith.constant 0 : index
    %c2_19 = arith.constant 2 : index
    %26 = vector.load %arg10[%c0_18, %c2_19] : memref<81x256xf32, #tpu.memory_space<vmem>>, vector<1x127xf32>
    tpu.vector_store %arg10[%c0_18, %c2_19], %25 {strides = array<i32>} : memref<81x256xf32, #tpu.memory_space<vmem>>, vector<1x127xf32>,
    %27 = vector.extract_strided_slice %21 {offsets = [0, 0], sizes = [1, 128], strides = [1, 1]} : vector<1x129xf32> to vector<1x128xf32>
    %c1_20 = arith.constant 1 : index
    %c1_21 = arith.constant 1 : index
    %28 = vector.load %arg10[%c1_20, %c1_21] : memref<81x256xf32, #tpu.memory_space<vmem>>, vector<1x128xf32>
    tpu.vector_store %arg10[%c1_20, %c1_21], %27 {strides = array<i32>} : memref<81x256xf32, #tpu.memory_space<vmem>>, vector<1x128xf32>,
    %c2_22 = arith.constant 2 : index
    %c0_23 = arith.constant 0 : index
    %29 = vector.load %arg10[%c2_22, %c0_23] : memref<81x256xf32, #tpu.memory_space<vmem>>, vector<1x129xf32>
    tpu.vector_store %arg10[%c2_22, %c0_23], %21 {strides = array<i32>} : memref<81x256xf32, #tpu.memory_space<vmem>>, vector<1x129xf32>,
    %30 = vector.extract_strided_slice %21 {offsets = [0, 1], sizes = [1, 128], strides = [1, 1]} : vector<1x129xf32> to vector<1x128xf32>
    %c3_24 = arith.constant 3 : index
    %c0_25 = arith.constant 0 : index
    %31 = vector.load %arg10[%c3_24, %c0_25] : memref<81x256xf32, #tpu.memory_space<vmem>>, vector<1x128xf32>
    tpu.vector_store %arg10[%c3_24, %c0_25], %30 {strides = array<i32>} : memref<81x256xf32, #tpu.memory_space<vmem>>, vector<1x128xf32>,
    %32 = vector.extract_strided_slice %21 {offsets = [0, 2], sizes = [1, 127], strides = [1, 1]} : vector<1x129xf32> to vector<1x127xf32>
    %c4 = arith.constant 4 : index
    %c0_26 = arith.constant 0 : index
    %33 = vector.load %arg10[%c4, %c0_26] : memref<81x256xf32, #tpu.memory_space<vmem>>, vector<1x127xf32>
    tpu.vector_store %arg10[%c4, %c0_26], %32 {strides = array<i32>} : memref<81x256xf32, #tpu.memory_space<vmem>>, vector<1x127xf32>,
    %cst_27 = arith.constant 1.000000e+00 : f32
    %34 = vector.broadcast %cst_27 : f32 to vector<1x129xf32>
    %c5 = arith.constant 5 : index
    %c0_28 = arith.constant 0 : index
    %35 = vector.load %arg10[%c5, %c0_28] : memref<81x256xf32, #tpu.memory_space<vmem>>, vector<1x129xf32>
    tpu.vector_store %arg10[%c5, %c0_28], %34 {strides = array<i32>} : memref<81x256xf32, #tpu.memory_space<vmem>>, vector<1x129xf32>,
    %c0_29 = arith.constant 0 : index
    %c0_30 = arith.constant 0 : index
    %36 = vector.load %arg10[%c0_29, %c0_30] : memref<81x256xf32, #tpu.memory_space<vmem>>, vector<6x129xf32>
    %cst_31 = arith.constant dense<0.000000e+00> : vector<8x129xf32>
    %37 = tpu.matmul %22, %36, %cst_31 {dimension_numbers = #tpu.dot_dimension_numbers<[1], [0], [0], [1], [0, 0, 1, 1], [], []>} : vector<8x6xf32>, vector<6x129xf32>, vector<8x129xf32> -> vector<8x129xf32>
    %cst_32 = arith.constant 0.000000e+00 : f32
    %38 = vector.broadcast %cst_32 : f32 to vector<8x129xf32>
    %39 = arith.cmpf ogt, %37, %38 : vector<8x129xf32>
    %cst_33 = arith.constant 1.000000e-01 : f32
    %40 = vector.broadcast %cst_33 : f32 to vector<8x129xf32>
    %41 = arith.mulf %40, %37 : vector<8x129xf32>
    %42 = arith.select %39, %37, %41 : vector<8x129xi1>, vector<8x129xf32>
    %c0_34 = arith.constant 0 : index
    %c0_35 = arith.constant 0 : index
    %c0_36 = arith.constant 0 : index
    %43 = vector.load %arg6[%c0_34, %c0_35, %c0_36] : memref<1x8x129xf32, #tpu.memory_space<vmem>>, vector<1x8x129xf32>
    %44 = vector.shape_cast %43 : vector<1x8x129xf32> to vector<8x129xf32>
    %45 = vector.shape_cast %42 : vector<8x129xf32> to vector<1x8x129xf32>
    tpu.vector_store %arg6[%c0_34, %c0_35, %c0_36], %45 {strides = array<i32>} : memref<1x8x129xf32, #tpu.memory_space<vmem>>, vector<1x8x129xf32>,
    %c0_37 = arith.constant 0 : index
    %c0_38 = arith.constant 0 : index
    %46 = vector.load %arg3[%c0_37, %c0_38] : memref<16x41xf32, #tpu.memory_space<vmem>>, vector<16x41xf32>
    %cst_39 = arith.constant 0.000000e+00 : f32
    %47 = vector.broadcast %cst_39 : f32 to vector<41x129xf32>
    %c0_40 = arith.constant 0 : index
    %c0_41 = arith.constant 0 : index
    %48 = vector.load %arg10[%c0_40, %c0_41] : memref<81x256xf32, #tpu.memory_space<vmem>>, vector<41x129xf32>
    tpu.vector_store %arg10[%c0_40, %c0_41], %47 {strides = array<i32>} : memref<81x256xf32, #tpu.memory_space<vmem>>, vector<41x129xf32>,
    %49 = vector.extract_strided_slice %42 {offsets = [0, 0], sizes = [8, 127], strides = [1, 1]} : vector<8x129xf32> to vector<8x127xf32>
    %c0_42 = arith.constant 0 : index
    %c2_43 = arith.constant 2 : index
    %50 = vector.load %arg10[%c0_42, %c2_43] : memref<81x256xf32, #tpu.memory_space<vmem>>, vector<8x127xf32>
    tpu.vector_store %arg10[%c0_42, %c2_43], %49 {strides = array<i32>} : memref<81x256xf32, #tpu.memory_space<vmem>>, vector<8x127xf32>,
    %51 = vector.extract_strided_slice %42 {offsets = [0, 0], sizes = [8, 128], strides = [1, 1]} : vector<8x129xf32> to vector<8x128xf32>
    %c8 = arith.constant 8 : index
    %c1_44 = arith.constant 1 : index
    %52 = vector.load %arg10[%c8, %c1_44] : memref<81x256xf32, #tpu.memory_space<vmem>>, vector<8x128xf32>
    tpu.vector_store %arg10[%c8, %c1_44], %51 {strides = array<i32>} : memref<81x256xf32, #tpu.memory_space<vmem>>, vector<8x128xf32>,
    %c16 = arith.constant 16 : index
    %c0_45 = arith.constant 0 : index
    %53 = vector.load %arg10[%c16, %c0_45] : memref<81x256xf32, #tpu.memory_space<vmem>>, vector<8x129xf32>
    tpu.vector_store %arg10[%c16, %c0_45], %42 {strides = array<i32>} : memref<81x256xf32, #tpu.memory_space<vmem>>, vector<8x129xf32>,
    %54 = vector.extract_strided_slice %42 {offsets = [0, 1], sizes = [8, 128], strides = [1, 1]} : vector<8x129xf32> to vector<8x128xf32>
    %c24 = arith.constant 24 : index
    %c0_46 = arith.constant 0 : index
    %55 = vector.load %arg10[%c24, %c0_46] : memref<81x256xf32, #tpu.memory_space<vmem>>, vector<8x128xf32>
    tpu.vector_store %arg10[%c24, %c0_46], %54 {strides = array<i32>} : memref<81x256xf32, #tpu.memory_space<vmem>>, vector<8x128xf32>,
    %56 = vector.extract_strided_slice %42 {offsets = [0, 2], sizes = [8, 127], strides = [1, 1]} : vector<8x129xf32> to vector<8x127xf32>
    %c32 = arith.constant 32 : index
    %c0_47 = arith.constant 0 : index
    %57 = vector.load %arg10[%c32, %c0_47] : memref<81x256xf32, #tpu.memory_space<vmem>>, vector<8x127xf32>
    tpu.vector_store %arg10[%c32, %c0_47], %56 {strides = array<i32>} : memref<81x256xf32, #tpu.memory_space<vmem>>, vector<8x127xf32>,
    %cst_48 = arith.constant 1.000000e+00 : f32
    %58 = vector.broadcast %cst_48 : f32 to vector<1x129xf32>
    %c40 = arith.constant 40 : index
    %c0_49 = arith.constant 0 : index
    %59 = vector.load %arg10[%c40, %c0_49] : memref<81x256xf32, #tpu.memory_space<vmem>>, vector<1x129xf32>
    tpu.vector_store %arg10[%c40, %c0_49], %58 {strides = array<i32>} : memref<81x256xf32, #tpu.memory_space<vmem>>, vector<1x129xf32>,
    %c0_50 = arith.constant 0 : index
    %c0_51 = arith.constant 0 : index
    %60 = vector.load %arg10[%c0_50, %c0_51] : memref<81x256xf32, #tpu.memory_space<vmem>>, vector<41x129xf32>
    %cst_52 = arith.constant dense<0.000000e+00> : vector<16x129xf32>
    %61 = tpu.matmul %46, %60, %cst_52 {dimension_numbers = #tpu.dot_dimension_numbers<[1], [0], [0], [1], [0, 0, 1, 1], [], []>} : vector<16x41xf32>, vector<41x129xf32>, vector<16x129xf32> -> vector<16x129xf32>
    %cst_53 = arith.constant 0.000000e+00 : f32
    %62 = vector.broadcast %cst_53 : f32 to vector<16x129xf32>
    %63 = arith.cmpf ogt, %61, %62 : vector<16x129xf32>
    %cst_54 = arith.constant 1.000000e-01 : f32
    %64 = vector.broadcast %cst_54 : f32 to vector<16x129xf32>
    %65 = arith.mulf %64, %61 : vector<16x129xf32>
    %66 = arith.select %63, %61, %65 : vector<16x129xi1>, vector<16x129xf32>
    %67 = tpu.iota {dimensions = array<i32: 0>} : vector<129x65xi32>
    %68 = tpu.iota {dimensions = array<i32: 1>} : vector<129x65xi32>
    %c2_i32_55 = arith.constant 2 : i32
    %69 = vector.broadcast %c2_i32_55 : i32 to vector<129x65xi32>
    %70 = arith.muli %69, %68 : vector<129x65xi32>
    %71 = arith.cmpi eq, %67, %70 : vector<129x65xi32>
    %72 = arith.extui %71 : vector<129x65xi1> to vector<129x65xi32>
    %73 = arith.sitofp %72 : vector<129x65xi32> to vector<129x65xf32>
    %cst_56 = arith.constant dense<0.000000e+00> : vector<16x65xf32>
    %74 = tpu.matmul %66, %73, %cst_56 {dimension_numbers = #tpu.dot_dimension_numbers<[1], [0], [0], [1], [0, 0, 1, 1], [], []>} : vector<16x129xf32>, vector<129x65xf32>, vector<16x65xf32> -> vector<16x65xf32>
    %c0_57 = arith.constant 0 : index
    %c0_58 = arith.constant 0 : index
    %c0_59 = arith.constant 0 : index
    %75 = vector.load %arg7[%c0_57, %c0_58, %c0_59] : memref<1x16x65xf32, #tpu.memory_space<vmem>>, vector<1x16x65xf32>
    %76 = vector.shape_cast %75 : vector<1x16x65xf32> to vector<16x65xf32>
    %77 = vector.shape_cast %74 : vector<16x65xf32> to vector<1x16x65xf32>
    tpu.vector_store %arg7[%c0_57, %c0_58, %c0_59], %77 {strides = array<i32>} : memref<1x16x65xf32, #tpu.memory_space<vmem>>, vector<1x16x65xf32>,
    %c0_60 = arith.constant 0 : index
    %c0_61 = arith.constant 0 : index
    %78 = vector.load %arg4[%c0_60, %c0_61] : memref<16x81xf32, #tpu.memory_space<vmem>>, vector<16x81xf32>
    %cst_62 = arith.constant 0.000000e+00 : f32
    %79 = vector.broadcast %cst_62 : f32 to vector<81x65xf32>
    %c0_63 = arith.constant 0 : index
    %c0_64 = arith.constant 0 : index
    %80 = vector.load %arg10[%c0_63, %c0_64] : memref<81x256xf32, #tpu.memory_space<vmem>>, vector<81x65xf32>
    tpu.vector_store %arg10[%c0_63, %c0_64], %79 {strides = array<i32>} : memref<81x256xf32, #tpu.memory_space<vmem>>, vector<81x65xf32>,
    %81 = vector.extract_strided_slice %74 {offsets = [0, 0], sizes = [16, 63], strides = [1, 1]} : vector<16x65xf32> to vector<16x63xf32>
    %c0_65 = arith.constant 0 : index
    %c2_66 = arith.constant 2 : index
    %82 = vector.load %arg10[%c0_65, %c2_66] : memref<81x256xf32, #tpu.memory_space<vmem>>, vector<16x63xf32>
    tpu.vector_store %arg10[%c0_65, %c2_66], %81 {strides = array<i32>} : memref<81x256xf32, #tpu.memory_space<vmem>>, vector<16x63xf32>,
    %83 = vector.extract_strided_slice %74 {offsets = [0, 0], sizes = [16, 64], strides = [1, 1]} : vector<16x65xf32> to vector<16x64xf32>
    %c16_67 = arith.constant 16 : index
    %c1_68 = arith.constant 1 : index
    %84 = vector.load %arg10[%c16_67, %c1_68] : memref<81x256xf32, #tpu.memory_space<vmem>>, vector<16x64xf32>
    tpu.vector_store %arg10[%c16_67, %c1_68], %83 {strides = array<i32>} : memref<81x256xf32, #tpu.memory_space<vmem>>, vector<16x64xf32>,
    %c32_69 = arith.constant 32 : index
    %c0_70 = arith.constant 0 : index
    %85 = vector.load %arg10[%c32_69, %c0_70] : memref<81x256xf32, #tpu.memory_space<vmem>>, vector<16x65xf32>
    tpu.vector_store %arg10[%c32_69, %c0_70], %74 {strides = array<i32>} : memref<81x256xf32, #tpu.memory_space<vmem>>, vector<16x65xf32>,
    %86 = vector.extract_strided_slice %74 {offsets = [0, 1], sizes = [16, 64], strides = [1, 1]} : vector<16x65xf32> to vector<16x64xf32>
    %c48 = arith.constant 48 : index
    %c0_71 = arith.constant 0 : index
    %87 = vector.load %arg10[%c48, %c0_71] : memref<81x256xf32, #tpu.memory_space<vmem>>, vector<16x64xf32>
    tpu.vector_store %arg10[%c48, %c0_71], %86 {strides = array<i32>} : memref<81x256xf32, #tpu.memory_space<vmem>>, vector<16x64xf32>,
    %88 = vector.extract_strided_slice %74 {offsets = [0, 2], sizes = [16, 63], strides = [1, 1]} : vector<16x65xf32> to vector<16x63xf32>
    %c64 = arith.constant 64 : index
    %c0_72 = arith.constant 0 : index
    %89 = vector.load %arg10[%c64, %c0_72] : memref<81x256xf32, #tpu.memory_space<vmem>>, vector<16x63xf32>
    tpu.vector_store %arg10[%c64, %c0_72], %88 {strides = array<i32>} : memref<81x256xf32, #tpu.memory_space<vmem>>, vector<16x63xf32>,
    %cst_73 = arith.constant 1.000000e+00 : f32
    %90 = vector.broadcast %cst_73 : f32 to vector<1x65xf32>
    %c80 = arith.constant 80 : index
    %c0_74 = arith.constant 0 : index
    %91 = vector.load %arg10[%c80, %c0_74] : memref<81x256xf32, #tpu.memory_space<vmem>>, vector<1x65xf32>
    tpu.vector_store %arg10[%c80, %c0_74], %90 {strides = array<i32>} : memref<81x256xf32, #tpu.memory_space<vmem>>, vector<1x65xf32>,
    %c0_75 = arith.constant 0 : index
    %c0_76 = arith.constant 0 : index
    %92 = vector.load %arg10[%c0_75, %c0_76] : memref<81x256xf32, #tpu.memory_space<vmem>>, vector<81x65xf32>
    %cst_77 = arith.constant dense<0.000000e+00> : vector<16x65xf32>
    %93 = tpu.matmul %78, %92, %cst_77 {dimension_numbers = #tpu.dot_dimension_numbers<[1], [0], [0], [1], [0, 0, 1, 1], [], []>} : vector<16x81xf32>, vector<81x65xf32>, vector<16x65xf32> -> vector<16x65xf32>
    %cst_78 = arith.constant 0.000000e+00 : f32
    %94 = vector.broadcast %cst_78 : f32 to vector<16x65xf32>
    %95 = arith.cmpf ogt, %93, %94 : vector<16x65xf32>
    %cst_79 = arith.constant 1.000000e-01 : f32
    %96 = vector.broadcast %cst_79 : f32 to vector<16x65xf32>
    %97 = arith.mulf %96, %93 : vector<16x65xf32>
    %98 = arith.select %95, %93, %97 : vector<16x65xi1>, vector<16x65xf32>
    %99 = tpu.iota {dimensions = array<i32: 0>} : vector<65x33xi32>
    %100 = tpu.iota {dimensions = array<i32: 1>} : vector<65x33xi32>
    %c2_i32_80 = arith.constant 2 : i32
    %101 = vector.broadcast %c2_i32_80 : i32 to vector<65x33xi32>
    %102 = arith.muli %101, %100 : vector<65x33xi32>
    %103 = arith.cmpi eq, %99, %102 : vector<65x33xi32>
    %104 = arith.extui %103 : vector<65x33xi1> to vector<65x33xi32>
    %105 = arith.sitofp %104 : vector<65x33xi32> to vector<65x33xf32>
    %cst_81 = arith.constant dense<0.000000e+00> : vector<16x33xf32>
    %106 = tpu.matmul %98, %105, %cst_81 {dimension_numbers = #tpu.dot_dimension_numbers<[1], [0], [0], [1], [0, 0, 1, 1], [], []>} : vector<16x65xf32>, vector<65x33xf32>, vector<16x33xf32> -> vector<16x33xf32>
    %c0_82 = arith.constant 0 : index
    %c0_83 = arith.constant 0 : index
    %c0_84 = arith.constant 0 : index
    %107 = vector.load %arg8[%c0_82, %c0_83, %c0_84] : memref<1x16x33xf32, #tpu.memory_space<vmem>>, vector<1x16x33xf32>
    %108 = vector.shape_cast %107 : vector<1x16x33xf32> to vector<16x33xf32>
    %109 = vector.shape_cast %106 : vector<16x33xf32> to vector<1x16x33xf32>
    tpu.vector_store %arg8[%c0_82, %c0_83, %c0_84], %109 {strides = array<i32>} : memref<1x16x33xf32, #tpu.memory_space<vmem>>, vector<1x16x33xf32>,
    %c0_85 = arith.constant 0 : index
    %c0_86 = arith.constant 0 : index
    %110 = vector.load %arg5[%c0_85, %c0_86] : memref<1x49xf32, #tpu.memory_space<vmem>>, vector<1x49xf32>
    %cst_87 = arith.constant 0.000000e+00 : f32
    %111 = vector.broadcast %cst_87 : f32 to vector<49x33xf32>
    %c0_88 = arith.constant 0 : index
    %c0_89 = arith.constant 0 : index
    %112 = vector.load %arg10[%c0_88, %c0_89] : memref<81x256xf32, #tpu.memory_space<vmem>>, vector<49x33xf32>
    tpu.vector_store %arg10[%c0_88, %c0_89], %111 {strides = array<i32>} : memref<81x256xf32, #tpu.memory_space<vmem>>, vector<49x33xf32>,
    %113 = vector.extract_strided_slice %106 {offsets = [0, 0], sizes = [16, 32], strides = [1, 1]} : vector<16x33xf32> to vector<16x32xf32>
    %c0_90 = arith.constant 0 : index
    %c1_91 = arith.constant 1 : index
    %114 = vector.load %arg10[%c0_90, %c1_91] : memref<81x256xf32, #tpu.memory_space<vmem>>, vector<16x32xf32>
    tpu.vector_store %arg10[%c0_90, %c1_91], %113 {strides = array<i32>} : memref<81x256xf32, #tpu.memory_space<vmem>>, vector<16x32xf32>,
    %c16_92 = arith.constant 16 : index
    %c0_93 = arith.constant 0 : index
    %115 = vector.load %arg10[%c16_92, %c0_93] : memref<81x256xf32, #tpu.memory_space<vmem>>, vector<16x33xf32>
    tpu.vector_store %arg10[%c16_92, %c0_93], %106 {strides = array<i32>} : memref<81x256xf32, #tpu.memory_space<vmem>>, vector<16x33xf32>,
    %116 = vector.extract_strided_slice %106 {offsets = [0, 1], sizes = [16, 32], strides = [1, 1]} : vector<16x33xf32> to vector<16x32xf32>
    %c32_94 = arith.constant 32 : index
    %c0_95 = arith.constant 0 : index
    %117 = vector.load %arg10[%c32_94, %c0_95] : memref<81x256xf32, #tpu.memory_space<vmem>>, vector<16x32xf32>
    tpu.vector_store %arg10[%c32_94, %c0_95], %116 {strides = array<i32>} : memref<81x256xf32, #tpu.memory_space<vmem>>, vector<16x32xf32>,
    %cst_96 = arith.constant 1.000000e+00 : f32
    %118 = vector.broadcast %cst_96 : f32 to vector<1x33xf32>
    %c48_97 = arith.constant 48 : index
    %c0_98 = arith.constant 0 : index
    %119 = vector.load %arg10[%c48_97, %c0_98] : memref<81x256xf32, #tpu.memory_space<vmem>>, vector<1x33xf32>
    tpu.vector_store %arg10[%c48_97, %c0_98], %118 {strides = array<i32>} : memref<81x256xf32, #tpu.memory_space<vmem>>, vector<1x33xf32>,
    %c0_99 = arith.constant 0 : index
    %c0_100 = arith.constant 0 : index
    %120 = vector.load %arg10[%c0_99, %c0_100] : memref<81x256xf32, #tpu.memory_space<vmem>>, vector<49x33xf32>
    %cst_101 = arith.constant dense<0.000000e+00> : vector<1x33xf32>
    %121 = tpu.matmul %110, %120, %cst_101 {dimension_numbers = #tpu.dot_dimension_numbers<[1], [0], [0], [1], [0, 0, 1, 1], [], []>} : vector<1x49xf32>, vector<49x33xf32>, vector<1x33xf32> -> vector<1x33xf32>
    %c0_102 = arith.constant 0 : index
    %c0_103 = arith.constant 0 : index
    %c0_104 = arith.constant 0 : index
    %122 = vector.load %arg9[%c0_102, %c0_103, %c0_104] : memref<1x1x33xf32, #tpu.memory_space<vmem>>, vector<1x1x33xf32>
    %123 = vector.shape_cast %122 : vector<1x1x33xf32> to vector<1x33xf32>
    %124 = vector.shape_cast %121 : vector<1x33xf32> to vector<1x1x33xf32>
    tpu.vector_store %arg9[%c0_102, %c0_103, %c0_104], %124 {strides = array<i32>} : memref<1x1x33xf32, #tpu.memory_space<vmem>>, vector<1x1x33xf32>,
    return
  }
  func.func @transform_0(%arg0: i32) -> (i32, i32, i32) {
    %c0_i32 = arith.constant 0 : i32
    %c0_i32_0 = arith.constant 0 : i32
    %c0_i32_1 = arith.constant 0 : i32
    return %arg0, %c0_i32, %c0_i32_0 : i32, i32, i32
  }
  func.func @transform_1(%arg0: i32) -> (i32, i32) {
    %c0_i32 = arith.constant 0 : i32
    %c0_i32_0 = arith.constant 0 : i32
    %c0_i32_1 = arith.constant 0 : i32
    return %c0_i32, %c0_i32_0 : i32, i32
  }
  func.func @transform_2(%arg0: i32) -> (i32, i32) {
    %c0_i32 = arith.constant 0 : i32
    %c0_i32_0 = arith.constant 0 : i32
    %c0_i32_1 = arith.constant 0 : i32
    return %c0_i32, %c0_i32_0 : i32, i32
  }
  func.func @transform_3(%arg0: i32) -> (i32, i32) {
    %c0_i32 = arith.constant 0 : i32
    %c0_i32_0 = arith.constant 0 : i32
    %c0_i32_1 = arith.constant 0 : i32
    return %c0_i32, %c0_i32_0 : i32, i32
  }
  func.func @transform_4(%arg0: i32) -> (i32, i32) {
    %c0_i32 = arith.constant 0 : i32
    %c0_i32_0 = arith.constant 0 : i32
    %c0_i32_1 = arith.constant 0 : i32
    return %c0_i32, %c0_i32_0 : i32, i32
  }
  func.func @transform_5(%arg0: i32) -> (i32, i32, i32) {
    %c0_i32 = arith.constant 0 : i32
    %c0_i32_0 = arith.constant 0 : i32
    %c0_i32_1 = arith.constant 0 : i32
    return %arg0, %c0_i32, %c0_i32_0 : i32, i32, i32
  }
  func.func @transform_6(%arg0: i32) -> (i32, i32, i32) {
    %c0_i32 = arith.constant 0 : i32
    %c0_i32_0 = arith.constant 0 : i32
    %c0_i32_1 = arith.constant 0 : i32
    return %arg0, %c0_i32, %c0_i32_0 : i32, i32, i32
  }
  func.func @transform_7(%arg0: i32) -> (i32, i32, i32) {
    %c0_i32 = arith.constant 0 : i32
    %c0_i32_0 = arith.constant 0 : i32
    %c0_i32_1 = arith.constant 0 : i32
    return %arg0, %c0_i32, %c0_i32_0 : i32, i32, i32
  }
  func.func @transform_8(%arg0: i32) -> (i32, i32, i32) {
    %c0_i32 = arith.constant 0 : i32
    %c0_i32_0 = arith.constant 0 : i32
    %c0_i32_1 = arith.constant 0 : i32
    return %arg0, %c0_i32, %c0_i32_0 : i32, i32, i32
  }
}

</mosaic_0001>

<bundles_post_ra>
// kernel: _lambda_.3
= control target key start
LH: loop header
LB: loop body
LE: loop exit
PB: predicated region body
PF: predicated region fallthrough
CT: control target
= control target key end

     0   :  { %s1813_s27 = smov 0   ;;  %s2213_s0 = inlined_call_operand.vmem [shape: f32[4,1,256], index: 0, kind: input, shape index: {}]   ;;  %s2214_s1 = inlined_call_operand.vmem [shape: f32[8,6], index: 1, kind: input, shape index: {}]   ;;  %s2215_s2 = inlined_call_operand.vmem [shape: f32[16,41], index: 2, kind: input, shape index: {}]   ;;  %s2216_s3 = inlined_call_operand.vmem [shape: f32[16,81], index: 3, kind: input, shape index: {}]   ;;  %s2217_s4 = inlined_call_operand.vmem [shape: f32[1,49], index: 4, kind: input, shape index: {}]   ;;  %s2218_s5 = inlined_call_operand.vmem [shape: f32[4,8,256], index: 5, kind: output, shape index: {0}]   ;;  %s2219_s6 = inlined_call_operand.vmem [shape: f32[4,16,128], index: 6, kind: output, shape index: {1}]   ;;  %s2220_s7 = inlined_call_operand.vmem [shape: f32[4,16,64], index: 7, kind: output, shape index: {2}]   ;;  %s2221_s8 = inlined_call_operand.vmem [shape: f32[4,1,64], index: 8, kind: output, shape index: {3}]  }
   0x1 LB: > { %s1362_s28 = sadd.s32 4294967295, %s1756_s27   ;;  %p1366_p0 = scmp.ge.s32.totalorder %s1756_s27, 1  ;;  %s1756_s27 = sphi %s1813_s27, %s19_s27  }
   0x2   : > { %p268_p1 = scmp.lt.s32.totalorder %s1756_s27, 5 }
   0x4   : > { %p269_p2 = pnand %p1366_p0, %p268_p1 }
   0x5   : > { %p1821_p3 = scmp.lt.s32.totalorder (!%p269_p2), %s1362_s28, 3  ;;  %v347_v0 = vlaneseq (!%p269_p2)  ;;  %v1758_v1 = vmov (!%p269_p2), 0.0   ;;  %v1759_v3 = vmov (!%p269_p2), 1.0   ;;  %s1760_s12 = smov (!%p269_p2), 127   ;;  %vm2223_vm5 = vcmask (!%p269_p2), 1039360   ;;  %v337_v21 = vld [vmem:[%s2214_s1] sm:$0xff] (!%p269_p2) }
   0x6   : > { %272 = sbr.rel (%p269_p2) target bundleno = 1872 (0x750), region = 40  ;;  %338 = vst [vmem:[#allocation2] sm:$0x3f] (!%p269_p2), %v1758_v1  ;;  %339 = vst [vmem:[#allocation2 + $0x8] sm:$0x3f] (!%p269_p2), %v1758_v1  ;;  %471 = vmatprep.mubr.f32.mxu1 (!%p269_p2), %v1758_v1  ;;  %s1761_s13 = smov (!%p269_p2), 2  }
   0x7   : > { %881 = vst [vmem:[#allocation2 + $0xa0] sm:$0x1] (!%p269_p2), %v1758_v1  ;;  %490 = vst [vmem:[#allocation2 + $0x10] sm:$0xff] (!%p269_p2), %v1758_v1  ;;  %vm1845_vm0 = vcmp.lt.s32.totalorder (!%p269_p2), %v347_v0, 256  ;;  %vm1857_vm1 = vcmp.ge.s32.totalorder (!%p269_p2), %v347_v0, 2  ;;  %vm1862_vm2 = vcmp.ge.s32.totalorder (!%p269_p2), %v347_v0, 1 }
   0x8   : > { %495 = vst [vmem:[#allocation2 + $0x38] sm:$0xff] (!%p269_p2), %v1758_v1  ;;  %497 = vst [vmem:[#allocation2 + $0x48] sm:$0xff] (!%p269_p2), %v1758_v1  ;;  %s1762_s14 = smov (!%p269_p2), 126   ;;  %s1763_s15 = smov (!%p269_p2), 1   ;;  %vm344_vm6 = vcmask (!%p269_p2), 15360   ;;  %vm375_vm7 = vcmp.lt.s32.totalorder (!%p269_p2), %v347_v0, 255 }
   0x9   : > { %498 = vst [vmem:[#allocation2 + $0x50] sm:$0x1] (!%p269_p2), %v1758_v1  ;;  %499 = vst [vmem:[#allocation2 + $0x58] sm:$0x1] (!%p269_p2), %v1758_v1  ;;  %vm2222_vm8 = vcmask (!%p269_p2), 1031168   ;;  %vm2224_vm9 = vcmask (!%p269_p2), 7168  }
   0xa   : > { %877 = vst [vmem:[#allocation2 + $0x60] sm:$0xff] (!%p269_p2), %v1758_v1  ;;  %878 = vst [vmem:[#allocation2 + $0x70] sm:$0xff] (!%p269_p2), %v1758_v1  ;;  %vm386_vm10 = vcmp.lt.s32.totalorder (!%p269_p2), %v347_v0, 254  ;;  %vm400_vm11 = vcmask (!%p269_p2), 1045504   ;;  %vm396_vm12 = vcmask (!%p269_p2), 48128   ;;  %v694_v28 = vand.u32 (!%p269_p2), 127, %v347_v0 }
   0xb   : > { %879 = vst [vmem:[#allocation2 + $0x80] sm:$0xff] (!%p269_p2), %v1758_v1  ;;  %880 = vst [vmem:[#allocation2 + $0x90] sm:$0xff] (!%p269_p2), %v1758_v1  ;;  %v1936_v29 = vshrl.u32 (!%p269_p2), %v347_v0, 7  ;;  %v1764_v39 = vmov (!%p269_p2), 1.0|1.0  }
   0xc   : > { %873 = vst [vmem:[#allocation2 + $0x20] sm:$0xff] (!%p269_p2), %v1758_v1  ;;  %874 = vst [vmem:[#allocation2 + $0x30] sm:$0xff] (!%p269_p2), %v1758_v1  ;;  %v1938_v30 = vmul.u32 (!%p269_p2), 2, %v694_v28 }
   0xd   : > { %s2258_s28 = smov (!%p1821_p3, %s1362_s28), 3  ;;  %918 = vst [vmem:[#allocation2 + $0xa0] sm:$0x1] %v1759_v3  ;;  %392 = vst.msk [vmem:[#allocation2 + $0x5] ss:$8 sm:$0x3] %vm1845_vm0, %v1759_v3 }
   0xe   : > { %543 = vst.msk [vmem:[#allocation2 + $0x50] ss:$8 sm:$0x3] %vm1845_vm0, %v1759_v3  ;;  %s1367_s30 = sshll.u32 %s2258_s28, 1  ;;  %vm350_vm3 = vmand %vm1857_vm1, %vm1845_vm0  ;;  %s1906_s18 = sshll.u32 %s2258_s28, 4  ;;  %v677_v31 = vadd.s32 128, %v1936_v29  ;;  %vm696_vm15 = vcmp.eq.s32.totalorder %v1936_v29, %v1938_v30 }
   0xf   : > { %s317_s11 = scalar_lea.vmem %s2213_s0, %s1367_s30  ;;  %vm360_vm4 = vmand %vm1862_vm2, %vm1845_vm0  ;;  %s322_s21 = scalar_lea.vmem %s2218_s5, %s1906_s18  ;;  %v678_v32 = vadd.s32 136, %v1936_v29  ;;  %v662_v33 = vadd.s32 8, %v1936_v29  ;;  %v679_v34 = vadd.s32 144, %v1936_v29  ;;  %v680_v35 = vadd.s32 152, %v1936_v29 }
  0x10   : > { %v336_v6 = vld [vmem:[%s317_s11] sm:$0x3]  ;;  %v663_v36 = vadd.s32 16, %v1936_v29  ;;  %v664_v37 = vadd.s32 24, %v1936_v29  ;;  %v681_v38 = vadd.s32 160, %v1936_v29  ;;  %v682_v41 = vadd.s32 168, %v1936_v29  ;;  %s327_s30 = scalar_lea.vmem %s2219_s6, %s1906_s18  ;;  %s332_s17 = scalar_lea.vmem %s2220_s7, %s1906_s18 }
  0x11   : > { %369 = vrot.lane.b32.xlu1 %v336_v6, %s1760_s12  ;;  %367 = vst.msk [vmem:[#allocation2 + $0x2] ss:$8 sm:$0x3] %vm1845_vm0, %v336_v6  ;;  %341 = vrot.lane.b32.xlu0 %v336_v6, %s1761_s13  ;;  %vm712_vm0 = vcmp.eq.s32.totalorder %v677_v31, %v1938_v30  ;;  %vm713_vm1 = vcmp.eq.s32.totalorder %v678_v32, %v1938_v30  ;;  %v665_v42 = vadd.s32 32, %v1936_v29  ;;  %v666_v43 = vadd.s32 40, %v1936_v29  ;;  %s335_s20 = scalar_lea.vmem %s2221_s8, %s2258_s28 }
  0x12   : > { %vm697_vm2 = vcmp.eq.s32.totalorder %v662_v33, %v1938_v30  ;;  %v683_v44 = vadd.s32 176, %v1936_v29  ;;  %v684_v45 = vadd.s32 184, %v1936_v29  ;;  %v667_v47 = vadd.s32 48, %v1936_v29 }
  0x13   : > { %v668_v48 = vadd.s32 56, %v1936_v29  ;;  %v685_v49 = vadd.s32 192, %v1936_v29  ;;  %v686_v50 = vadd.s32 200, %v1936_v29  ;;  %v669_v52 = vadd.s32 64, %v1936_v29 }
  0x14   : > { %v670_v53 = vadd.s32 72, %v1936_v29  ;;  %v687_v54 = vadd.s32 208, %v1936_v29  ;;  %v688_v55 = vadd.s32 216, %v1936_v29  ;;  %v671_v57 = vadd.s32 80, %v1936_v29 }
  0x15   : > { %380 = vrot.lane.b32.xlu1 %v336_v6, %s1762_s14  ;;  %353 = vrot.lane.b32.xlu0 %v336_v6, %s1763_s15  ;;  %v672_v58 = vadd.s32 88, %v1936_v29  ;;  %v689_v59 = vadd.s32 224, %v1936_v29  ;;  %v690_v60 = vadd.s32 232, %v1936_v29  ;;  %v673_v62 = vadd.s32 96, %v1936_v29 }
  0x16   : > { %v674_v63 = vadd.s32 104, %v1936_v29  ;;  %v691_v32 = vadd.s32 240, %v1936_v29  ;;  %v692_v33 = vadd.s32 248, %v1936_v29 }
  0x83   : > { %v370_v7 = vpop.permute.xlu1 %369  ;;  %v342_v8 = vpop.permute.xlu0 %341 }
  0x84   : > { %v371_v9 = vrot.slane %v370_v7, 1  ;;  %v343_v10 = vrot.slane %v342_v8, 7 }
  0x86   : > { %v373_v11 = vsel %vm2223_vm5, %v370_v7, %v371_v9  ;;  %v345_v12 = vsel %vm344_vm6, %v343_v10, %v342_v8  ;;  %vm723_vm5 = vcmp.eq.s32.totalorder %v688_v55, %v1938_v30 }
  0x87   : > { %378 = vst.msk [vmem:[#allocation2 + $0x3] ss:$8 sm:$0x3] %vm375_vm7, %v373_v11  ;;  %v381_v13 = vpop.permute.xlu1 %380  ;;  %v354_v14 = vpop.permute.xlu0 %353  ;;  %vm715_vm7 = vcmp.eq.s32.totalorder %v680_v35, %v1938_v30  ;;  %v676_v35 = vadd.s32 120, %v1936_v29 }
  0x88   : > { %351 = vst.msk [vmem:[#allocation2] ss:$8 sm:$0x3] %vm350_vm3, %v345_v12  ;;  %v382_v15 = vrot.slane %v381_v13, 1  ;;  %v355_v16 = vrot.slane %v354_v14, 7  ;;  %vm1639_vm3 = vmpackc.low %vm713_vm1, %vm712_vm0  ;;  %vm717_vm0 = vcmp.eq.s32.totalorder %v682_v41, %v1938_v30 }
  0x89   : > { %1640 = vmatprep.subr.msk.bf16.mxu0 %vm1639_vm3, %v1764_v39  ;;  %vm701_vm3 = vcmp.eq.s32.totalorder %v666_v43, %v1938_v30 }
  0x8a   : > { %v384_v17 = vsel %vm2222_vm8, %v381_v13, %v382_v15  ;;  %v357_v18 = vsel %vm2224_vm9, %v355_v16, %v354_v14  ;;  %vm721_vm8 = vcmp.eq.s32.totalorder %v686_v50, %v1938_v30  ;;  %vm725_vm9 = vcmp.eq.s32.totalorder %v690_v60, %v1938_v30 }
  0x8b   : > { %389 = vst.msk [vmem:[#allocation2 + $0x4] ss:$8 sm:$0x3] %vm386_vm10, %v384_v17  ;;  %vm698_vm10 = vcmp.eq.s32.totalorder %v663_v36, %v1938_v30 }
  0x8c   : > { %362 = vst.msk [vmem:[#allocation2 + $0x1] ss:$8 sm:$0x3] %vm360_vm4, %v357_v18  ;;  %vm714_vm4 = vcmp.eq.s32.totalorder %v679_v34, %v1938_v30  ;;  %v675_v34 = vadd.s32 112, %v1936_v29 }
  0x93   : > { %v395_v19 = vld [vmem:[#allocation2 + $0x8] sm:$0x3f]  ;;  %v394_v20 = vld [vmem:[#allocation2] sm:$0x3f] }
  0x94   : > { %1374 = vmatprep.subr.msk.mxu1 %vm400_vm11, %v395_v19  ;;  %488 = vst [vmem:[#allocation2] sm:$0xff] %v1758_v1 }
  0x95   : > { %1375 = vmatpush1.msk.msra.mxu1 %vm400_vm11, %v394_v20  ;;  %vm1960_vm11 = vmpackc.low %vm697_vm2, %vm696_vm15  ;;  %vm700_vm2 = vcmp.eq.s32.totalorder %v665_v42, %v1938_v30 }
  0x96   : > { %1376 = vmatmul.mubr.msk.f32.vlgmr.msra.gmra.mrb[0].mxu1 %vm396_vm12, %v337_v21  ;;  %vm699_vm12 = vcmp.eq.s32.totalorder %v664_v37, %v1938_v30  ;;  %1642 = vmatpush3.bf16.msk.msra.mxu0 %vm1960_vm11, %v1764_v39 }
  0x97   : > { %635 = vmatprep.mubr.f32.mxu1 %v1758_v1  ;;  %vm1977_vm15 = vmpackc.low %vm699_vm12, %vm698_vm10 }
  0x98   : > { %vm1994_vm10 = vmpackc.low %vm701_vm3, %vm700_vm2  ;;  %vm704_vm3 = vcmp.eq.s32.totalorder %v669_v52, %v1938_v30 }
 0x169   : > { %v473_v22 = vpop.f32.mrb[0].mxu1 }
 0x16a   : > { %vm478_vm13 = vcmp.gt.f32.partialorder %v473_v22, 0.0  ;;  %v480_v23 = vmul.f32 0.1, %v473_v22  ;;  %v475_v24 = vpop.f32.mrb[1].mxu1 }
 0x16b   : > { %vm479_vm14 = vcmp.gt.f32.partialorder %v475_v24, 0.0  ;;  %v481_v25 = vmul.f32 0.1, %v475_v24 }
 0x16c   : > { %v1912_v26 = vsel %vm478_vm13, %v473_v22, %v480_v23  ;;  %vm1643_vm13 = vmpackc.low %vm715_vm7, %vm714_vm4  ;;  %vm718_vm4 = vcmp.eq.s32.totalorder %v683_v44, %v1938_v30  ;;  %vm719_vm7 = vcmp.eq.s32.totalorder %v684_v45, %v1938_v30  ;;  %v556_v22 = vld [vmem:[#allocation2 + $0x58] sm:$0x1]  ;;  %v555_v23 = vld [vmem:[#allocation2 + $0x50] sm:$0x1] }
 0x16d   : > { %v1914_v27 = vsel %vm479_vm14, %v475_v24, %v481_v25  ;;  %502 = vrot.lane.b32.xlu0 %v1912_v26, %s1761_s13  ;;  %484 = vst [vmem:[%s322_s21] sm:$0xff] %v1912_v26  ;;  %vm716_vm14 = vcmp.eq.s32.totalorder %v681_v38, %v1938_v30  ;;  %1644 = vmatprep.subr.msk.bf16.mxu0 %vm1643_vm13, %v1764_v39  ;;  %vm1651_vm12 = vmpackc.low %vm719_vm7, %vm718_vm4 }
 0x16e   : > { %504 = vrot.lane.b32.xlu1 %v1914_v27, %s1761_s13  ;;  %485 = vst [vmem:[%s322_s21 + $0x8] sm:$0xff] %v1914_v27  ;;  %vm1647_vm1 = vmpackc.low %vm717_vm0, %vm716_vm14  ;;  %1646 = vmatpush3.bf16.msk.msra.mxu0 %vm1977_vm15, %v1764_v39  ;;  %vm702_vm13 = vcmp.eq.s32.totalorder %v667_v47, %v1938_v30  ;;  %vm703_vm14 = vcmp.eq.s32.totalorder %v668_v48, %v1938_v30 }
 0x16f   : > { %1648 = vmatprep.subr.msk.bf16.mxu0 %vm1647_vm1, %v1764_v39  ;;  %vm720_vm0 = vcmp.eq.s32.totalorder %v685_v49, %v1938_v30  ;;  %vm2010_vm1 = vmpackc.low %vm703_vm14, %vm702_vm13  ;;  %vm705_vm4 = vcmp.eq.s32.totalorder %v670_v53, %v1938_v30  ;;  %vm722_vm7 = vcmp.eq.s32.totalorder %v687_v54, %v1938_v30  ;;  %vm706_vm13 = vcmp.eq.s32.totalorder %v671_v57, %v1938_v30  ;;  %v869_v54 = vld [vmem:[%s2216_s3] sm:$0xff] }
 0x170   : > { %vm1655_vm2 = vmpackc.low %vm721_vm8, %vm720_vm0  ;;  %vm707_vm14 = vcmp.eq.s32.totalorder %v672_v58, %v1938_v30  ;;  %vm724_vm0 = vcmp.eq.s32.totalorder %v689_v59, %v1938_v30 }
 0x171   : > { %512 = vrot.lane.b32.xlu0 %v1912_v26, %s1763_s15  ;;  %vm2026_vm8 = vmpackc.low %vm705_vm4, %vm704_vm3  ;;  %vm708_vm3 = vcmp.eq.s32.totalorder %v673_v62, %v1938_v30  ;;  %vm709_vm4 = vcmp.eq.s32.totalorder %v674_v63, %v1938_v30 }
 0x172   : > { %514 = vrot.lane.b32.xlu1 %v1914_v27, %s1763_s15  ;;  %1650 = vmatpush3.bf16.msk.msra.mxu0 %vm1994_vm10, %v1764_v39 }
 0x173   : > { %1652 = vmatprep.subr.msk.bf16.mxu0 %vm1651_vm12, %v1764_v39  ;;  %vm1659_vm12 = vmpackc.low %vm723_vm5, %vm722_vm7 }
 0x174   : > { %vm1663_vm5 = vmpackc.low %vm725_vm9, %vm724_vm0  ;;  %vm519_vm9 = vcmask 1047560  }
 0x175   : > { %524 = vrot.lane.b32.xlu0 %v1912_v26, %s1760_s12  ;;  %vm2050_vm7 = vmpackc.low %vm709_vm4, %vm708_vm3  ;;  %vm1765_vm4 = vmmov 1  }
 0x176   : > { %526 = vrot.lane.b32.xlu1 %v1914_v27, %s1760_s12  ;;  %1654 = vmatpush3.bf16.msk.msra.mxu0 %vm2010_vm1, %v1764_v39 }
 0x177   : > { %1656 = vmatprep.subr.msk.bf16.mxu0 %vm1655_vm2, %v1764_v39  ;;  %vm2040_vm2 = vmpackc.low %vm707_vm14, %vm706_vm13  ;;  %vm2246_vm13 = vcmask 7168   ;;  %vm2247_vm14 = vcmask 1039360  }
 0x178   : > { %vm2249_vm0 = vmmov %vm2247_vm14 }
 0x179   : > { %533 = vrot.lane.b32.xlu0 %v1912_v26, %s1762_s14 }
 0x17a   : > { %535 = vrot.lane.b32.xlu1 %v1914_v27, %s1762_s14  ;;  %1658 = vmatpush3.bf16.msk.msra.mxu0 %vm2026_vm8, %v1764_v39 }
 0x17b   : > { %1660 = vmatprep.subr.msk.bf16.mxu0 %vm1659_vm12, %v1764_v39  ;;  %vm509_vm12 = vcmask 1047568  }
 0x17e   : > { %1662 = vmatpush3.bf16.msk.msra.mxu0 %vm2040_vm2, %v1764_v39 }
 0x17f   : > { %1664 = vmatprep.subr.msk.bf16.mxu0 %vm1663_vm5, %v1764_v39  ;;  %vm564_vm5 = vcmask 1040384  }
 0x182   : > { %1666 = vmatpush3.bf16.msk.msra.mxu0 %vm2050_vm7, %v1764_v39 }
 0x1df   : > { %v503_v4 = vpop.permute.xlu0 %502 }
 0x1e0   : > { %510 = vst.msk [vmem:[#allocation2] sm:$0xff] %vm509_vm12, %v503_v4  ;;  %v505_v5 = vpop.permute.xlu1 %504 }
 0x1e1   : > { %v506_v6 = vsel %vm344_vm6, %v503_v4, %v505_v5  ;;  %vm2248_vm6 = vcmask 1031168  }
 0x1e2   : > { %511 = vst [vmem:[#allocation2 + $0x8] sm:$0xff] %v506_v6  ;;  %vm2250_vm3 = vmmov %vm2248_vm6 }
 0x1e3   : > { %v513_v7 = vpop.permute.xlu0 %512 }
 0x1e4   : > { %520 = vst.msk [vmem:[#allocation2 + $0x10] sm:$0xff] %vm519_vm9, %v513_v7  ;;  %v515_v8 = vpop.permute.xlu1 %514 }
 0x1e5   : > { %v516_v9 = vsel %vm2246_vm13, %v513_v7, %v515_v8  ;;  %vm1634_vm13 = vmpackc.low %vm564_vm5, %vm1765_vm4  ;;  %vm710_vm4 = vcmp.eq.s32.totalorder %v675_v34, %v1938_v30 }
 0x1e6   : > { %v1625_v10 = vpack.c.bf16 %v516_v9, %v506_v6 }
 0x1e7   : > { %v545_v11 = vld [vmem:[#allocation2] sm:$0xff]  ;;  %v525_v13 = vpop.permute.xlu0 %524 }
 0x1e8   : > { %v527_v12 = vpop.permute.xlu1 %526  ;;  %1626 = vmatprep.subr.bf16.mxu1 %v1625_v10  ;;  %871 = vst [vmem:[#allocation2] sm:$0xff] %v1758_v1 }
 0x1e9   : > { %532 = vst.msk [vmem:[#allocation2 + $0x38] sm:$0xff] %vm2247_vm14, %v527_v12  ;;  %v528_v17 = vsel %vm2249_vm0, %v525_v13, %v527_v12  ;;  %vm557_vm14 = vcmask 334848   ;;  %vm727_vm0 = vcmp.eq.s32.totalorder %v692_v33, %v1938_v30  ;;  %v929_v13 = vld [vmem:[#allocation2 + $0xa0] sm:$0x1] }
 0x1ea   : > { %v1631_v21 = vpack.c.bf16 %v528_v17, %v1912_v26  ;;  %v487_v26 = vld [vmem:[%s2215_s2 + $0x8] sm:$0xff] }
 0x1eb   : > { %v547_v14 = vld [vmem:[#allocation2 + $0x10] sm:$0xff]  ;;  %v534_v18 = vpop.permute.xlu0 %533 }
 0x1ec   : > { %v536_v15 = vpop.permute.xlu1 %535  ;;  %v1627_v16 = vpack.c.bf16 %v547_v14, %v545_v11  ;;  %872 = vst [vmem:[#allocation2 + $0x10] sm:$0xff] %v1758_v1 }
 0x1ed   : > { %541 = vst.msk [vmem:[#allocation2 + $0x48] sm:$0xff] %vm2248_vm6, %v536_v15  ;;  %v537_v24 = vsel %vm2250_vm3, %v534_v18, %v536_v15  ;;  %vm726_vm6 = vcmp.eq.s32.totalorder %v691_v32, %v1938_v30 }
 0x1ee   : > { %1628 = vmatpush1.bf16.msra.mxu1 %v1627_v16  ;;  %v1636_v31 = vpack.c.bf16 %v555_v23, %v537_v24  ;;  %vm1667_vm3 = vmpackc.low %vm727_vm0, %vm726_vm6 }
 0x1ef   : > { %1668 = vmatprep.subr.msk.bf16.mxu0 %vm1667_vm3, %v1764_v39 }
 0x1f0   : > { %v552_v19 = vld [vmem:[#allocation2 + $0x38] sm:$0xff] }
 0x1f1   : > { %v1629_v20 = vpack.c.bf16 %v552_v19, %v1914_v27  ;;  %v486_v27 = vld [vmem:[%s2215_s2] sm:$0xff] }
 0x1f3   : > { %1630 = vmatprep.subr.bf16.mxu1 %v1629_v20  ;;  %v1766_v20 = vmov 0.0|0.0  }
 0x1f4   : > { %1632 = vmatpush1.bf16.msra.mxu1 %v1631_v21  ;;  %v554_v25 = vld [vmem:[#allocation2 + $0x48] sm:$0xff] }
 0x1f5   : > { %v1633_v28 = vpack.c.bf16 %v556_v22, %v554_v25 }
 0x1f7   : > { %1635 = vmatprep.subr.msk.bf16.mxu1 %vm1634_vm13, %v1633_v28 }
 0x1f8   : > { %1638 = vmatpush1.bf16.msk.msra.mxu1 %vm1634_vm13, %v1636_v31  ;;  %vm711_vm13 = vcmp.eq.s32.totalorder %v676_v35, %v1938_v30 }
 0x1fb   : > { %1379 = vmatmul.mubr.msk.f32.vlgmr.msra.gmra.mrb[2].mxu1 %vm557_vm14, %v486_v27 }
 0x1fc   : > { %641 = vmatprep.mubr.f32.mxu1 %v1758_v1 }
 0x1ff   : > { %1380 = vmatmul.mubr.msk.f32.gmra.mrb[4].mxu1 %vm557_vm14, %v487_v26  ;;  %vm2086_vm14 = vmpackc.low %vm711_vm13, %vm710_vm4  ;;  %vm1767_vm13 = vmmov 0  }
 0x200   : > { %1670 = vmatpush3.bf16.msk.msra.mxu0 %vm2086_vm14, %v1764_v39 }
 0x201   : > { %1692 = vmatprep.subr.msk.bf16.mxu0 %vm1960_vm11, %v1764_v39 }
 0x2ce   : > { %v637_v29 = vpop.f32.mrb[2].mxu1 }
 0x2cf   : > { %v652_v37 = vmul.f32 0.1, %v637_v29  ;;  %v639_v38 = vpop.f32.mrb[3].mxu1  ;;  %vm648_vm6 = vcmp.gt.f32.partialorder %v637_v29, 0.0 }
 0x2d0   : > { %v653_v41 = vmul.f32 0.1, %v639_v38  ;;  %vm649_vm0 = vcmp.gt.f32.partialorder %v639_v38, 0.0 }
 0x2d1   : > { %v656_v45 = vsel %vm648_vm6, %v637_v29, %v652_v37  ;;  %vm1127_vm6 = vcmask 515072  }
 0x2d2   : > { %v643_v30 = vpop.f32.mrb[4].mxu1  ;;  %v657_v42 = vsel %vm649_vm0, %v639_v38, %v653_v41  ;;  %v1099_v38 = vld [vmem:[%s2217_s4] sm:$0x1]  ;;  %vm1138_vm0 = vcmask 400384  }
 0x2d3   : > { %v654_v43 = vmul.f32 0.1, %v643_v30  ;;  %v645_v44 = vpop.f32.mrb[5].mxu1  ;;  %856 = vmatprep.mubr.f32.mxu0 %v657_v42  ;;  %vm650_vm3 = vcmp.gt.f32.partialorder %v643_v30, 0.0 }
 0x2d4   : > { %vm651_vm4 = vcmp.gt.f32.partialorder %v645_v44, 0.0  ;;  %v655_v47 = vmul.f32 0.1, %v645_v44  ;;  %857 = vmatmul.mubr.f32.vlgmr.msra.gmra.mrb[0].mxu0 %v656_v45 }
 0x2d5   : > { %1694 = vmatpush3.bf16.msk.msra.mxu0 %vm1960_vm11, %v1764_v39  ;;  %v658_v49 = vsel %vm650_vm3, %v643_v30, %v654_v43  ;;  %vm930_vm11 = vcmask 662528  }
 0x2d6   : > { %v659_v48 = vsel %vm651_vm4, %v645_v44, %v655_v47  ;;  %1696 = vmatprep.subr.msk.bf16.mxu0 %vm1977_vm15, %v1764_v39  ;;  %1570 = vmatprep.mubr.msk.f32.mxu1 %vm930_vm11, %v869_v54 }
 0x2d7   : > { %861 = vmatprep.mubr.f32.mxu0 %v659_v48 }
 0x2d8   : > { %862 = vmatmul.mubr.f32.gmra.mrb[2].mxu0 %v658_v49 }
 0x2d9   : > { %1698 = vmatpush3.bf16.msk.msra.mxu0 %vm1977_vm15, %v1764_v39  ;;  %vm2253_vm15 = vcmask 1039360  }
 0x2da   : > { %1700 = vmatprep.subr.msk.bf16.mxu0 %vm1994_vm10, %v1764_v39 }
 0x2dd   : > { %1702 = vmatpush3.bf16.msk.msra.mxu0 %vm1994_vm10, %v1764_v39  ;;  %vm2254_vm10 = vcmask 1031168  }
 0x2de   : > { %1704 = vmatprep.subr.msk.bf16.mxu0 %vm2010_vm1, %v1764_v39 }
 0x2e1   : > { %1706 = vmatpush3.bf16.msk.msra.mxu0 %vm2010_vm1, %v1764_v39  ;;  %vm2255_vm1 = vmmov %vm2253_vm15 }
 0x2e2   : > { %1708 = vmatprep.subr.msk.bf16.mxu0 %vm2026_vm8, %v1764_v39 }
 0x2e5   : > { %1710 = vmatpush3.bf16.msk.msra.mxu0 %vm2026_vm8, %v1764_v39  ;;  %vm1106_vm8 = vcmask 516096  }
 0x2e6   : > { %1712 = vmatprep.subr.msk.bf16.mxu0 %vm2040_vm2, %v1764_v39 }
 0x2e9   : > { %1714 = vmatpush3.bf16.msk.msra.mxu0 %vm2040_vm2, %v1764_v39  ;;  %vm2256_vm2 = vmmov %vm2254_vm10 }
 0x2ea   : > { %1716 = vmatprep.subr.msk.bf16.mxu0 %vm2050_vm7, %v1764_v39 }
 0x2ed   : > { %1718 = vmatpush3.bf16.msk.msra.mxu0 %vm2050_vm7, %v1764_v39 }
 0x2ee   : > { %1720 = vmatprep.subr.msk.bf16.mxu0 %vm2086_vm14, %v1764_v39 }
 0x2f1   : > { %1722 = vmatpush3.bf16.msk.msra.mxu0 %vm2086_vm14, %v1764_v39  ;;  %vm1116_vm14 = vcmask 523272  }
 0x3a7   : > { %v1503_v40 = vpop.f32.mrb[0].mxu0 }
 0x3a8   : > { %v1504_v46 = vpop.f32.mrb[1].mxu0 }
 0x3a9   : > { %v1505_v50 = vadd.f32 %v1504_v46, %v1503_v40 }
 0x3ab   : > { %900 = vst [vmem:[#allocation2 + $0x40] sm:$0xff] %v1505_v50  ;;  %884 = vrot.lane.b32.xlu0 %v1505_v50, %s1761_s13  ;;  %v1506_v51 = vpop.f32.mrb[2].mxu0  ;;  %867 = vst [vmem:[%s327_s30] sm:$0xff] %v1505_v50 }
 0x3ac   : > { %v1507_v52 = vpop.f32.mrb[3].mxu0 }
 0x3ad   : > { %v1508_v53 = vadd.f32 %v1507_v52, %v1506_v51 }
 0x3af   : > { %901 = vst [vmem:[#allocation2 + $0x50] sm:$0xff] %v1508_v53  ;;  %892 = vrot.lane.b32.xlu0 %v1505_v50, %s1763_s15  ;;  %886 = vrot.lane.b32.xlu1 %v1508_v53, %s1761_s13  ;;  %v1679_v39 = vpack.c.bf16 %v1508_v53, %v1505_v50  ;;  %868 = vst [vmem:[%s327_s30 + $0x8] sm:$0xff] %v1508_v53 }
 0x3b3   : > { %902 = vrot.lane.b32.xlu0 %v1505_v50, %s1760_s12  ;;  %894 = vrot.lane.b32.xlu1 %v1508_v53, %s1763_s15 }
 0x3b7   : > { %910 = vrot.lane.b32.xlu0 %v1505_v50, %s1762_s14  ;;  %904 = vrot.lane.b32.xlu1 %v1508_v53, %s1760_s12 }
 0x3bb   : > { %912 = vrot.lane.b32.xlu1 %v1508_v53, %s1762_s14 }
 0x41d   : > { %v885_v55 = vpop.permute.xlu0 %884 }
 0x41e   : > { %890 = vst.msk [vmem:[#allocation2] sm:$0xff] %vm509_vm12, %v885_v55 }
 0x421   : > { %v893_v56 = vpop.permute.xlu0 %892  ;;  %v887_v57 = vpop.permute.xlu1 %886 }
 0x422   : > { %898 = vst.msk [vmem:[#allocation2 + $0x20] sm:$0xff] %vm519_vm9, %v893_v56 }
 0x423   : > { %891 = vst.msk [vmem:[#allocation2 + $0x10] sm:$0xff] %vm509_vm12, %v887_v57 }
 0x425   : > { %v903_v58 = vpop.permute.xlu0 %902  ;;  %v895_v59 = vpop.permute.xlu1 %894  ;;  %v919_v62 = vld [vmem:[#allocation2] sm:$0xff] }
 0x426   : > { %908 = vst.msk [vmem:[#allocation2 + $0x60] sm:$0xff] %vm2253_vm15, %v903_v58 }
 0x427   : > { %899 = vst.msk [vmem:[#allocation2 + $0x30] sm:$0xff] %vm519_vm9, %v895_v59  ;;  %vm1096_vm9 = vcmask 523264  }
 0x428   : > { %1100 = vst.msk [vmem:[#allocation2] sm:$0xff] %vm1096_vm9, %v1758_v1  ;;  %1104 = vst.msk [vmem:[#allocation2 + $0x40] sm:$0xff] %vm1096_vm9, %v1758_v1 }
 0x429   : > { %v911_v60 = vpop.permute.xlu0 %910  ;;  %v905_v61 = vpop.permute.xlu1 %904  ;;  %v921_v5 = vld [vmem:[#allocation2 + $0x20] sm:$0xff]  ;;  %1105 = vst.msk [vmem:[#allocation2 + $0x50] sm:$0xff] %vm1096_vm9, %v1758_v1 }
 0x42a   : > { %v920_v63 = vld [vmem:[#allocation2 + $0x10] sm:$0xff]  ;;  %916 = vst.msk [vmem:[#allocation2 + $0x80] sm:$0xff] %vm2254_vm10, %v911_v60 }
 0x42b   : > { %909 = vst.msk [vmem:[#allocation2 + $0x70] sm:$0xff] %vm2255_vm1, %v905_v61  ;;  %v1671_v0 = vpack.c.bf16 %v920_v63, %v919_v62 }
 0x42c   : > { %1101 = vst.msk [vmem:[#allocation2 + $0x10] sm:$0xff] %vm1096_vm9, %v1758_v1  ;;  %1102 = vst.msk [vmem:[#allocation2 + $0x20] sm:$0xff] %vm1096_vm9, %v1758_v1 }
 0x42d   : > { %1672 = vmatprep.subr.bf16.mxu1 %v1671_v0  ;;  %v925_v2 = vld [vmem:[#allocation2 + $0x60] sm:$0xff]  ;;  %v913_v4 = vpop.permute.xlu1 %912 }
 0x42e   : > { %1674 = vmatpush3.bf16.msra.mxu1 %v1671_v0  ;;  %v922_v6 = vld [vmem:[#allocation2 + $0x30] sm:$0xff]  ;;  %1107 = vst.msk [vmem:[#allocation2 + $0x60] sm:$0x1] %vm1106_vm8, %v1758_v1 }
 0x42f   : > { %917 = vst.msk [vmem:[#allocation2 + $0x90] sm:$0xff] %vm2256_vm2, %v913_v4  ;;  %v1675_v7 = vpack.c.bf16 %v922_v6, %v921_v5 }
 0x430   : > { %1130 = vst.msk [vmem:[#allocation2 + $0x60] sm:$0x1] %vm1106_vm8, %v1759_v3  ;;  %v870_v3 = vld [vmem:[%s2216_s3 + $0x8] sm:$0xff] }
 0x431   : > { %1676 = vmatprep.subr.bf16.mxu1 %v1675_v7  ;;  %v927_v11 = vld [vmem:[#allocation2 + $0x80] sm:$0xff]  ;;  %1103 = vst.msk [vmem:[#allocation2 + $0x30] sm:$0xff] %vm1096_vm9, %v1758_v1 }
 0x432   : > { %1678 = vmatpush3.bf16.msra.mxu1 %v1675_v7  ;;  %v926_v8 = vld [vmem:[#allocation2 + $0x70] sm:$0xff] }
 0x433   : > { %1680 = vmatprep.subr.bf16.mxu1 %v1679_v39  ;;  %v1683_v9 = vpack.c.bf16 %v926_v8, %v925_v2 }
 0x436   : > { %1682 = vmatpush3.bf16.msra.mxu1 %v1679_v39  ;;  %v928_v10 = vld [vmem:[#allocation2 + $0x90] sm:$0xff] }
 0x437   : > { %1684 = vmatprep.subr.bf16.mxu1 %v1683_v9  ;;  %v1687_v12 = vpack.c.bf16 %v928_v10, %v927_v11  ;;  %v1137_v37 = vld [vmem:[#allocation2 + $0x60] sm:$0x1] }
 0x43a   : > { %1686 = vmatpush3.bf16.msra.mxu1 %v1683_v9 }
 0x43b   : > { %1688 = vmatprep.subr.bf16.mxu1 %v1687_v12 }
 0x43e   : > { %1690 = vmatpush3.bf16.msra.mxu1 %v1687_v12 }
 0x43f   : > { %1568 = vmatprep.subr.msk.mxu1 %vm564_vm5, %v929_v13 }
 0x442   : > { %1569 = vmatpush3.msk.msra.mxu1 %vm564_vm5, %v929_v13 }
 0x443   : > { %1571 = vmatmul.mubr.msk.f32.vlgmr.msra.gmra.mrb[6].mxu1 %vm930_vm11, %v870_v3  ;;  %1723 = vmatprep.subr.bf16.mxu1 %v1766_v20 }
 0x444   : > { %1622 = vmatprep.mubr.msk.f32.mxu1 %vm1767_vm13, %v1758_v1 }
 0x516   : > { %v1572_v14 = vpop.f32.mrb[6].mxu1 }
 0x517   : > { %v1018_v15 = vmul.f32 0.1, %v1572_v14  ;;  %v1006_v16 = vpop.f32.mrb[7].mxu1  ;;  %vm1016_vm7 = vcmp.gt.f32.partialorder %v1572_v14, 0.0 }
 0x518   : > { %vm1015_vm12 = vcmp.gt.f32.partialorder %v1006_v16, 0.0  ;;  %v1017_v17 = vmul.f32 0.1, %v1006_v16 }
 0x519   : > { %v1020_v19 = vsel %vm1016_vm7, %v1572_v14, %v1018_v15 }
 0x51a   : > { %v1019_v18 = vsel %vm1015_vm12, %v1006_v16, %v1017_v17 }
 0x51b   : > { %1605 = vmatprep.mubr.f32.mxu0 %v1019_v18 }
 0x51c   : > { %1606 = vmatmul.mubr.f32.vlgmr.msra.gmra.mrb[4].mxu0 %v1020_v19 }
 0x5ef   : > { %v1607_v21 = vpop.f32.mrb[4].mxu0 }
 0x5f0   : > { %1098 = vst.msk [vmem:[%s332_s17 + $0x8] sm:$0xff] %vm1096_vm9, %v1607_v21  ;;  %1120 = vst.msk [vmem:[#allocation2 + $0x30] sm:$0xff] %vm1096_vm9, %v1607_v21  ;;  %1112 = vrot.lane.b32.xlu1 %v1607_v21, %s1763_s15  ;;  %v1087_v22 = vpop.f32.mrb[5].mxu0 }
 0x5f1   : > { %1097 = vst.msk [vmem:[%s332_s17] sm:$0xff] %vm1096_vm9, %v1087_v22  ;;  %1119 = vst.msk [vmem:[#allocation2 + $0x20] sm:$0xff] %vm1096_vm9, %v1087_v22  ;;  %1110 = vrot.lane.b32.xlu0 %v1087_v22, %s1763_s15 }
 0x5f4   : > { %1123 = vrot.lane.b32.xlu1 %v1607_v21, %s1760_s12 }
 0x5f5   : > { %1121 = vrot.lane.b32.xlu0 %v1087_v22, %s1760_s12 }
 0x5f7   : > { %v1134_v33 = vld [vmem:[#allocation2 + $0x30] sm:$0xff] }
 0x5f8   : > { %v1133_v32 = vld [vmem:[#allocation2 + $0x20] sm:$0xff] }
 0x5f9   : > { %v1727_v34 = vpack.c.bf16 %v1134_v33, %v1133_v32 }
 0x662   : > { %v1113_v23 = vpop.permute.xlu1 %1112 }
 0x663   : > { %1118 = vst.msk [vmem:[#allocation2 + $0x10] sm:$0xff] %vm1116_vm14, %v1113_v23  ;;  %v1111_v24 = vpop.permute.xlu0 %1110 }
 0x664   : > { %1117 = vst.msk [vmem:[#allocation2] sm:$0xff] %vm1116_vm14, %v1111_v24 }
 0x666   : > { %v1124_v25 = vpop.permute.xlu1 %1123 }
 0x667   : > { %1129 = vst.msk [vmem:[#allocation2 + $0x50] sm:$0xff] %vm1127_vm6, %v1124_v25  ;;  %v1122_v28 = vpop.permute.xlu0 %1121 }
 0x668   : > { %1128 = vst.msk [vmem:[#allocation2 + $0x40] sm:$0xff] %vm1127_vm6, %v1122_v28 }
 0x66a   : > { %v1132_v31 = vld [vmem:[#allocation2 + $0x10] sm:$0xff] }
 0x66b   : > { %v1131_v27 = vld [vmem:[#allocation2] sm:$0xff] }
 0x66c   : > { %v1724_v26 = vpack.c.bf16 %v1132_v31, %v1131_v27 }
 0x66e   : > { %1725 = vmatpush3.bf16.msra.mxu1 %v1724_v26  ;;  %v1136_v36 = vld [vmem:[#allocation2 + $0x50] sm:$0xff] }
 0x66f   : > { %1726 = vmatprep.subr.bf16.mxu1 %v1766_v20  ;;  %v1135_v35 = vld [vmem:[#allocation2 + $0x40] sm:$0xff] }
 0x670   : > { %v1730_v29 = vpack.c.bf16 %v1136_v36, %v1135_v35 }
 0x672   : > { %1728 = vmatpush3.bf16.msra.mxu1 %v1727_v34 }
 0x673   : > { %1729 = vmatprep.subr.bf16.mxu1 %v1766_v20 }
 0x676   : > { %1731 = vmatpush3.bf16.msra.mxu1 %v1730_v29 }
 0x677   : > { %1620 = vmatprep.subr.mxu1 %v1758_v1 }
 0x67a   : > { %1621 = vmatpush3.msk.msra.mxu1 %vm564_vm5, %v1137_v37 }
 0x67b   : > { %1623 = vmatmul.mubr.msk.f32.vlgmr.msra.gmra.mrb[8].mxu1 %vm1138_vm0, %v1099_v38 }
 0x74e   : > { %v1211_v41 = vpop.f32.mrb[8].mxu1 }
 0x74f   : > { %1215 = vst.msk [vmem:[%s335_s20] sm:$0x1] %vm1106_vm8, %v1211_v41  ;;  %v1624_v30 = vpop.f32.mrb[9].mxu1 }
 0x750 PF: > { %s19_s27 = sadd.s32 1, %s1756_s27  }
 0x751   : > { %p16_p4 = scmp.ge.s32.totalorder %s19_s27, 6  }
 0x753   :  { %18 = sbr.rel (!%p16_p4) target bundleno = 1 (0x1), region = 112 }

// kernel: _lambda_.5
= control target key start
LH: loop header
LB: loop body
LE: loop exit
PB: predicated region body
PF: predicated region fallthrough
CT: control target
= control target key end

     0   :  { %s2326_s27 = smov 0   ;;  %s2842_s0 = inlined_call_operand.vmem [shape: f32[4,1,256], index: 0, kind: input, shape index: {}]   ;;  %s2843_s1 = inlined_call_operand.vmem [shape: f32[8,6], index: 1, kind: input, shape index: {}]   ;;  %s2844_s2 = inlined_call_operand.vmem [shape: f32[16,41], index: 2, kind: input, shape index: {}]   ;;  %s2845_s3 = inlined_call_operand.vmem [shape: f32[16,81], index: 3, kind: input, shape index: {}]   ;;  %s2846_s4 = inlined_call_operand.vmem [shape: f32[1,49], index: 4, kind: input, shape index: {}]   ;;  %s2847_s5 = inlined_call_operand.vmem [shape: f32[4,8,65], index: 5, kind: output, shape index: {0}]   ;;  %s2848_s6 = inlined_call_operand.vmem [shape: f32[4,16,33], index: 6, kind: output, shape index: {1}]   ;;  %s2849_s7 = inlined_call_operand.vmem [shape: f32[4,16,17], index: 7, kind: output, shape index: {2}]   ;;  %s2850_s8 = inlined_call_operand.vmem [shape: f32[4,1,17], index: 8, kind: output, shape index: {3}]  }
   0x1 LB: > { %s1745_s28 = sadd.s32 4294967295, %s2267_s27   ;;  %p1749_p0 = scmp.ge.s32.totalorder %s2267_s27, 1  ;;  %s2267_s27 = sphi %s2326_s27, %s19_s27  }
   0x2   : > { %p268_p1 = scmp.lt.s32.totalorder %s2267_s27, 5 }
   0x4   : > { %p269_p2 = pnand %p1749_p0, %p268_p1 }
   0x5   : > { %p313_p3 = scmp.lt.s32.totalorder (!%p269_p2), %s1745_s28, 3  ;;  %v335_v0 = vlaneseq (!%p269_p2)  ;;  %v2269_v1 = vmov (!%p269_p2), 0.0   ;;  %v2867_v4 = vmov (!%p269_p2), 0  ;;  %s2270_s11 = smov (!%p269_p2), 2   ;;  %v2271_v15 = vmov (!%p269_p2), 1.0|1.0  }
   0x6   : > { %272 = sbr.rel (%p269_p2) target bundleno = 2806 (0xaf6), region = 40  ;;  %v2871_v19 = vmov (!%p269_p2), 0  ;;  %v2873_v22 = vmov (!%p269_p2), 0  ;;  %v2875_v25 = vmov (!%p269_p2), 0  ;;  %v2877_v28 = vmov (!%p269_p2), 0  ;;  %s2272_s12 = smov (!%p269_p2), 126  }
   0x7   : > { %vm337_vm0 = vcmp.lt.s32.totalorder (!%p269_p2), %v335_v0, 260  ;;  %vm2339_vm1 = vcmp.ge.s32.totalorder (!%p269_p2), %v335_v0, 2  ;;  %v410_v3 = vand.u32 (!%p269_p2), 127, %v335_v0  ;;  %vm2345_vm2 = vcmp.lt.s32.totalorder (!%p269_p2), %v335_v0, 131  ;;  %s2273_s13 = smov (!%p269_p2), 127   ;;  %s2274_s14 = smov (!%p269_p2), 125  }
   0x8   : > { %339 = vst.msk [vmem:[#allocation3] sm:$0x7] (!%p269_p2), %vm337_vm0, %v2269_v1  ;;  %v2868_v4 = vsel (!%p269_p2), %vm2345_vm2, 4294967295, %v2867_v4  ;;  %v2358_v5 = vshrl.u32 (!%p269_p2), %v335_v0, 7  ;;  %v2879_v31 = vmov (!%p269_p2), 0  ;;  %v2881_v34 = vmov (!%p269_p2), 0 }
   0x9   : > { %v411_v6 = vadd.s32 (!%p269_p2), 128, %v410_v3  ;;  %v2360_v7 = vmul.u32 (!%p269_p2), 2, %v410_v3  ;;  %v2883_v37 = vmov (!%p269_p2), 0  ;;  %s2279_s15 = smov (!%p269_p2), 1  }
   0xa   : > { %v377_v10 = vadd.s32 (!%p269_p2), 8, %v2358_v5  ;;  %v378_v11 = vadd.s32 (!%p269_p2), 16, %v2358_v5  ;;  %v379_v12 = vadd.s32 (!%p269_p2), 24, %v2358_v5  ;;  %v2373_v13 = vadd.s32 (!%p269_p2), 32, %v2358_v5 }
   0xb   : > { %v2363_v9 = vmul.u32 (!%p269_p2), 2, %v411_v6  ;;  %vm414_vm4 = vcmp.eq.s32.totalorder (!%p269_p2), %v2358_v5, %v2360_v7  ;;  %v381_v14 = vadd.s32 (!%p269_p2), 40, %v2358_v5  ;;  %v382_v17 = vadd.s32 (!%p269_p2), 48, %v2358_v5 }
   0xc   : > { %vm416_vm6 = vcmp.eq.s32.totalorder (!%p269_p2), %v377_v10, %v2360_v7  ;;  %vm418_vm9 = vcmp.eq.s32.totalorder (!%p269_p2), %v378_v11, %v2360_v7  ;;  %vm420_vm11 = vcmp.eq.s32.totalorder (!%p269_p2), %v379_v12, %v2360_v7  ;;  %v383_v18 = vadd.s32 (!%p269_p2), 56, %v2358_v5 }
   0xd   : > { %s2900_s28 = smov (!%p313_p3, %s1745_s28), 3  ;;  %vm415_vm5 = vcmp.eq.s32.totalorder %v2358_v5, %v2363_v9  ;;  %vm417_vm7 = vcmp.eq.s32.totalorder %v377_v10, %v2363_v9  ;;  %vm419_vm10 = vcmp.eq.s32.totalorder %v378_v11, %v2363_v9  ;;  %vm421_vm12 = vcmp.eq.s32.totalorder %v379_v12, %v2363_v9  ;;  %vm2386_vm13 = vmpackc.low %vm416_vm6, %vm414_vm4 }
   0xe   : > { %s1750_s29 = sshll.u32 %s2900_s28, 1  ;;  %vm2084_vm8 = vmpackc.low %vm417_vm7, %vm415_vm5  ;;  %vm423_vm14 = vcmp.eq.s32.totalorder %v2373_v13, %v2363_v9  ;;  %vm425_vm15 = vcmp.eq.s32.totalorder %v381_v14, %v2363_v9  ;;  %vm2851_vm6 = vcmp.eq.s32.totalorder %v2373_v13, %v2360_v7  ;;  %vm424_vm7 = vcmp.eq.s32.totalorder %v381_v14, %v2360_v7  ;;  %s1751_s18 = sshll.u32 %s2900_s28, 3 }
   0xf   : > { %s316_s10 = scalar_lea.vmem %s2842_s0, %s1750_s29  ;;  %2085 = vmatprep.subr.msk.bf16.mxu0 %vm2084_vm8, %v2271_v15  ;;  %vm2088_vm0 = vmpackc.low %vm421_vm12, %vm419_vm10  ;;  %vm427_vm8 = vcmp.eq.s32.totalorder %v382_v17, %v2363_v9  ;;  %vm429_vm3 = vcmp.eq.s32.totalorder %v383_v18, %v2363_v9  ;;  %v2409_v20 = vadd.s32 64, %v2358_v5  ;;  %v385_v21 = vadd.s32 72, %v2358_v5  ;;  %s320_s21 = scalar_lea.vmem %s2847_s5, %s1751_s18 }
  0x10   : > { %v334_v8 = vld [vmem:[%s316_s10] sm:$0x3]  ;;  %2087 = vmatpush1.bf16.msk.msra.mxu0 %vm2386_vm13, %v2271_v15  ;;  %vm2399_vm4 = vmpackc.low %vm420_vm11, %vm418_vm9  ;;  %vm426_vm11 = vcmp.eq.s32.totalorder %v382_v17, %v2360_v7  ;;  %vm428_vm12 = vcmp.eq.s32.totalorder %v383_v18, %v2360_v7  ;;  %v386_v23 = vadd.s32 80, %v2358_v5  ;;  %v387_v24 = vadd.s32 88, %v2358_v5  ;;  %s1937_s26 = sshll.u32 %s2900_s28, 4 }
  0x11   : > { %341 = vrot.lane.b32.xlu0 %v334_v8, %s2270_s11  ;;  %2089 = vmatprep.subr.msk.bf16.mxu0 %vm2088_vm0, %v2271_v15  ;;  %v2872_v19 = vsel %vm2399_vm4, 4294967295, %v2871_v19  ;;  %vm2092_vm5 = vmpackc.low %vm425_vm15, %vm423_vm14  ;;  %vm431_vm14 = vcmp.eq.s32.totalorder %v2409_v20, %v2363_v9  ;;  %vm433_vm15 = vcmp.eq.s32.totalorder %v385_v21, %v2363_v9  ;;  %v388_v26 = vadd.s32 96, %v2358_v5  ;;  %s325_s9 = scalar_lea.vmem %s2848_s6, %s1937_s26  ;;  %s330_s18 = scalar_lea.vmem %s2849_s7, %s1937_s26 }
  0x12   : > { %vm2419_vm9 = vmpackc.low %vm424_vm7, %vm2851_vm6  ;;  %vm432_vm7 = vcmp.eq.s32.totalorder %v385_v21, %v2360_v7  ;;  %vm437_vm6 = vcmp.eq.s32.totalorder %v387_v24, %v2363_v9  ;;  %v389_v27 = vadd.s32 104, %v2358_v5  ;;  %v390_v29 = vadd.s32 112, %v2358_v5 }
  0x13   : > { %v2874_v22 = vsel %vm2419_vm9, 4294967295, %v2873_v22  ;;  %vm2096_vm10 = vmpackc.low %vm429_vm3, %vm427_vm8  ;;  %vm435_vm8 = vcmp.eq.s32.totalorder %v386_v23, %v2363_v9  ;;  %v391_v30 = vadd.s32 120, %v2358_v5  ;;  %v2475_v32 = vadd.s32 128, %v2358_v5 }
  0x14   : > { %2091 = vmatpush1.bf16.msk.msra.mxu0 %vm2399_vm4, %v2271_v15  ;;  %vm2434_vm3 = vmpackc.low %vm428_vm12, %vm426_vm11  ;;  %vm434_vm12 = vcmp.eq.s32.totalorder %v386_v23, %v2360_v7  ;;  %vm441_vm2 = vcmp.eq.s32.totalorder %v389_v27, %v2363_v9  ;;  %v393_v33 = vadd.s32 136, %v2358_v5  ;;  %v394_v35 = vadd.s32 144, %v2358_v5 }
  0x15   : > { %2093 = vmatprep.subr.msk.bf16.mxu0 %vm2092_vm5, %v2271_v15  ;;  %v2876_v25 = vsel %vm2434_vm3, 4294967295, %v2875_v25  ;;  %vm2100_vm0 = vmpackc.low %vm433_vm15, %vm431_vm14  ;;  %vm2853_vm5 = vcmp.eq.s32.totalorder %v2409_v20, %v2360_v7  ;;  %vm436_vm14 = vcmp.eq.s32.totalorder %v387_v24, %v2360_v7  ;;  %vm439_vm15 = vcmp.eq.s32.totalorder %v388_v26, %v2363_v9 }
  0x16   : > { %vm2104_vm11 = vmpackc.low %vm437_vm6, %vm435_vm8  ;;  %vm440_vm8 = vcmp.eq.s32.totalorder %v389_v27, %v2360_v7  ;;  %v395_v36 = vadd.s32 152, %v2358_v5  ;;  %v396_v38 = vadd.s32 160, %v2358_v5  ;;  %v397_v39 = vadd.s32 168, %v2358_v5 }
  0x17   : > { %vm2108_vm6 = vmpackc.low %vm441_vm2, %vm439_vm15  ;;  %vm447_vm15 = vcmp.eq.s32.totalorder %v2475_v32, %v2363_v9  ;;  %v398_v40 = vadd.s32 176, %v2358_v5  ;;  %v399_v41 = vadd.s32 184, %v2358_v5  ;;  %v400_v42 = vadd.s32 192, %v2358_v5 }
  0x18   : > { %2095 = vmatpush1.bf16.msk.msra.mxu0 %vm2419_vm9, %v2271_v15  ;;  %v401_v43 = vadd.s32 200, %v2358_v5  ;;  %v402_v45 = vadd.s32 208, %v2358_v5  ;;  %v403_v46 = vadd.s32 216, %v2358_v5  ;;  %v404_v49 = vadd.s32 224, %v2358_v5 }
  0x19   : > { %2097 = vmatprep.subr.msk.bf16.mxu0 %vm2096_vm10, %v2271_v15  ;;  %vm2452_vm10 = vmpackc.low %vm432_vm7, %vm2853_vm5  ;;  %vm438_vm7 = vcmp.eq.s32.totalorder %v388_v26, %v2360_v7  ;;  %vm443_vm5 = vcmp.eq.s32.totalorder %v390_v29, %v2363_v9  ;;  %v405_v50 = vadd.s32 232, %v2358_v5  ;;  %v406_v52 = vadd.s32 240, %v2358_v5 }
  0x1a   : > { %v2878_v28 = vsel %vm2452_vm10, 4294967295, %v2877_v28  ;;  %vm2482_vm2 = vmpackc.low %vm440_vm8, %vm438_vm7  ;;  %vm448_vm7 = vcmp.eq.s32.totalorder %v393_v33, %v2360_v7  ;;  %vm451_vm8 = vcmp.eq.s32.totalorder %v394_v35, %v2363_v9  ;;  %v407_v53 = vadd.s32 248, %v2358_v5 }
  0x1b   : > { %v2882_v34 = vsel %vm2482_vm2, 4294967295, %v2881_v34  ;;  %v408_v55 = vadd.s32 256, %v2358_v5  ;;  %v619_v10 = vsub.s32 1, %v2358_v5  ;;  %v615_v11 = vsub.s32 0, %v2358_v5 }
  0x1c   : > { %2099 = vmatpush1.bf16.msk.msra.mxu0 %vm2434_vm3, %v2271_v15  ;;  %vm445_vm3 = vcmp.eq.s32.totalorder %v391_v30, %v2363_v9  ;;  %v623_v21 = vsub.s32 2, %v2358_v5  ;;  %v2275_v24 = vmov 1966171168  }
  0x1d   : > { %2101 = vmatprep.subr.msk.bf16.mxu0 %vm2100_vm0, %v2271_v15  ;;  %vm2466_vm0 = vmpackc.low %vm436_vm14, %vm434_vm12  ;;  %vm442_vm12 = vcmp.eq.s32.totalorder %v390_v29, %v2360_v7  ;;  %vm444_vm14 = vcmp.eq.s32.totalorder %v391_v30, %v2360_v7  ;;  %v786_v26 = vunpack.c.l.s4 %v2275_v24 }
  0x1e   : > { %v2880_v31 = vsel %vm2466_vm0, 4294967295, %v2879_v31 }
  0x1f   : > { %v787_v27 = vunpack.c.0.s8 %v786_v26 }
  0x20   : > { %2103 = vmatpush1.bf16.msk.msra.mxu0 %vm2452_vm10, %v2271_v15  ;;  %vm449_vm10 = vcmp.eq.s32.totalorder %v393_v33, %v2363_v9 }
  0x21   : > { %2105 = vmatprep.subr.msk.bf16.mxu0 %vm2104_vm11, %v2271_v15  ;;  %vm2112_vm11 = vmpackc.low %vm445_vm3, %vm443_vm5  ;;  %v790_v30 = vsub.s32 %v787_v27, %v2358_v5  ;;  %v1026_v27 = vld [vmem:[%s2844_s2 + $0x8] sm:$0xff] }
  0x22   : > { %vm2497_vm3 = vmpackc.low %vm444_vm14, %vm442_vm12  ;;  %vm450_vm12 = vcmp.eq.s32.totalorder %v394_v35, %v2360_v7  ;;  %vm452_vm14 = vcmp.eq.s32.totalorder %v395_v36, %v2360_v7 }
  0x23   : > { %v2884_v37 = vsel %vm2497_vm3, 4294967295, %v2883_v37  ;;  %vm2116_vm5 = vmpackc.low %vm449_vm10, %vm447_vm15  ;;  %vm455_vm15 = vcmp.eq.s32.totalorder %v396_v38, %v2363_v9 }
  0x24   : > { %2107 = vmatpush1.bf16.msk.msra.mxu0 %vm2466_vm0, %v2271_v15  ;;  %vm453_vm0 = vcmp.eq.s32.totalorder %v395_v36, %v2363_v9 }
  0x25   : > { %2109 = vmatprep.subr.msk.bf16.mxu0 %vm2108_vm6, %v2271_v15  ;;  %vm2860_vm6 = vcmp.eq.s32.totalorder %v2475_v32, %v2360_v7 }
  0x26   : > { %vm2118_vm10 = vmpackc.low %vm448_vm7, %vm2860_vm6  ;;  %vm456_vm7 = vcmp.eq.s32.totalorder %v397_v39, %v2360_v7  ;;  %vm461_vm6 = vcmp.eq.s32.totalorder %v399_v41, %v2363_v9 }
  0x28   : > { %2111 = vmatpush1.bf16.msk.msra.mxu0 %vm2482_vm2, %v2271_v15  ;;  %vm457_vm2 = vcmp.eq.s32.totalorder %v397_v39, %v2363_v9  ;;  %v2276_v39 = vmov 0.0|0.0  }
  0x29   : > { %2113 = vmatprep.subr.msk.bf16.mxu0 %vm2112_vm11, %v2271_v15  ;;  %vm2120_vm11 = vmpackc.low %vm453_vm0, %vm451_vm8  ;;  %vm454_vm0 = vcmp.eq.s32.totalorder %v396_v38, %v2360_v7  ;;  %vm459_vm8 = vcmp.eq.s32.totalorder %v398_v40, %v2363_v9  ;;  %2148 = vmatprep.subr.bf16.mxu1 %v2276_v39 }
  0x2a   : > { %2150 = vmatpush1.bf16.msk.msra.mxu1 %vm2386_vm13, %v2271_v15 }
  0x2b   : > { %2151 = vmatprep.subr.bf16.mxu1 %v2276_v39 }
  0x2c   : > { %2115 = vmatpush1.bf16.msk.msra.mxu0 %vm2497_vm3, %v2271_v15  ;;  %vm2124_vm3 = vmpackc.low %vm457_vm2, %vm455_vm15  ;;  %vm458_vm2 = vcmp.eq.s32.totalorder %v398_v40, %v2360_v7  ;;  %vm465_vm15 = vcmp.eq.s32.totalorder %v401_v43, %v2363_v9 }
  0x2d   : > { %2117 = vmatprep.subr.msk.bf16.mxu0 %vm2116_vm5, %v2271_v15  ;;  %vm2122_vm5 = vmpackc.low %vm452_vm14, %vm450_vm12  ;;  %vm460_vm12 = vcmp.eq.s32.totalorder %v399_v41, %v2360_v7  ;;  %vm463_vm14 = vcmp.eq.s32.totalorder %v400_v42, %v2363_v9 }
  0x2e   : > { %vm2130_vm9 = vmpackc.low %vm460_vm12, %vm458_vm2  ;;  %vm468_vm2 = vcmp.eq.s32.totalorder %v403_v46, %v2360_v7 }
  0x2f   : > { %vm2132_vm4 = vmpackc.low %vm465_vm15, %vm463_vm14  ;;  %vm471_vm14 = vcmp.eq.s32.totalorder %v404_v49, %v2363_v9  ;;  %vm473_vm15 = vcmp.eq.s32.totalorder %v405_v50, %v2363_v9 }
  0x30   : > { %2119 = vmatpush1.bf16.msk.msra.mxu0 %vm2118_vm10, %v2271_v15  ;;  %vm2126_vm10 = vmpackc.low %vm456_vm7, %vm454_vm0  ;;  %vm2543_vm0 = vcmp.lt.s32.totalorder %v335_v0, 258 }
  0x31   : > { %2121 = vmatprep.subr.msk.bf16.mxu0 %vm2120_vm11, %v2271_v15  ;;  %vm2128_vm11 = vmpackc.low %vm461_vm6, %vm459_vm8  ;;  %vm344_vm8 = vcmask 15360  }
  0x32   : > { %vm349_vm7 = vmand %vm2339_vm1, %vm2543_vm0 }
  0x34   : > { %2123 = vmatpush1.bf16.msk.msra.mxu0 %vm2122_vm5, %v2271_v15  ;;  %vm462_vm5 = vcmp.eq.s32.totalorder %v400_v42, %v2360_v7 }
  0x35   : > { %2125 = vmatprep.subr.msk.bf16.mxu0 %vm2124_vm3, %v2271_v15  ;;  %vm464_vm3 = vcmp.eq.s32.totalorder %v401_v43, %v2360_v7 }
  0x36   : > { %vm2134_vm6 = vmpackc.low %vm464_vm3, %vm462_vm5  ;;  %vm470_vm3 = vcmp.eq.s32.totalorder %v404_v49, %v2360_v7 }
  0x37   : > { %vm2140_vm5 = vmpackc.low %vm473_vm15, %vm471_vm14  ;;  %vm630_vm14 = vcmask 1040384   ;;  %vm479_vm15 = vcmp.eq.s32.totalorder %v408_v55, %v2363_v9 }
  0x38   : > { %2127 = vmatpush1.bf16.msk.msra.mxu0 %vm2126_vm10, %v2271_v15  ;;  %v1821_v56 = vsel %vm479_vm15, 1.0, %v2269_v1  ;;  %vm2893_vm15 = vnez %v2884_v37 }
  0x39   : > { %2129 = vmatprep.subr.msk.bf16.mxu0 %vm2128_vm11, %v2271_v15  ;;  %vm466_vm11 = vcmp.eq.s32.totalorder %v402_v45, %v2360_v7 }
  0x3a   : > { %vm2138_vm12 = vmpackc.low %vm468_vm2, %vm466_vm11  ;;  %vm476_vm11 = vcmp.eq.s32.totalorder %v407_v53, %v2360_v7  ;;  %vm779_vm2 = vcmp.lt.s32.totalorder %v335_v0, 133 }
  0x3c   : > { %2131 = vmatpush1.bf16.msk.msra.mxu0 %vm2130_vm9, %v2271_v15  ;;  %vm467_vm9 = vcmp.eq.s32.totalorder %v402_v45, %v2363_v9 }
  0x3d   : > { %2133 = vmatprep.subr.msk.bf16.mxu0 %vm2132_vm4, %v2271_v15  ;;  %vm469_vm4 = vcmp.eq.s32.totalorder %v403_v46, %v2363_v9 }
  0x3e   : > { %vm2136_vm10 = vmpackc.low %vm469_vm4, %vm467_vm9  ;;  %vm475_vm4 = vcmp.eq.s32.totalorder %v406_v52, %v2363_v9 }
  0x40   : > { %2135 = vmatpush1.bf16.msk.msra.mxu0 %vm2134_vm6, %v2271_v15  ;;  %vm472_vm6 = vcmp.eq.s32.totalorder %v405_v50, %v2360_v7 }
  0x41   : > { %2137 = vmatprep.subr.msk.bf16.mxu0 %vm2136_vm10, %v2271_v15  ;;  %vm2142_vm9 = vmpackc.low %vm472_vm6, %vm470_vm3  ;;  %vm477_vm10 = vcmp.eq.s32.totalorder %v407_v53, %v2363_v9  ;;  %vm363_vm3 = vcmask 1031168   ;;  %vm370_vm6 = vcmask 1022976   ;;  %v2277_v53 = vmov 1.0  }
  0x42   : > { %vm2144_vm0 = vmpackc.low %vm477_vm10, %vm475_vm4  ;;  %vm627_vm4 = vcmask 7168   ;;  %vm2887_vm10 = vnez %v2872_v19 }
  0x43   : > { %2153 = vmatpush1.bf16.msk.msra.mxu1 %vm2887_vm10, %v2271_v15 }
  0x44   : > { %2139 = vmatpush1.bf16.msk.msra.mxu0 %vm2138_vm12, %v2271_v15  ;;  %2154 = vmatprep.subr.bf16.mxu1 %v2276_v39 }
  0x45   : > { %2141 = vmatprep.subr.msk.bf16.mxu0 %vm2140_vm5, %v2271_v15  ;;  %vm356_vm5 = vcmask 1039360  }
  0x48   : > { %2143 = vmatpush1.bf16.msk.msra.mxu0 %vm2142_vm9, %v2271_v15  ;;  %vm478_vm9 = vcmp.eq.s32.totalorder %v408_v55, %v2360_v7 }
  0x49   : > { %2145 = vmatprep.subr.msk.bf16.mxu0 %vm2144_vm0, %v2271_v15  ;;  %v1820_v18 = vsel %vm478_vm9, 1.0, %v2269_v1  ;;  %vm2888_vm0 = vnez %v2874_v22  ;;  %vm2894_vm9 = vnez %v2868_v4 }
  0x4a   : > { %2156 = vmatpush1.bf16.msk.msra.mxu1 %vm2888_vm0, %v2271_v15 }
  0x4b   : > { %2157 = vmatprep.subr.bf16.mxu1 %v2276_v39 }
  0x83   : > { %v342_v47 = vpop.permute.xlu0 %341 }
  0x84   : > { %v343_v48 = vrot.slane %v342_v47, 7 }
  0x86   : > { %v345_v51 = vsel %vm344_vm8, %v343_v48, %v342_v47 }
  0x87   : > { %350 = vst.msk [vmem:[#allocation3] sm:$0x7] %vm349_vm7, %v345_v51  ;;  %vm474_vm7 = vcmp.eq.s32.totalorder %v406_v52, %v2360_v7 }
  0x88   : > { %vm2146_vm12 = vmpackc.low %vm476_vm11, %vm474_vm7  ;;  %vm2889_vm7 = vnez %v2876_v25  ;;  %vm2890_vm11 = vnez %v2878_v28 }
  0x89   : > { %2147 = vmatpush1.bf16.msk.msra.mxu0 %vm2146_vm12, %v2271_v15  ;;  %2159 = vmatpush1.bf16.msk.msra.mxu1 %vm2889_vm7, %v2271_v15  ;;  %vm2892_vm12 = vnez %v2882_v34 }
  0x8a   : > { %1886 = vmatprep.subr.msk.mxu0 %vm630_vm14, %v1821_v56  ;;  %2160 = vmatprep.subr.bf16.mxu1 %v2276_v39 }
  0x8d   : > { %2162 = vmatpush1.bf16.msk.msra.mxu1 %vm2890_vm11, %v2271_v15  ;;  %vm2896_vm11 = vcmp.eq.s32.totalorder %v2475_v32, %v2360_v7 }
  0x8e   : > { %v351_v54 = vld [vmem:[#allocation3] sm:$0x7]  ;;  %2163 = vmatprep.subr.bf16.mxu1 %v2276_v39 }
  0x8f   : > { %781 = vst.msk [vmem:[#allocation3] sm:$0x3] %vm779_vm2, %v2269_v1  ;;  %360 = vrot.lane.b32.xlu1 %v351_v54, %s2272_s12  ;;  %353 = vrot.lane.b32.xlu0 %v351_v54, %s2273_s13  ;;  %vm2891_vm2 = vnez %v2880_v31  ;;  %v1788_v31 = vsel %vm2896_vm11, 1.0, %v2269_v1  ;;  %vm942_vm11 = vcmask 48128  }
  0x91   : > { %2165 = vmatpush1.bf16.msk.msra.mxu1 %vm2891_vm2, %v2271_v15  ;;  %vm840_vm2 = vcmask 1041408  }
  0x92   : > { %2166 = vmatprep.subr.bf16.mxu1 %v2276_v39 }
  0x93   : > { %367 = vrot.lane.b32.xlu1 %v351_v54, %s2274_s14 }
  0x95   : > { %2168 = vmatpush1.bf16.msk.msra.mxu1 %vm2892_vm12, %v2271_v15  ;;  %vm921_vm12 = vcmask 524304  }
  0x96   : > { %2169 = vmatprep.subr.bf16.mxu1 %v2276_v39 }
  0x99   : > { %2171 = vmatpush1.bf16.msk.msra.mxu1 %vm2893_vm15, %v2271_v15  ;;  %vm938_vm15 = vcmask 507904  }
  0x9a   : > { %876 = vmatprep.subr.mxu1 %v2269_v1 }
  0x9d   : > { %1905 = vmatpush1.msk.msra.mxu1 %vm840_vm2, %v1788_v31  ;;  %vm1023_vm2 = vcmask 531456  }
  0x9e   : > { %1988 = vmatprep.subr.mxu1 %v2269_v1  ;;  %1029 = vst.msk [vmem:[#allocation2 + $0x20] sm:$0xff] %vm1023_vm2, %v2269_v1  ;;  %1028 = vst.msk [vmem:[#allocation2 + $0x10] sm:$0xff] %vm1023_vm2, %v2269_v1 }
  0x9f   : > { %1030 = vst.msk [vmem:[#allocation2 + $0x30] sm:$0xff] %vm1023_vm2, %v2269_v1  ;;  %1031 = vst.msk [vmem:[#allocation2 + $0x40] sm:$0xff] %vm1023_vm2, %v2269_v1 }
 0x101   : > { %v361_v57 = vpop.permute.xlu1 %360  ;;  %v354_v58 = vpop.permute.xlu0 %353 }
 0x102   : > { %v362_v59 = vrot.slane %v361_v57, 1  ;;  %v355_v60 = vrot.slane %v354_v58, 1 }
 0x104   : > { %v357_v61 = vsel %vm356_vm5, %v354_v58, %v355_v60  ;;  %v364_v0 = vsel %vm363_vm3, %v361_v57, %v362_v59  ;;  %v914_v59 = vld [vmem:[%s2843_s1] sm:$0xff] }
 0x105   : > { %v359_v62 = vadd.f32 %v357_v61, %v351_v54  ;;  %v368_v63 = vpop.permute.xlu1 %367 }
 0x106   : > { %v369_v3 = vrot.slane %v368_v63, 1 }
 0x107   : > { %v366_v6 = vadd.f32 %v364_v0, %v359_v62 }
 0x108   : > { %v371_v8 = vsel %vm370_vm6, %v368_v63, %v369_v3 }
 0x109   : > { %v373_v9 = vadd.f32 %v371_v8, %v366_v6  ;;  %v1025_v6 = vld [vmem:[%s2844_s2] sm:$0xff] }
 0x10b   : > { %v374_v12 = vmul.f32 0.25, %v373_v9 }
 0x10d   : > { %v620_v14 = vrot.slane %v374_v12, %v619_v10  ;;  %v616_v17 = vrot.slane %v374_v12, %v615_v11  ;;  %v624_v23 = vrot.slane %v374_v12, %v623_v21 }
 0x10f   : > { %701 = vmatprep.mubr.f32.mxu0 %v620_v14 }
 0x110   : > { %702 = vmatmul.mubr.f32.vlgmr.msra.gmra.mrb[0].mxu0 %v616_v17 }
 0x111   : > { %1887 = vmatpush1.msk.msra.mxu0 %vm630_vm14, %v1820_v18  ;;  %772 = vmatprep.mubr.f32.mxu0 %v2269_v1 }
 0x118   : > { %1888 = vmatmul.mubr.msk.f32.vlgmr.msra.gmra.mrb[0].mxu0 %vm627_vm4, %v624_v23  ;;  %vm2895_vm4 = vmand %vm2339_vm1, %vm2894_vm9  ;;  %vm915_vm1 = vcmask 529408   ;;  %vm933_vm9 = vcmask 516096  }
 0x119   : > { %916 = vst.msk [vmem:[#allocation2] sm:$0x3f] %vm915_vm1, %v2269_v1  ;;  %vm1237_vm1 = vcmask 269312  }
 0x11a   : > { %1248 = vst.msk [vmem:[#allocation2 + $0x60] sm:$0xff] %vm1237_vm1, %v2269_v1  ;;  %1249 = vst.msk [vmem:[#allocation2 + $0x70] sm:$0xff] %vm1237_vm1, %v2269_v1 }
 0x11b   : > { %1250 = vst.msk [vmem:[#allocation2 + $0x80] sm:$0xff] %vm1237_vm1, %v2269_v1  ;;  %1251 = vst.msk [vmem:[#allocation2 + $0x90] sm:$0xff] %vm1237_vm1, %v2269_v1 }
 0x1eb   : > { %v774_v29 = vpop.f32.mrb[0].mxu0 }
 0x1ec   : > { %v776_v33 = vpop.f32.mrb[1].mxu0 }
 0x1ed   : > { %v784_v35 = vcombine.low %v774_v29, %v776_v33 }
 0x1ef   : > { %v791_v36 = vrot.slane %v784_v35, %v790_v30 }
 0x1f1   : > { %v798_v38 = vrot.slane %v791_v36, %v790_v30 }
 0x1f3   : > { %799 = vrot.lane.b32.xlu0 %v798_v38, %s2270_s11 }
 0x265   : > { %v800_v28 = vpop.permute.xlu0 %799 }
 0x266   : > { %v801_v40 = vrot.slane %v800_v28, 7 }
 0x268   : > { %v802_v41 = vsel %vm344_vm8, %v801_v40, %v800_v28 }
 0x269   : > { %806 = vst.msk [vmem:[#allocation3] sm:$0x3] %vm2895_vm4, %v802_v41  ;;  %vm946_vm4 = vcmask 1045504  }
 0x270   : > { %v807_v34 = vld [vmem:[#allocation3] sm:$0x3] }
 0x271   : > { %815 = vrot.lane.b32.xlu0 %v807_v34, %s2272_s12  ;;  %809 = vrot.lane.b32.xlu1 %v807_v34, %s2273_s13 }
 0x275   : > { %821 = vrot.lane.b32.xlu1 %v807_v34, %s2274_s14 }
 0x2e3   : > { %v816_v2 = vpop.permute.xlu0 %815  ;;  %v810_v4 = vpop.permute.xlu1 %809 }
 0x2e4   : > { %v817_v37 = vrot.slane %v816_v2, 1  ;;  %v811_v42 = vrot.slane %v810_v4, 1 }
 0x2e6   : > { %v812_v43 = vsel %vm356_vm5, %v810_v4, %v811_v42  ;;  %v818_v45 = vsel %vm363_vm3, %v816_v2, %v817_v37  ;;  %vm928_vm5 = vcmask 524288   ;;  %vm1252_vm3 = vcmask 262144  }
 0x2e7   : > { %v814_v44 = vadd.f32 %v812_v43, %v807_v34  ;;  %v822_v32 = vpop.permute.xlu1 %821  ;;  %1032 = vst.msk [vmem:[#allocation2 + $0x50] sm:$0x1] %vm928_vm5, %v2269_v1  ;;  %940 = vst.msk [vmem:[#allocation2 + $0x5] sm:$0x1] %vm928_vm5, %v2277_v53 }
 0x2e8   : > { %v823_v46 = vrot.slane %v822_v32, 1  ;;  %1253 = vst.msk [vmem:[#allocation2 + $0xa0] sm:$0x1] %vm1252_vm3, %v2269_v1 }
 0x2e9   : > { %v820_v47 = vadd.f32 %v818_v45, %v814_v44  ;;  %1055 = vst.msk [vmem:[#allocation2 + $0x50] sm:$0x1] %vm928_vm5, %v2277_v53 }
 0x2ea   : > { %v824_v48 = vsel %vm370_vm6, %v822_v32, %v823_v46  ;;  %1294 = vst.msk [vmem:[#allocation2 + $0xa0] sm:$0x1] %vm1252_vm3, %v2277_v53  ;;  %vm2278_vm6 = vmmov 0   ;;  %vm1062_vm3 = vcmask 334848  }
 0x2eb   : > { %v826_v49 = vadd.f32 %v824_v48, %v820_v47 }
 0x2ed   : > { %v827_v50 = vmul.f32 0.25, %v826_v49 }
 0x2ef   : > { %v836_v51 = vrot.slane %v827_v50, %v619_v10  ;;  %v832_v52 = vrot.slane %v827_v50, %v615_v11 }
 0x2f0   : > { %v1061_v0 = vld [vmem:[#allocation2 + $0x50] sm:$0x1] }
 0x2f1   : > { %1906 = vmatprep.mubr.msk.f32.mxu1 %vm344_vm8, %v836_v51  ;;  %vm926_vm8 = vcmask 524296   ;;  %1247 = vst.msk [vmem:[#allocation2 + $0x50] sm:$0xff] %vm1237_vm1, %v2269_v1 }
 0x2f2   : > { %909 = vmatmul.mubr.f32.vlgmr.msra.gmra.mrb[0].mxu1 %v832_v52 }
 0x2f3   : > { %1990 = vmatprep.mubr.msk.f32.mxu1 %vm2278_vm6, %v2269_v1 }
 0x3c5   : > { %v910_v5 = vpop.f32.mrb[0].mxu1 }
 0x3c6   : > { %929 = vst.msk [vmem:[#allocation2 + $0x2] sm:$0x1] %vm928_vm5, %v910_v5  ;;  %923 = vrot.lane.b32.xlu1 %v910_v5, %s2279_s15  ;;  %918 = vrot.lane.b32.xlu0 %v910_v5, %s2270_s11  ;;  %v912_v54 = vpop.f32.mrb[1].mxu1 }
 0x3c7   : > { %v1305_v54 = vld [vmem:[#allocation2 + $0xa0] sm:$0x1] }
 0x3ca   : > { %935 = vrot.lane.b32.xlu1 %v910_v5, %s2272_s12  ;;  %930 = vrot.lane.b32.xlu0 %v910_v5, %s2273_s13 }
 0x438   : > { %v924_v55 = vpop.permute.xlu1 %923  ;;  %v919_v56 = vpop.permute.xlu0 %918 }
 0x439   : > { %927 = vst.msk [vmem:[#allocation2 + $0x1] sm:$0x1] %vm926_vm8, %v924_v55  ;;  %vm1042_vm8 = vcmask 531464   ;;  %v1241_v55 = vld [vmem:[%s2845_s3 + $0x8] sm:$0xff] }
 0x43a   : > { %922 = vst.msk [vmem:[#allocation2] sm:$0x1] %vm921_vm12, %v919_v56  ;;  %vm1037_vm12 = vcmask 531472  }
 0x43c   : > { %v936_v57 = vpop.permute.xlu1 %935  ;;  %v931_v58 = vpop.permute.xlu0 %930 }
 0x43d   : > { %939 = vst.msk [vmem:[#allocation2 + $0x4] sm:$0x1] %vm938_vm15, %v936_v57  ;;  %vm1053_vm15 = vcmask 515072  }
 0x43e   : > { %934 = vst.msk [vmem:[#allocation2 + $0x3] sm:$0x1] %vm933_vm9, %v931_v58  ;;  %vm1048_vm9 = vcmask 523264  }
 0x445   : > { %v941_v60 = vld [vmem:[#allocation2] sm:$0x3f] }
 0x446   : > { %1989 = vmatpush3.msk.msra.mxu1 %vm946_vm4, %v941_v60  ;;  %1027 = vst.msk [vmem:[#allocation2] sm:$0xff] %vm1023_vm2, %v2269_v1  ;;  %vm2280_vm4 = vmmov 1  }
 0x447   : > { %1991 = vmatmul.mubr.msk.f32.vlgmr.msra.gmra.mrb[2].mxu1 %vm942_vm11, %v914_v59  ;;  %vm2181_vm11 = vmpackc.low %vm630_vm14, %vm2280_vm4 }
 0x448   : > { %2005 = vmatprep.mubr.msk.f32.mxu1 %vm1062_vm3, %v1025_v6 }
 0x51a   : > { %v1016_v61 = vpop.f32.mrb[2].mxu1 }
 0x51b   : > { %vm1020_vm5 = vcmp.gt.f32.partialorder %v1016_v61, 0.0  ;;  %v1021_v62 = vmul.f32 0.1, %v1016_v61  ;;  %v1992_v63 = vpop.f32.mrb[3].mxu1 }
 0x51d   : > { %v1022_v3 = vsel %vm1020_vm5, %v1016_v61, %v1021_v62  ;;  %vm2897_vm5 = vcmp.eq.s32.totalorder %v2409_v20, %v2360_v7 }
 0x51e   : > { %1024 = vst.msk [vmem:[%s320_s21] sm:$0xff] %vm1023_vm2, %v1022_v3  ;;  %1044 = vst.msk [vmem:[#allocation2 + $0x20] sm:$0xff] %vm1023_vm2, %v1022_v3  ;;  %1039 = vrot.lane.b32.xlu1 %v1022_v3, %s2279_s15  ;;  %1034 = vrot.lane.b32.xlu0 %v1022_v3, %s2270_s11  ;;  %v1772_v29 = vsel %vm2897_vm5, 1.0, %v2269_v1  ;;  %vm1523_vm5 = vcmask 400384   ;;  %s333_s21 = scalar_lea.vmem %s2850_s8, %s2900_s28 }
 0x522   : > { %1050 = vrot.lane.b32.xlu1 %v1022_v3, %s2272_s12  ;;  %1045 = vrot.lane.b32.xlu0 %v1022_v3, %s2273_s13 }
 0x525   : > { %v1058_v8 = vld [vmem:[#allocation2 + $0x20] sm:$0xff] }
 0x526   : > { %1244 = vst.msk [vmem:[#allocation2 + $0x20] sm:$0xff] %vm1237_vm1, %v2269_v1 }
 0x590   : > { %v1040_v9 = vpop.permute.xlu1 %1039  ;;  %v1035_v10 = vpop.permute.xlu0 %1034 }
 0x591   : > { %1043 = vst.msk [vmem:[#allocation2 + $0x10] sm:$0xff] %vm1042_vm8, %v1040_v9  ;;  %vm1291_vm8 = vcmask 252928  }
 0x592   : > { %1038 = vst.msk [vmem:[#allocation2] sm:$0xff] %vm1037_vm12, %v1035_v10  ;;  %vm1491_vm12 = vcmask 131072  }
 0x594   : > { %v1051_v11 = vpop.permute.xlu1 %1050  ;;  %v1046_v12 = vpop.permute.xlu0 %1045 }
 0x595   : > { %1054 = vst.msk [vmem:[#allocation2 + $0x40] sm:$0xff] %vm1053_vm15, %v1051_v11  ;;  %vm2898_vm15 = vcmp.eq.s32.totalorder %v2373_v13, %v2360_v7 }
 0x596   : > { %1049 = vst.msk [vmem:[#allocation2 + $0x30] sm:$0xff] %vm1048_vm9, %v1046_v12 }
 0x598   : > { %v1057_v17 = vld [vmem:[#allocation2 + $0x10] sm:$0xff] }
 0x599   : > { %v1056_v14 = vld [vmem:[#allocation2] sm:$0xff]  ;;  %1243 = vst.msk [vmem:[#allocation2 + $0x10] sm:$0xff] %vm1237_vm1, %v2269_v1 }
 0x59a   : > { %v2172_v18 = vpack.c.bf16 %v1057_v17, %v1056_v14  ;;  %1242 = vst.msk [vmem:[#allocation2] sm:$0xff] %vm1237_vm1, %v2269_v1 }
 0x59c   : > { %2173 = vmatprep.subr.bf16.mxu1 %v2172_v18  ;;  %v1060_v21 = vld [vmem:[#allocation2 + $0x40] sm:$0xff] }
 0x59d   : > { %2175 = vmatpush3.bf16.msra.mxu1 %v2172_v18  ;;  %v1059_v23 = vld [vmem:[#allocation2 + $0x30] sm:$0xff]  ;;  %1246 = vst.msk [vmem:[#allocation2 + $0x40] sm:$0xff] %vm1237_vm1, %v2269_v1  ;;  %v2180_v26 = vpack.c.bf16 %v1061_v0, %v1060_v21 }
 0x59e   : > { %v2176_v24 = vpack.c.bf16 %v1059_v23, %v1058_v8  ;;  %1245 = vst.msk [vmem:[#allocation2 + $0x30] sm:$0xff] %vm1237_vm1, %v2269_v1  ;;  %v1484_v23 = vld [vmem:[%s2846_s4] sm:$0x1] }
 0x5a0   : > { %2177 = vmatprep.subr.bf16.mxu1 %v2176_v24 }
 0x5a1   : > { %2179 = vmatpush3.bf16.msra.mxu1 %v2176_v24 }
 0x5a2   : > { %2182 = vmatprep.subr.msk.bf16.mxu1 %vm2181_vm11, %v2180_v26 }
 0x5a5   : > { %2185 = vmatpush3.bf16.msk.msra.mxu1 %vm2181_vm11, %v2180_v26  ;;  %vm1481_vm11 = vcmask 138240  }
 0x5a6   : > { %2187 = vmatprep.subr.msk.bf16.mxu1 %vm2386_vm13, %v2271_v15 }
 0x5a8   : > { %2006 = vmatmul.mubr.msk.f32.vlgmr.msra.gmra.mrb[4].mxu1 %vm1062_vm3, %v1026_v27  ;;  %vm1282_vm3 = vcmask 261120  }
 0x5a9   : > { %2189 = vmatpush3.bf16.msk.msra.mxu1 %vm2386_vm13, %v2271_v15 }
 0x5aa   : > { %2191 = vmatprep.subr.msk.bf16.mxu1 %vm2887_vm10, %v2271_v15 }
 0x5ad   : > { %2193 = vmatpush3.bf16.msk.msra.mxu1 %vm2887_vm10, %v2271_v15 }
 0x5ae   : > { %2195 = vmatprep.subr.msk.bf16.mxu1 %vm2888_vm0, %v2271_v15 }
 0x5b1   : > { %2197 = vmatpush3.bf16.msk.msra.mxu1 %vm2888_vm0, %v2271_v15 }
 0x5b2   : > { %2199 = vmatprep.subr.msk.bf16.mxu1 %vm2889_vm7, %v2271_v15 }
 0x5b5   : > { %2201 = vmatpush3.bf16.msk.msra.mxu1 %vm2889_vm7, %v2271_v15 }
 0x5b6   : > { %2024 = vmatprep.subr.msk.mxu1 %vm630_vm14, %v1772_v29 }
 0x5b9   : > { %2025 = vmatpush3.msk.msra.mxu1 %vm630_vm14, %v1772_v29 }
 0x5ba   : > { %2223 = vmatprep.subr.msk.bf16.mxu1 %vm2386_vm13, %v2271_v15 }
 0x67b   : > { %v2007_v22 = vpop.f32.mrb[4].mxu1 }
 0x67c   : > { %v1150_v30 = vmul.f32 0.1, %v2007_v22  ;;  %v1138_v33 = vpop.f32.mrb[5].mxu1  ;;  %vm1148_vm0 = vcmp.gt.f32.partialorder %v2007_v22, 0.0 }
 0x67d   : > { %vm1147_vm7 = vcmp.gt.f32.partialorder %v1138_v33, 0.0  ;;  %v1149_v25 = vmul.f32 0.1, %v1138_v33 }
 0x67e   : > { %v1152_v36 = vsel %vm1148_vm0, %v2007_v22, %v1150_v30 }
 0x67f   : > { %v1151_v35 = vsel %vm1147_vm7, %v1138_v33, %v1149_v25 }
 0x680   : > { %2026 = vmatprep.mubr.msk.f32.mxu1 %vm1023_vm2, %v1151_v35 }
 0x681   : > { %2027 = vmatmul.mubr.msk.f32.vlgmr.msra.gmra.mrb[6].mxu1 %vm1023_vm2, %v1152_v36  ;;  %vm1271_vm2 = vcmask 269320  }
 0x682   : > { %2225 = vmatpush3.bf16.msk.msra.mxu1 %vm2386_vm13, %v2271_v15  ;;  %vm1306_vm13 = vcmask 662528  }
 0x683   : > { %2227 = vmatprep.subr.msk.bf16.mxu1 %vm2887_vm10, %v2271_v15 }
 0x686   : > { %2229 = vmatpush3.bf16.msk.msra.mxu1 %vm2887_vm10, %v2271_v15  ;;  %v1240_v15 = vld [vmem:[%s2845_s3] sm:$0xff]  ;;  %vm1262_vm10 = vcmask 269328  }
 0x687   : > { %2051 = vmatprep.mubr.msk.f32.mxu0 %vm1306_vm13, %v1240_v15 }
 0x754   : > { %v2028_v20 = vpop.f32.mrb[6].mxu1 }
 0x755   : > { %1275 = vst.msk [vmem:[#allocation2 + $0x50] sm:$0xff] %vm1237_vm1, %v2028_v20  ;;  %1258 = vrot.lane.b32.xlu1 %v2028_v20, %s2270_s11  ;;  %v1228_v16 = vpop.f32.mrb[7].mxu1  ;;  %1239 = vst.msk [vmem:[%s325_s9 + $0x8] sm:$0xff] %vm1237_vm1, %v2028_v20 }
 0x756   : > { %1274 = vst.msk [vmem:[#allocation2 + $0x40] sm:$0xff] %vm1237_vm1, %v1228_v16  ;;  %1256 = vrot.lane.b32.xlu0 %v1228_v16, %s2270_s11  ;;  %1238 = vst.msk [vmem:[%s325_s9] sm:$0xff] %vm1237_vm1, %v1228_v16 }
 0x759   : > { %1267 = vrot.lane.b32.xlu1 %v2028_v20, %s2279_s15 }
 0x75a   : > { %1265 = vrot.lane.b32.xlu0 %v1228_v16, %s2279_s15 }
 0x75c   : > { %v1300_v45 = vld [vmem:[#allocation2 + $0x50] sm:$0xff] }
 0x75d   : > { %1278 = vrot.lane.b32.xlu1 %v2028_v20, %s2273_s13  ;;  %v1299_v32 = vld [vmem:[#allocation2 + $0x40] sm:$0xff]  ;;  %1490 = vst.msk [vmem:[#allocation2 + $0x50] sm:$0xff] %vm1481_vm11, %v2269_v1 }
 0x75e   : > { %1276 = vrot.lane.b32.xlu0 %v1228_v16, %s2273_s13  ;;  %v2210_v47 = vpack.c.bf16 %v1300_v45, %v1299_v32  ;;  %1489 = vst.msk [vmem:[#allocation2 + $0x40] sm:$0xff] %vm1481_vm11, %v2269_v1 }
 0x761   : > { %1287 = vrot.lane.b32.xlu1 %v2028_v20, %s2272_s12 }
 0x762   : > { %1285 = vrot.lane.b32.xlu0 %v1228_v16, %s2272_s12 }
 0x7c7   : > { %v1259_v19 = vpop.permute.xlu1 %1258 }
 0x7c8   : > { %1264 = vst.msk [vmem:[#allocation2 + $0x10] sm:$0xff] %vm1262_vm10, %v1259_v19  ;;  %v1257_v38 = vpop.permute.xlu0 %1256 }
 0x7c9   : > { %1263 = vst.msk [vmem:[#allocation2] sm:$0xff] %vm1262_vm10, %v1257_v38 }
 0x7cb   : > { %v1268_v28 = vpop.permute.xlu1 %1267 }
 0x7cc   : > { %1273 = vst.msk [vmem:[#allocation2 + $0x30] sm:$0xff] %vm1271_vm2, %v1268_v28  ;;  %v1266_v40 = vpop.permute.xlu0 %1265 }
 0x7cd   : > { %1272 = vst.msk [vmem:[#allocation2 + $0x20] sm:$0xff] %vm1271_vm2, %v1266_v40 }
 0x7cf   : > { %v1279_v41 = vpop.permute.xlu1 %1278  ;;  %v1296_v31 = vld [vmem:[#allocation2 + $0x10] sm:$0xff] }
 0x7d0   : > { %1284 = vst.msk [vmem:[#allocation2 + $0x70] sm:$0xff] %vm1282_vm3, %v1279_v41  ;;  %v1277_v34 = vpop.permute.xlu0 %1276  ;;  %v1295_v2 = vld [vmem:[#allocation2] sm:$0xff] }
 0x7d1   : > { %1283 = vst.msk [vmem:[#allocation2 + $0x60] sm:$0xff] %vm1282_vm3, %v1277_v34  ;;  %v2202_v4 = vpack.c.bf16 %v1296_v31, %v1295_v2 }
 0x7d2   : > { %1485 = vst.msk [vmem:[#allocation2] sm:$0xff] %vm1481_vm11, %v2269_v1  ;;  %1486 = vst.msk [vmem:[#allocation2 + $0x10] sm:$0xff] %vm1481_vm11, %v2269_v1 }
 0x7d3   : > { %v1288_v37 = vpop.permute.xlu1 %1287  ;;  %2203 = vmatprep.subr.bf16.mxu0 %v2202_v4  ;;  %v1298_v42 = vld [vmem:[#allocation2 + $0x30] sm:$0xff] }
 0x7d4   : > { %1293 = vst.msk [vmem:[#allocation2 + $0x90] sm:$0xff] %vm1291_vm8, %v1288_v37  ;;  %2205 = vmatpush3.bf16.msra.mxu0 %v2202_v4  ;;  %v1286_v43 = vpop.permute.xlu0 %1285  ;;  %v1297_v44 = vld [vmem:[#allocation2 + $0x20] sm:$0xff] }
 0x7d5   : > { %1292 = vst.msk [vmem:[#allocation2 + $0x80] sm:$0xff] %vm1291_vm8, %v1286_v43  ;;  %v2206_v46 = vpack.c.bf16 %v1298_v42, %v1297_v44 }
 0x7d6   : > { %1488 = vst.msk [vmem:[#allocation2 + $0x30] sm:$0xff] %vm1481_vm11, %v2269_v1  ;;  %1487 = vst.msk [vmem:[#allocation2 + $0x20] sm:$0xff] %vm1481_vm11, %v2269_v1 }
 0x7d7   : > { %2207 = vmatprep.subr.bf16.mxu0 %v2206_v46  ;;  %v1302_v49 = vld [vmem:[#allocation2 + $0x70] sm:$0xff] }
 0x7d8   : > { %v1301_v48 = vld [vmem:[#allocation2 + $0x60] sm:$0xff]  ;;  %2209 = vmatpush3.bf16.msra.mxu0 %v2206_v46 }
 0x7d9   : > { %1492 = vst.msk [vmem:[#allocation2 + $0x60] sm:$0x1] %vm1491_vm12, %v2269_v1  ;;  %2211 = vmatprep.subr.bf16.mxu0 %v2210_v47  ;;  %v2214_v50 = vpack.c.bf16 %v1302_v49, %v1301_v48 }
 0x7da   : > { %1515 = vst.msk [vmem:[#allocation2 + $0x60] sm:$0x1] %vm1491_vm12, %v2277_v53  ;;  %v1764_v53 = vsel %vm2898_vm15, 1.0, %v2269_v1 }
 0x7db   : > { %v1304_v52 = vld [vmem:[#allocation2 + $0x90] sm:$0xff]  ;;  %2062 = vmatprep.subr.msk.mxu1 %vm630_vm14, %v1764_v53 }
 0x7dc   : > { %2213 = vmatpush3.bf16.msra.mxu0 %v2210_v47  ;;  %v1303_v51 = vld [vmem:[#allocation2 + $0x80] sm:$0xff]  ;;  %2063 = vmatpush3.msk.msra.mxu1 %vm630_vm14, %v1764_v53 }
 0x7dd   : > { %2215 = vmatprep.subr.bf16.mxu0 %v2214_v50  ;;  %v2218_v5 = vpack.c.bf16 %v1304_v52, %v1303_v51  ;;  %2230 = vmatprep.subr.bf16.mxu1 %v2276_v39 }
 0x7e0   : > { %2217 = vmatpush3.bf16.msra.mxu0 %v2214_v50 }
 0x7e1   : > { %2219 = vmatprep.subr.bf16.mxu0 %v2218_v5  ;;  %v1522_v21 = vld [vmem:[#allocation2 + $0x60] sm:$0x1] }
 0x7e4   : > { %2221 = vmatpush3.bf16.msra.mxu0 %v2218_v5 }
 0x7e5   : > { %2049 = vmatprep.subr.msk.mxu0 %vm630_vm14, %v1305_v54 }
 0x7e8   : > { %2050 = vmatpush3.msk.msra.mxu0 %vm630_vm14, %v1305_v54 }
 0x7e9   : > { %2052 = vmatmul.mubr.msk.f32.vlgmr.msra.gmra.mrb[2].mxu0 %vm1306_vm13, %v1241_v55 }
 0x8bc   : > { %v2053_v56 = vpop.f32.mrb[2].mxu0 }
 0x8bd   : > { %v1394_v57 = vmul.f32 0.1, %v2053_v56  ;;  %v1382_v58 = vpop.f32.mrb[3].mxu0  ;;  %vm1392_vm9 = vcmp.gt.f32.partialorder %v2053_v56, 0.0 }
 0x8be   : > { %vm1391_vm4 = vcmp.gt.f32.partialorder %v1382_v58, 0.0  ;;  %v1393_v59 = vmul.f32 0.1, %v1382_v58 }
 0x8bf   : > { %v1396_v61 = vsel %vm1392_vm9, %v2053_v56, %v1394_v57 }
 0x8c0   : > { %v1395_v60 = vsel %vm1391_vm4, %v1382_v58, %v1393_v59 }
 0x8c1   : > { %2064 = vmatprep.mubr.msk.f32.mxu1 %vm1237_vm1, %v1395_v60 }
 0x8c2   : > { %2065 = vmatmul.mubr.msk.f32.vlgmr.msra.gmra.mrb[8].mxu1 %vm1237_vm1, %v1396_v61  ;;  %vm1512_vm1 = vcmask 130048  }
 0x8c3   : > { %2081 = vmatprep.mubr.msk.f32.mxu1 %vm2278_vm6, %v2269_v1  ;;  %vm1501_vm6 = vcmask 138248  }
 0x995   : > { %v2066_v7 = vpop.f32.mrb[8].mxu1 }
 0x996   : > { %1483 = vst.msk [vmem:[%s330_s18 + $0x8] sm:$0xff] %vm1481_vm11, %v2066_v7  ;;  %1505 = vst.msk [vmem:[#allocation2 + $0x30] sm:$0xff] %vm1481_vm11, %v2066_v7  ;;  %1497 = vrot.lane.b32.xlu1 %v2066_v7, %s2279_s15  ;;  %v1472_v13 = vpop.f32.mrb[9].mxu1 }
 0x997   : > { %1482 = vst.msk [vmem:[%s330_s18] sm:$0xff] %vm1481_vm11, %v1472_v13  ;;  %1504 = vst.msk [vmem:[#allocation2 + $0x20] sm:$0xff] %vm1481_vm11, %v1472_v13  ;;  %1495 = vrot.lane.b32.xlu0 %v1472_v13, %s2279_s15 }
 0x99a   : > { %1508 = vrot.lane.b32.xlu1 %v2066_v7, %s2273_s13 }
 0x99b   : > { %1506 = vrot.lane.b32.xlu0 %v1472_v13, %s2273_s13 }
 0x99d   : > { %v1519_v11 = vld [vmem:[#allocation2 + $0x30] sm:$0xff] }
 0x99e   : > { %v1518_v10 = vld [vmem:[#allocation2 + $0x20] sm:$0xff] }
 0x99f   : > { %v2234_v12 = vpack.c.bf16 %v1519_v11, %v1518_v10 }
 0xa08   : > { %v1498_v62 = vpop.permute.xlu1 %1497 }
 0xa09   : > { %1503 = vst.msk [vmem:[#allocation2 + $0x10] sm:$0xff] %vm1501_vm6, %v1498_v62  ;;  %v1496_v63 = vpop.permute.xlu0 %1495 }
 0xa0a   : > { %1502 = vst.msk [vmem:[#allocation2] sm:$0xff] %vm1501_vm6, %v1496_v63 }
 0xa0c   : > { %v1509_v0 = vpop.permute.xlu1 %1508 }
 0xa0d   : > { %1514 = vst.msk [vmem:[#allocation2 + $0x50] sm:$0xff] %vm1512_vm1, %v1509_v0  ;;  %v1507_v3 = vpop.permute.xlu0 %1506 }
 0xa0e   : > { %1513 = vst.msk [vmem:[#allocation2 + $0x40] sm:$0xff] %vm1512_vm1, %v1507_v3 }
 0xa10   : > { %v1517_v6 = vld [vmem:[#allocation2 + $0x10] sm:$0xff] }
 0xa11   : > { %v1516_v8 = vld [vmem:[#allocation2] sm:$0xff] }
 0xa12   : > { %v2231_v9 = vpack.c.bf16 %v1517_v6, %v1516_v8 }
 0xa14   : > { %2232 = vmatpush3.bf16.msra.mxu1 %v2231_v9  ;;  %v1521_v17 = vld [vmem:[#allocation2 + $0x50] sm:$0xff] }
 0xa15   : > { %2233 = vmatprep.subr.bf16.mxu1 %v2276_v39  ;;  %v1520_v14 = vld [vmem:[#allocation2 + $0x40] sm:$0xff] }
 0xa16   : > { %v2237_v18 = vpack.c.bf16 %v1521_v17, %v1520_v14 }
 0xa18   : > { %2235 = vmatpush3.bf16.msra.mxu1 %v2234_v12 }
 0xa19   : > { %2236 = vmatprep.subr.bf16.mxu1 %v2276_v39 }
 0xa1c   : > { %2238 = vmatpush3.bf16.msra.mxu1 %v2237_v18 }
 0xa1d   : > { %2079 = vmatprep.subr.mxu1 %v2269_v1 }
 0xa20   : > { %2080 = vmatpush3.msk.msra.mxu1 %vm630_vm14, %v1522_v21 }
 0xa21   : > { %2082 = vmatmul.mubr.msk.f32.vlgmr.msra.gmra.mrb[10].mxu1 %vm1523_vm5, %v1484_v23 }
 0xaf4   : > { %v1596_v24 = vpop.f32.mrb[10].mxu1 }
 0xaf5   : > { %1600 = vst.msk [vmem:[%s333_s21] sm:$0x1] %vm1491_vm12, %v1596_v24  ;;  %v2083_v39 = vpop.f32.mrb[11].mxu1 }
 0xaf6 PF: > { %s19_s27 = sadd.s32 1, %s2267_s27  }
 0xaf7   : > { %p16_p4 = scmp.ge.s32.totalorder %s19_s27, 6  }
 0xaf9   :  { %18 = sbr.rel (!%p16_p4) target bundleno = 1 (0x1), region = 106 }

// kernel: _lambda_.4
= control target key start
LH: loop header
LB: loop body
LE: loop exit
PB: predicated region body
PF: predicated region fallthrough
CT: control target
= control target key end

     0   :  { %s2207_s27 = smov 0   ;;  %s2690_s0 = inlined_call_operand.vmem [shape: f32[4,1,256], index: 0, kind: input, shape index: {}]   ;;  %s2691_s1 = inlined_call_operand.vmem [shape: f32[8,6], index: 1, kind: input, shape index: {}]   ;;  %s2692_s2 = inlined_call_operand.vmem [shape: f32[16,41], index: 2, kind: input, shape index: {}]   ;;  %s2693_s3 = inlined_call_operand.vmem [shape: f32[16,81], index: 3, kind: input, shape index: {}]   ;;  %s2694_s4 = inlined_call_operand.vmem [shape: f32[1,49], index: 4, kind: input, shape index: {}]   ;;  %s2695_s5 = inlined_call_operand.vmem [shape: f32[4,8,129], index: 5, kind: output, shape index: {0}]   ;;  %s2696_s6 = inlined_call_operand.vmem [shape: f32[4,16,65], index: 6, kind: output, shape index: {1}]   ;;  %s2697_s7 = inlined_call_operand.vmem [shape: f32[4,16,33], index: 7, kind: output, shape index: {2}]   ;;  %s2698_s8 = inlined_call_operand.vmem [shape: f32[4,1,33], index: 8, kind: output, shape index: {3}]  }
   0x1 LB: > { %s1686_s28 = sadd.s32 4294967295, %s2148_s27   ;;  %p1690_p0 = scmp.ge.s32.totalorder %s2148_s27, 1  ;;  %s2148_s27 = sphi %s2207_s27, %s19_s27  }
   0x2   : > { %p268_p1 = scmp.lt.s32.totalorder %s2148_s27, 5 }
   0x4   : > { %p269_p2 = pnand %p1690_p0, %p268_p1 }
   0x5   : > { %p314_p3 = scmp.lt.s32.totalorder (!%p269_p2), %s1686_s28, 3  ;;  %v337_v0 = vlaneseq (!%p269_p2)  ;;  %v2150_v1 = vmov (!%p269_p2), 0.0   ;;  %s2151_s11 = smov (!%p269_p2), 2   ;;  %v2152_v13 = vmov (!%p269_p2), 1.0|1.0   ;;  %v2713_v20 = vmov (!%p269_p2), 0 }
   0x6   : > { %272 = sbr.rel (%p269_p2) target bundleno = 2341 (0x925), region = 40  ;;  %782 = vst [vmem:[#allocation2] sm:$0x3f] (!%p269_p2), %v2150_v1  ;;  %935 = vst [vmem:[#allocation2 + $0x10] sm:$0xff] (!%p269_p2), %v2150_v1  ;;  %916 = vmatprep.mubr.f32.mxu1 (!%p269_p2), %v2150_v1  ;;  %v2715_v23 = vmov (!%p269_p2), 0  ;;  %v2717_v26 = vmov (!%p269_p2), 0 }
   0x7   : > { %941 = vst [vmem:[#allocation2 + $0x40] sm:$0xff] (!%p269_p2), %v2150_v1  ;;  %943 = vst [vmem:[#allocation2 + $0x50] sm:$0x1] (!%p269_p2), %v2150_v1  ;;  %vm339_vm0 = vcmp.lt.s32.totalorder (!%p269_p2), %v337_v0, 260  ;;  %v412_v2 = vand.u32 (!%p269_p2), 127, %v337_v0  ;;  %v2230_v3 = vshrl.u32 (!%p269_p2), %v337_v0, 7 }
   0x8   : > { %341 = vst.msk [vmem:[#allocation3] sm:$0x7] (!%p269_p2), %vm339_vm0, %v2150_v1  ;;  %v2719_v29 = vmov (!%p269_p2), 0  ;;  %v2721_v32 = vmov (!%p269_p2), 0  ;;  %v2723_v35 = vmov (!%p269_p2), 0  ;;  %s2153_s12 = smov (!%p269_p2), 126  }
   0x9   : > { %v413_v4 = vadd.s32 (!%p269_p2), 128, %v412_v2  ;;  %v2232_v5 = vmul.u32 (!%p269_p2), 2, %v412_v2  ;;  %v379_v8 = vadd.s32 (!%p269_p2), 8, %v2230_v3  ;;  %v380_v9 = vadd.s32 (!%p269_p2), 16, %v2230_v3  ;;  %s2154_s13 = smov (!%p269_p2), 127   ;;  %s2155_s14 = smov (!%p269_p2), 125  }
   0xa   : > { %v381_v10 = vadd.s32 (!%p269_p2), 24, %v2230_v3  ;;  %v382_v11 = vadd.s32 (!%p269_p2), 32, %v2230_v3  ;;  %v383_v12 = vadd.s32 (!%p269_p2), 40, %v2230_v3  ;;  %v384_v15 = vadd.s32 (!%p269_p2), 48, %v2230_v3  ;;  %s2158_s15 = smov (!%p269_p2), 1  }
   0xb   : > { %v2235_v7 = vmul.u32 (!%p269_p2), 2, %v413_v4  ;;  %vm416_vm2 = vcmp.eq.s32.totalorder (!%p269_p2), %v2230_v3, %v2232_v5  ;;  %vm418_vm4 = vcmp.eq.s32.totalorder (!%p269_p2), %v379_v8, %v2232_v5  ;;  %vm420_vm8 = vcmp.eq.s32.totalorder (!%p269_p2), %v380_v9, %v2232_v5 }
   0xc   : > { %vm422_vm9 = vcmp.eq.s32.totalorder (!%p269_p2), %v381_v10, %v2232_v5  ;;  %vm2253_vm10 = vmpackc.low (!%p269_p2), %vm418_vm4, %vm416_vm2  ;;  %v385_v16 = vadd.s32 (!%p269_p2), 56, %v2230_v3  ;;  %vm424_vm0 = vcmp.eq.s32.totalorder (!%p269_p2), %v382_v11, %v2232_v5  ;;  %v2274_v18 = vadd.s32 (!%p269_p2), 64, %v2230_v3 }
   0xd   : > { %s2740_s28 = smov (!%p314_p3, %s1686_s28), 3  ;;  %vm417_vm1 = vcmp.eq.s32.totalorder %v2230_v3, %v2235_v7  ;;  %vm419_vm3 = vcmp.eq.s32.totalorder %v379_v8, %v2235_v7  ;;  %vm421_vm6 = vcmp.eq.s32.totalorder %v380_v9, %v2235_v7  ;;  %vm423_vm7 = vcmp.eq.s32.totalorder %v381_v10, %v2235_v7  ;;  %vm2265_vm14 = vmpackc.low %vm422_vm9, %vm420_vm8 }
   0xe   : > { %s1691_s29 = sshll.u32 %s2740_s28, 1  ;;  %vm1973_vm5 = vmpackc.low %vm419_vm3, %vm417_vm1  ;;  %vm425_vm11 = vcmp.eq.s32.totalorder %v382_v11, %v2235_v7  ;;  %vm427_vm12 = vcmp.eq.s32.totalorder %v383_v12, %v2235_v7  ;;  %vm426_vm1 = vcmp.eq.s32.totalorder %v383_v12, %v2232_v5  ;;  %vm429_vm2 = vcmp.eq.s32.totalorder %v384_v15, %v2235_v7  ;;  %s2532_s18 = sshll.u32 %s2740_s28, 4 }
   0xf   : > { %s317_s10 = scalar_lea.vmem %s2690_s0, %s1691_s29  ;;  %1974 = vmatprep.subr.msk.bf16.mxu0 %vm1973_vm5, %v2152_v13  ;;  %vm1977_vm13 = vmpackc.low %vm423_vm7, %vm421_vm6  ;;  %vm431_vm3 = vcmp.eq.s32.totalorder %v385_v16, %v2235_v7  ;;  %v387_v19 = vadd.s32 72, %v2230_v3  ;;  %vm428_vm6 = vcmp.eq.s32.totalorder %v384_v15, %v2232_v5  ;;  %vm430_vm7 = vcmp.eq.s32.totalorder %v385_v16, %v2232_v5  ;;  %s322_s21 = scalar_lea.vmem %s2695_s5, %s2532_s18 }
  0x10   : > { %v336_v6 = vld [vmem:[%s317_s10] sm:$0x3]  ;;  %1976 = vmatpush1.bf16.msk.msra.mxu0 %vm2253_vm10, %v2152_v13  ;;  %vm1981_vm15 = vmpackc.low %vm427_vm12, %vm425_vm11  ;;  %vm433_vm8 = vcmp.eq.s32.totalorder %v2274_v18, %v2235_v7  ;;  %v388_v21 = vadd.s32 80, %v2230_v3  ;;  %v389_v22 = vadd.s32 88, %v2230_v3  ;;  %v390_v24 = vadd.s32 96, %v2230_v3  ;;  %s327_s30 = scalar_lea.vmem %s2696_s6, %s2532_s18  ;;  %s332_s17 = scalar_lea.vmem %s2697_s7, %s2532_s18 }
  0x11   : > { %343 = vrot.lane.b32.xlu0 %v336_v6, %s2151_s11  ;;  %1978 = vmatprep.subr.msk.bf16.mxu0 %vm1977_vm13, %v2152_v13  ;;  %vm2281_vm4 = vmpackc.low %vm426_vm1, %vm424_vm0  ;;  %vm435_vm9 = vcmp.eq.s32.totalorder %v387_v19, %v2235_v7  ;;  %vm2699_vm13 = vcmp.eq.s32.totalorder %v2274_v18, %v2232_v5  ;;  %v391_v25 = vadd.s32 104, %v2230_v3  ;;  %v392_v27 = vadd.s32 112, %v2230_v3  ;;  %s335_s20 = scalar_lea.vmem %s2698_s8, %s2740_s28 }
  0x12   : > { %v2714_v20 = vsel %vm2281_vm4, 4294967295, %v2713_v20  ;;  %vm1985_vm5 = vmpackc.low %vm431_vm3, %vm429_vm2  ;;  %vm437_vm0 = vcmp.eq.s32.totalorder %v388_v21, %v2235_v7  ;;  %vm439_vm1 = vcmp.eq.s32.totalorder %v389_v22, %v2235_v7  ;;  %v393_v28 = vadd.s32 120, %v2230_v3 }
  0x13   : > { %vm2296_vm11 = vmpackc.low %vm430_vm7, %vm428_vm6  ;;  %vm438_vm6 = vcmp.eq.s32.totalorder %v389_v22, %v2232_v5  ;;  %vm441_vm7 = vcmp.eq.s32.totalorder %v390_v24, %v2235_v7  ;;  %v2337_v30 = vadd.s32 128, %v2230_v3  ;;  %v395_v31 = vadd.s32 136, %v2230_v3 }
  0x14   : > { %1980 = vmatpush1.bf16.msk.msra.mxu0 %vm2265_vm14, %v2152_v13  ;;  %v2716_v23 = vsel %vm2296_vm11, 4294967295, %v2715_v23  ;;  %vm1989_vm12 = vmpackc.low %vm435_vm9, %vm433_vm8  ;;  %vm443_vm8 = vcmp.eq.s32.totalorder %v391_v25, %v2235_v7  ;;  %v396_v33 = vadd.s32 144, %v2230_v3  ;;  %v397_v34 = vadd.s32 152, %v2230_v3 }
  0x15   : > { %1982 = vmatprep.subr.msk.bf16.mxu0 %vm1981_vm15, %v2152_v13  ;;  %vm434_vm15 = vcmp.eq.s32.totalorder %v387_v19, %v2232_v5  ;;  %vm1993_vm3 = vmpackc.low %vm439_vm1, %vm437_vm0  ;;  %vm442_vm0 = vcmp.eq.s32.totalorder %v391_v25, %v2232_v5  ;;  %vm445_vm1 = vcmp.eq.s32.totalorder %v392_v27, %v2235_v7  ;;  %v398_v36 = vadd.s32 160, %v2230_v3 }
  0x16   : > { %vm2314_vm2 = vmpackc.low %vm434_vm15, %vm2699_vm13  ;;  %vm440_vm15 = vcmp.eq.s32.totalorder %v390_v24, %v2232_v5  ;;  %vm447_vm13 = vcmp.eq.s32.totalorder %v393_v28, %v2235_v7  ;;  %v399_v37 = vadd.s32 168, %v2230_v3  ;;  %v400_v38 = vadd.s32 176, %v2230_v3 }
  0x17   : > { %v2718_v26 = vsel %vm2314_vm2, 4294967295, %v2717_v26  ;;  %v401_v39 = vadd.s32 184, %v2230_v3  ;;  %v402_v40 = vadd.s32 192, %v2230_v3  ;;  %v403_v41 = vadd.s32 200, %v2230_v3 }
  0x18   : > { %1984 = vmatpush1.bf16.msk.msra.mxu0 %vm2281_vm4, %v2152_v13  ;;  %v404_v44 = vadd.s32 208, %v2230_v3  ;;  %v405_v45 = vadd.s32 216, %v2230_v3  ;;  %v406_v48 = vadd.s32 224, %v2230_v3  ;;  %v407_v49 = vadd.s32 232, %v2230_v3 }
  0x19   : > { %1986 = vmatprep.subr.msk.bf16.mxu0 %vm1985_vm5, %v2152_v13  ;;  %vm436_vm5 = vcmp.eq.s32.totalorder %v388_v21, %v2232_v5  ;;  %v408_v51 = vadd.s32 240, %v2230_v3  ;;  %v409_v52 = vadd.s32 248, %v2230_v3  ;;  %v410_v54 = vadd.s32 256, %v2230_v3 }
  0x1a   : > { %vm2328_vm9 = vmpackc.low %vm438_vm6, %vm436_vm5  ;;  %vm444_vm6 = vcmp.eq.s32.totalorder %v392_v27, %v2232_v5  ;;  %v621_v8 = vsub.s32 1, %v2230_v3  ;;  %v617_v9 = vsub.s32 0, %v2230_v3  ;;  %v625_v16 = vsub.s32 2, %v2230_v3 }
  0x1b   : > { %v2720_v29 = vsel %vm2328_vm9, 4294967295, %v2719_v29  ;;  %vm2001_vm5 = vmpackc.low %vm447_vm13, %vm445_vm1  ;;  %vm453_vm1 = vcmp.eq.s32.totalorder %v396_v33, %v2235_v7  ;;  %v2156_v22 = vmov 1.0  }
  0x1c   : > { %1988 = vmatpush1.bf16.msk.msra.mxu0 %vm2296_vm11, %v2152_v13 }
  0x1d   : > { %1990 = vmatprep.subr.msk.bf16.mxu0 %vm1989_vm12, %v2152_v13  ;;  %vm1997_vm12 = vmpackc.low %vm443_vm8, %vm441_vm7  ;;  %vm446_vm7 = vcmp.eq.s32.totalorder %v393_v28, %v2232_v5  ;;  %vm449_vm8 = vcmp.eq.s32.totalorder %v2337_v30, %v2235_v7 }
  0x1e   : > { %vm2359_vm13 = vmpackc.low %vm446_vm7, %vm444_vm6  ;;  %vm452_vm6 = vcmp.eq.s32.totalorder %v396_v33, %v2232_v5  ;;  %vm454_vm7 = vcmp.eq.s32.totalorder %v397_v34, %v2232_v5 }
  0x1f   : > { %v2724_v35 = vsel %vm2359_vm13, 4294967295, %v2723_v35 }
  0x20   : > { %1992 = vmatpush1.bf16.msk.msra.mxu0 %vm2314_vm2, %v2152_v13  ;;  %vm451_vm2 = vcmp.eq.s32.totalorder %v395_v31, %v2235_v7 }
  0x21   : > { %1994 = vmatprep.subr.msk.bf16.mxu0 %vm1993_vm3, %v2152_v13  ;;  %vm2344_vm3 = vmpackc.low %vm442_vm0, %vm440_vm15  ;;  %vm2704_vm15 = vcmp.eq.s32.totalorder %v2337_v30, %v2232_v5  ;;  %vm450_vm0 = vcmp.eq.s32.totalorder %v395_v31, %v2232_v5 }
  0x22   : > { %v2722_v32 = vsel %vm2344_vm3, 4294967295, %v2721_v32 }
  0x24   : > { %1996 = vmatpush1.bf16.msk.msra.mxu0 %vm2328_vm9, %v2152_v13  ;;  %vm455_vm9 = vcmp.eq.s32.totalorder %v397_v34, %v2235_v7 }
  0x25   : > { %1998 = vmatprep.subr.msk.bf16.mxu0 %vm1997_vm12, %v2152_v13  ;;  %vm2005_vm12 = vmpackc.low %vm451_vm2, %vm449_vm8  ;;  %vm457_vm8 = vcmp.eq.s32.totalorder %v398_v36, %v2235_v7 }
  0x26   : > { %vm2007_vm2 = vmpackc.low %vm450_vm0, %vm2704_vm15  ;;  %vm458_vm0 = vcmp.eq.s32.totalorder %v399_v37, %v2232_v5  ;;  %vm463_vm15 = vcmp.eq.s32.totalorder %v401_v39, %v2235_v7 }
  0x28   : > { %2000 = vmatpush1.bf16.msk.msra.mxu0 %vm2344_vm3, %v2152_v13  ;;  %vm459_vm3 = vcmp.eq.s32.totalorder %v399_v37, %v2235_v7 }
  0x29   : > { %2002 = vmatprep.subr.msk.bf16.mxu0 %vm2001_vm5, %v2152_v13  ;;  %vm2009_vm5 = vmpackc.low %vm455_vm9, %vm453_vm1  ;;  %vm456_vm9 = vcmp.eq.s32.totalorder %v398_v36, %v2232_v5  ;;  %vm461_vm1 = vcmp.eq.s32.totalorder %v400_v38, %v2235_v7 }
  0x2c   : > { %2004 = vmatpush1.bf16.msk.msra.mxu0 %vm2359_vm13, %v2152_v13  ;;  %vm2013_vm13 = vmpackc.low %vm459_vm3, %vm457_vm8  ;;  %vm460_vm3 = vcmp.eq.s32.totalorder %v400_v38, %v2232_v5  ;;  %vm467_vm8 = vcmp.eq.s32.totalorder %v403_v41, %v2235_v7 }
  0x2d   : > { %2006 = vmatprep.subr.msk.bf16.mxu0 %vm2005_vm12, %v2152_v13  ;;  %vm2011_vm12 = vmpackc.low %vm454_vm7, %vm452_vm6  ;;  %vm462_vm6 = vcmp.eq.s32.totalorder %v401_v39, %v2232_v5  ;;  %vm465_vm7 = vcmp.eq.s32.totalorder %v402_v40, %v2235_v7 }
  0x2e   : > { %vm2019_vm11 = vmpackc.low %vm462_vm6, %vm460_vm3  ;;  %vm468_vm3 = vcmp.eq.s32.totalorder %v404_v44, %v2232_v5  ;;  %vm470_vm6 = vcmp.eq.s32.totalorder %v405_v45, %v2232_v5 }
  0x2f   : > { %vm2021_vm4 = vmpackc.low %vm467_vm8, %vm465_vm7  ;;  %vm473_vm8 = vcmp.eq.s32.totalorder %v406_v48, %v2235_v7 }
  0x30   : > { %2008 = vmatpush1.bf16.msk.msra.mxu0 %vm2007_vm2, %v2152_v13  ;;  %vm2015_vm2 = vmpackc.low %vm458_vm0, %vm456_vm9  ;;  %vm2405_vm9 = vcmp.ge.s32.totalorder %v337_v0, 2  ;;  %vm2410_vm0 = vcmp.lt.s32.totalorder %v337_v0, 258 }
  0x31   : > { %2010 = vmatprep.subr.msk.bf16.mxu0 %vm2009_vm5, %v2152_v13  ;;  %vm2017_vm5 = vmpackc.low %vm463_vm15, %vm461_vm1  ;;  %vm471_vm1 = vcmp.eq.s32.totalorder %v405_v45, %v2235_v7  ;;  %v781_v45 = vld [vmem:[%s2691_s1] sm:$0xff] }
  0x32   : > { %vm2027_vm7 = vmpackc.low %vm470_vm6, %vm468_vm3  ;;  %vm632_vm6 = vcmask 1040384  }
  0x34   : > { %2012 = vmatpush1.bf16.msk.msra.mxu0 %vm2011_vm12, %v2152_v13  ;;  %vm464_vm12 = vcmp.eq.s32.totalorder %v402_v40, %v2232_v5 }
  0x35   : > { %2014 = vmatprep.subr.msk.bf16.mxu0 %vm2013_vm13, %v2152_v13  ;;  %vm466_vm13 = vcmp.eq.s32.totalorder %v403_v41, %v2232_v5 }
  0x36   : > { %vm2023_vm15 = vmpackc.low %vm466_vm13, %vm464_vm12  ;;  %vm475_vm12 = vcmp.eq.s32.totalorder %v407_v49, %v2235_v7 }
  0x37   : > { %vm2029_vm13 = vmpackc.low %vm475_vm12, %vm473_vm8  ;;  %vm629_vm8 = vcmask 7168   ;;  %vm358_vm12 = vcmask 1039360  }
  0x38   : > { %2016 = vmatpush1.bf16.msk.msra.mxu0 %vm2015_vm2, %v2152_v13  ;;  %vm346_vm2 = vcmask 15360   ;;  %936 = vst.msk [vmem:[#allocation2 + $0x18] sm:$0xff] %vm629_vm8, %v2150_v1  ;;  %938 = vst.msk [vmem:[#allocation2 + $0x28] sm:$0xff] %vm629_vm8, %v2150_v1 }
  0x39   : > { %2018 = vmatprep.subr.msk.bf16.mxu0 %vm2017_vm5, %v2152_v13  ;;  %940 = vst.msk [vmem:[#allocation2 + $0x38] sm:$0xff] %vm629_vm8, %v2150_v1  ;;  %942 = vst.msk [vmem:[#allocation2 + $0x48] sm:$0xff] %vm629_vm8, %v2150_v1 }
  0x3c   : > { %2020 = vmatpush1.bf16.msk.msra.mxu0 %vm2019_vm11, %v2152_v13  ;;  %vm469_vm11 = vcmp.eq.s32.totalorder %v404_v44, %v2235_v7 }
  0x3d   : > { %2022 = vmatprep.subr.msk.bf16.mxu0 %vm2021_vm4, %v2152_v13  ;;  %vm351_vm4 = vmand %vm2405_vm9, %vm2410_vm0  ;;  %vm476_vm0 = vcmp.eq.s32.totalorder %v408_v51, %v2232_v5 }
  0x3e   : > { %vm2025_vm5 = vmpackc.low %vm471_vm1, %vm469_vm11  ;;  %vm474_vm11 = vcmp.eq.s32.totalorder %v407_v49, %v2232_v5 }
  0x40   : > { %2024 = vmatpush1.bf16.msk.msra.mxu0 %vm2023_vm15, %v2152_v13  ;;  %vm472_vm15 = vcmp.eq.s32.totalorder %v406_v48, %v2232_v5 }
  0x41   : > { %2026 = vmatprep.subr.msk.bf16.mxu0 %vm2025_vm5, %v2152_v13  ;;  %vm2031_vm1 = vmpackc.low %vm474_vm11, %vm472_vm15  ;;  %vm479_vm5 = vcmp.eq.s32.totalorder %v409_v52, %v2235_v7  ;;  %vm372_vm15 = vcmask 1022976   ;;  %vm480_vm11 = vcmp.eq.s32.totalorder %v410_v54, %v2232_v5 }
  0x42   : > { %v1762_v15 = vsel %vm480_vm11, 1.0, %v2150_v1  ;;  %vm834_vm11 = vcmask 1032192  }
  0x44   : > { %2028 = vmatpush1.bf16.msk.msra.mxu0 %vm2027_vm7, %v2152_v13  ;;  %vm481_vm7 = vcmp.eq.s32.totalorder %v410_v54, %v2235_v7 }
  0x45   : > { %2030 = vmatprep.subr.msk.bf16.mxu0 %vm2029_vm13, %v2152_v13  ;;  %v1763_v55 = vsel %vm481_vm7, 1.0, %v2150_v1  ;;  %vm365_vm13 = vcmask 1031168   ;;  %vm789_vm7 = vcmask 1040400  }
  0x48   : > { %2032 = vmatpush1.bf16.msk.msra.mxu0 %vm2031_vm1, %v2152_v13  ;;  %vm2729_vm1 = vnez %v2714_v20 }
  0x83   : > { %v344_v46 = vpop.permute.xlu0 %343 }
  0x84   : > { %v345_v47 = vrot.slane %v344_v46, 7 }
  0x86   : > { %v347_v50 = vsel %vm346_vm2, %v345_v47, %v344_v46  ;;  %vm477_vm2 = vcmp.eq.s32.totalorder %v408_v51, %v2235_v7 }
  0x87   : > { %352 = vst.msk [vmem:[#allocation3] sm:$0x7] %vm351_vm4, %v347_v50  ;;  %vm2033_vm9 = vmpackc.low %vm479_vm5, %vm477_vm2  ;;  %vm478_vm4 = vcmp.eq.s32.totalorder %v409_v52, %v2232_v5  ;;  %vm2730_vm2 = vnez %v2716_v23  ;;  %vm783_vm5 = vcmask 5120  }
  0x88   : > { %2034 = vmatprep.subr.msk.bf16.mxu0 %vm2033_vm9, %v2152_v13  ;;  %vm2035_vm3 = vmpackc.low %vm478_vm4, %vm476_vm0  ;;  %784 = vst.msk [vmem:[#allocation2 + $0x8] sm:$0x3f] %vm783_vm5, %v2150_v1  ;;  %vm791_vm9 = vcmask 0   ;;  %vm2497_vm0 = vcmp.lt.s32.totalorder %v337_v0, 129  ;;  %vm1191_vm4 = vcmask 524288   ;;  %vm841_vm5 = vcmask 48128  }
  0x89   : > { %2036 = vmatpush1.bf16.msk.msra.mxu0 %vm2035_vm3, %v2152_v13  ;;  %837 = vst.msk [vmem:[#allocation2 + $0x5] ss:$8 sm:$0x3] %vm2497_vm0, %v2156_v22  ;;  %v2157_v0 = vmov 1966171168   ;;  %vm796_vm3 = vcmask 1040392  }
  0x8a   : > { %1828 = vmatprep.subr.msk.mxu0 %vm632_vm6, %v1763_v55  ;;  %944 = vst.msk [vmem:[#allocation2 + $0x58] sm:$0x1] %vm791_vm9, %v2150_v1  ;;  %v802_v24 = vunpack.c.l.s4 %v2157_v0  ;;  %v931_v0 = vld [vmem:[%s2692_s2] sm:$0xff] }
  0x8b   : > { %1192 = vst.msk [vmem:[#allocation2 + $0xa0] sm:$0x1] %vm1191_vm4, %v2150_v1 }
  0x8c   : > { %976 = vst.msk [vmem:[#allocation2 + $0x50] ss:$8 sm:$0x3] %vm2497_vm0, %v2156_v22  ;;  %v803_v25 = vunpack.c.0.s8 %v802_v24  ;;  %v2160_v24 = vmov 0.0|0.0  }
  0x8d   : > { %1233 = vst.msk [vmem:[#allocation2 + $0xa0] sm:$0x1] %vm1191_vm4, %v2156_v22 }
  0x8e   : > { %v353_v53 = vld [vmem:[#allocation3] sm:$0x7]  ;;  %v806_v28 = vsub.s32 %v803_v25, %v2230_v3  ;;  %v932_v25 = vld [vmem:[%s2692_s2 + $0x8] sm:$0xff] }
  0x8f   : > { %362 = vrot.lane.b32.xlu1 %v353_v53, %s2153_s12  ;;  %355 = vrot.lane.b32.xlu0 %v353_v53, %s2154_s13 }
  0x93   : > { %369 = vrot.lane.b32.xlu1 %v353_v53, %s2155_s14 }
 0x101   : > { %v363_v56 = vpop.permute.xlu1 %362  ;;  %v356_v57 = vpop.permute.xlu0 %355 }
 0x102   : > { %v364_v58 = vrot.slane %v363_v56, 1  ;;  %v357_v59 = vrot.slane %v356_v57, 1 }
 0x104   : > { %v359_v60 = vsel %vm358_vm12, %v356_v57, %v357_v59  ;;  %v366_v63 = vsel %vm365_vm13, %v363_v56, %v364_v58 }
 0x105   : > { %v361_v61 = vadd.f32 %v359_v60, %v353_v53  ;;  %v370_v62 = vpop.permute.xlu1 %369  ;;  %v988_v53 = vld [vmem:[#allocation2 + $0x50] sm:$0x1]  ;;  %v985_v60 = vld [vmem:[#allocation2 + $0x38] sm:$0xff] }
 0x106   : > { %v371_v2 = vrot.slane %v370_v62, 1 }
 0x107   : > { %v368_v4 = vadd.f32 %v366_v63, %v361_v61 }
 0x108   : > { %v373_v6 = vsel %vm372_vm15, %v370_v62, %v371_v2  ;;  %vm845_vm15 = vcmask 1045504  }
 0x109   : > { %v375_v7 = vadd.f32 %v373_v6, %v368_v4 }
 0x10b   : > { %v376_v10 = vmul.f32 0.25, %v375_v7 }
 0x10d   : > { %v622_v11 = vrot.slane %v376_v10, %v621_v8  ;;  %v618_v12 = vrot.slane %v376_v10, %v617_v9  ;;  %v626_v19 = vrot.slane %v376_v10, %v625_v16  ;;  %v987_v10 = vld [vmem:[#allocation2 + $0x48] sm:$0xff] }
 0x10f   : > { %703 = vmatprep.mubr.f32.mxu0 %v622_v11  ;;  %v989_v11 = vld [vmem:[#allocation2 + $0x58] sm:$0x1] }
 0x110   : > { %704 = vmatmul.mubr.f32.vlgmr.msra.gmra.mrb[0].mxu0 %v618_v12 }
 0x111   : > { %1829 = vmatpush1.msk.msra.mxu0 %vm632_vm6, %v1762_v15  ;;  %774 = vmatprep.mubr.f32.mxu0 %v2150_v1  ;;  %v2045_v15 = vpack.c.bf16 %v989_v11, %v987_v10 }
 0x112   : > { %2096 = vmatprep.subr.msk.bf16.mxu0 %vm2253_vm10, %v2152_v13 }
 0x118   : > { %1830 = vmatmul.mubr.msk.f32.vlgmr.msra.gmra.mrb[0].mxu0 %vm629_vm8, %v626_v19 }
 0x119   : > { %2098 = vmatpush3.bf16.msk.msra.mxu0 %vm2253_vm10, %v2152_v13 }
 0x11a   : > { %2100 = vmatprep.subr.msk.bf16.mxu0 %vm2265_vm14, %v2152_v13 }
 0x11d   : > { %2102 = vmatpush3.bf16.msk.msra.mxu0 %vm2265_vm14, %v2152_v13 }
 0x11e   : > { %2104 = vmatprep.subr.msk.bf16.mxu0 %vm2729_vm1, %v2152_v13 }
 0x121   : > { %2106 = vmatpush3.bf16.msk.msra.mxu0 %vm2729_vm1, %v2152_v13 }
 0x122   : > { %2108 = vmatprep.subr.msk.bf16.mxu0 %vm2730_vm2, %v2152_v13 }
 0x125   : > { %2110 = vmatpush3.bf16.msk.msra.mxu0 %vm2730_vm2, %v2152_v13 }
 0x1eb   : > { %v776_v27 = vpop.f32.mrb[0].mxu0 }
 0x1ec   : > { %793 = vrot.lane.b32.xlu1 %v776_v27, %s2158_s15  ;;  %786 = vrot.lane.b32.xlu0 %v776_v27, %s2151_s11  ;;  %v778_v31 = vpop.f32.mrb[1].mxu0 }
 0x1ed   : > { %v800_v33 = vcombine.low %v776_v27, %v778_v31 }
 0x1ef   : > { %v807_v34 = vrot.slane %v800_v33, %v806_v28 }
 0x1f0   : > { %821 = vrot.lane.b32.xlu0 %v776_v27, %s2154_s13  ;;  %823 = vrot.lane.b32.xlu1 %v778_v31, %s2154_s13 }
 0x1f1   : > { %v814_v36 = vrot.slane %v807_v34, %v806_v28 }
 0x1f3   : > { %819 = vst.msk [vmem:[#allocation2 + $0x2] ss:$8 sm:$0x3] %vm2497_vm0, %v814_v36 }
 0x1f4   : > { %828 = vrot.lane.b32.xlu0 %v776_v27, %s2153_s12  ;;  %830 = vrot.lane.b32.xlu1 %v778_v31, %s2153_s12 }
 0x25e   : > { %v794_v3 = vpop.permute.xlu1 %793  ;;  %v787_v37 = vpop.permute.xlu0 %786 }
 0x25f   : > { %797 = vst.msk [vmem:[#allocation2 + $0x1] sm:$0x1] %vm796_vm3, %v794_v3  ;;  %vm955_vm3 = vcmask 1047560  }
 0x260   : > { %798 = vst.msk [vmem:[#allocation2 + $0x9] sm:$0x1] %vm791_vm9, %v794_v3  ;;  %792 = vst.msk [vmem:[#allocation2 + $0x8] sm:$0x1] %vm791_vm9, %v787_v37  ;;  %vm1176_vm9 = vcmask 531456  }
 0x261   : > { %790 = vst.msk [vmem:[#allocation2] sm:$0x1] %vm789_vm7, %v787_v37  ;;  %vm949_vm7 = vcmask 1047568   ;;  %v1179_v37 = vld [vmem:[%s2693_s3] sm:$0xff] }
 0x262   : > { %v822_v38 = vpop.permute.xlu0 %821  ;;  %v824_v39 = vpop.permute.xlu1 %823  ;;  %1187 = vst.msk [vmem:[#allocation2 + $0x60] sm:$0xff] %vm1176_vm9, %v2150_v1  ;;  %1188 = vst.msk [vmem:[#allocation2 + $0x70] sm:$0xff] %vm1176_vm9, %v2150_v1 }
 0x263   : > { %v825_v40 = vsel %vm358_vm12, %v822_v38, %v824_v39  ;;  %1189 = vst.msk [vmem:[#allocation2 + $0x80] sm:$0xff] %vm1176_vm9, %v2150_v1  ;;  %1190 = vst.msk [vmem:[#allocation2 + $0x90] sm:$0xff] %vm1176_vm9, %v2150_v1 }
 0x264   : > { %827 = vst [vmem:[#allocation2 + $0x3] sm:$0x1] %v825_v40  ;;  %1186 = vst.msk [vmem:[#allocation2 + $0x50] sm:$0xff] %vm1176_vm9, %v2150_v1 }
 0x266   : > { %v829_v41 = vpop.permute.xlu0 %828  ;;  %v831_v42 = vpop.permute.xlu1 %830 }
 0x267   : > { %v840_v43 = vld [vmem:[#allocation2 + $0x8] sm:$0x3f]  ;;  %v832_v44 = vsel %vm365_vm13, %v829_v41, %v831_v42 }
 0x268   : > { %1831 = vmatprep.subr.msk.mxu1 %vm845_vm15, %v840_v43  ;;  %934 = vst.msk [vmem:[#allocation2 + $0x8] sm:$0xff] %vm629_vm8, %v2150_v1 }
 0x269   : > { %835 = vst.msk [vmem:[#allocation2 + $0x4] sm:$0x1] %vm834_vm11, %v832_v44  ;;  %vm2737_vm11 = vcmp.eq.s32.totalorder %v2337_v30, %v2232_v5 }
 0x26a   : > { %v1730_v14 = vsel %vm2737_vm11, 1.0, %v2150_v1  ;;  %vm1420_vm11 = vcmask 269312  }
 0x270   : > { %v839_v46 = vld [vmem:[#allocation2] sm:$0x3f] }
 0x271   : > { %1832 = vmatpush1.msk.msra.mxu1 %vm845_vm15, %v839_v46  ;;  %933 = vst [vmem:[#allocation2] sm:$0xff] %v2150_v1 }
 0x272   : > { %1833 = vmatmul.mubr.msk.f32.vlgmr.msra.gmra.mrb[0].mxu1 %vm841_vm5, %v781_v45 }
 0x273   : > { %1067 = vmatprep.mubr.f32.mxu1 %v2150_v1 }
 0x345   : > { %v918_v47 = vpop.f32.mrb[0].mxu1 }
 0x346   : > { %vm923_vm0 = vcmp.gt.f32.partialorder %v918_v47, 0.0  ;;  %v925_v48 = vmul.f32 0.1, %v918_v47  ;;  %v920_v49 = vpop.f32.mrb[1].mxu1 }
 0x347   : > { %vm924_vm4 = vcmp.gt.f32.partialorder %v920_v49, 0.0  ;;  %v926_v50 = vmul.f32 0.1, %v920_v49 }
 0x348   : > { %v927_v51 = vsel %vm923_vm0, %v918_v47, %v925_v48 }
 0x349   : > { %958 = vst [vmem:[#allocation2 + $0x20] sm:$0xff] %v927_v51  ;;  %952 = vrot.lane.b32.xlu1 %v927_v51, %s2158_s15  ;;  %946 = vrot.lane.b32.xlu0 %v927_v51, %s2151_s11  ;;  %v928_v52 = vsel %vm924_vm4, %v920_v49, %v926_v50  ;;  %929 = vst [vmem:[%s322_s21] sm:$0xff] %v927_v51 }
 0x34a   : > { %930 = vst.msk [vmem:[%s322_s21 + $0x8] sm:$0xff] %vm629_vm8, %v928_v52  ;;  %959 = vst.msk [vmem:[#allocation2 + $0x28] sm:$0xff] %vm629_vm8, %v928_v52 }
 0x34b   : > { %1183 = vst.msk [vmem:[#allocation2 + $0x20] sm:$0xff] %vm1176_vm9, %v2150_v1 }
 0x34d   : > { %961 = vrot.lane.b32.xlu0 %v927_v51, %s2154_s13  ;;  %963 = vrot.lane.b32.xlu1 %v928_v52, %s2154_s13 }
 0x351   : > { %968 = vrot.lane.b32.xlu0 %v927_v51, %s2153_s12  ;;  %970 = vrot.lane.b32.xlu1 %v928_v52, %s2153_s12  ;;  %v983_v59 = vld [vmem:[#allocation2 + $0x28] sm:$0xff] }
 0x352   : > { %v2041_v12 = vpack.c.bf16 %v985_v60, %v983_v59 }
 0x3bb   : > { %v953_v54 = vpop.permute.xlu1 %952  ;;  %v947_v55 = vpop.permute.xlu0 %946 }
 0x3bc   : > { %956 = vst.msk [vmem:[#allocation2 + $0x10] sm:$0xff] %vm955_vm3, %v953_v54 }
 0x3bd   : > { %957 = vst.msk [vmem:[#allocation2 + $0x18] sm:$0xff] %vm629_vm8, %v953_v54  ;;  %951 = vst.msk [vmem:[#allocation2 + $0x8] sm:$0xff] %vm629_vm8, %v947_v55 }
 0x3be   : > { %950 = vst.msk [vmem:[#allocation2] sm:$0xff] %vm949_vm7, %v947_v55  ;;  %vm1201_vm7 = vcmask 531472  }
 0x3bf   : > { %v962_v56 = vpop.permute.xlu0 %961  ;;  %v964_v57 = vpop.permute.xlu1 %963 }
 0x3c0   : > { %v965_v58 = vsel %vm358_vm12, %v962_v56, %v964_v57 }
 0x3c1   : > { %967 = vst [vmem:[#allocation2 + $0x30] sm:$0xff] %v965_v58  ;;  %v2043_v16 = vpack.c.bf16 %v965_v58, %v927_v51 }
 0x3c2   : > { %1184 = vst.msk [vmem:[#allocation2 + $0x30] sm:$0xff] %vm1176_vm9, %v2150_v1 }
 0x3c3   : > { %v969_v61 = vpop.permute.xlu0 %968  ;;  %v971_v62 = vpop.permute.xlu1 %970  ;;  %v980_v8 = vld [vmem:[#allocation2 + $0x10] sm:$0xff] }
 0x3c4   : > { %v979_v63 = vld [vmem:[#allocation2 + $0x8] sm:$0xff]  ;;  %v981_v2 = vld [vmem:[#allocation2 + $0x18] sm:$0xff]  ;;  %v972_v6 = vsel %vm365_vm13, %v969_v61, %v971_v62  ;;  %1182 = vst.msk [vmem:[#allocation2 + $0x10] sm:$0xff] %vm1176_vm9, %v2150_v1  ;;  %vm2159_vm13 = vmmov 1   ;;  %v1244_v61 = vld [vmem:[#allocation2 + $0xa0] sm:$0x1] }
 0x3c5   : > { %v978_v4 = vld [vmem:[#allocation2] sm:$0xff]  ;;  %v2037_v7 = vpack.c.bf16 %v981_v2, %v979_v63  ;;  %974 = vst.msk [vmem:[#allocation2 + $0x40] sm:$0xff] %vm358_vm12, %v972_v6  ;;  %vm2046_vm15 = vmpackc.low %vm632_vm6, %vm2159_vm13  ;;  %vm990_vm12 = vcmask 334848   ;;  %vm1210_vm13 = vcmask 531464  }
 0x3c6   : > { %1181 = vst.msk [vmem:[#allocation2] sm:$0xff] %vm1176_vm9, %v2150_v1  ;;  %v2039_v9 = vpack.c.bf16 %v980_v8, %v978_v4 }
 0x3c7   : > { %2038 = vmatprep.subr.bf16.mxu1 %v2037_v7 }
 0x3c8   : > { %2040 = vmatpush1.bf16.msra.mxu1 %v2039_v9 }
 0x3c9   : > { %2042 = vmatprep.subr.bf16.mxu1 %v2041_v12 }
 0x3cc   : > { %2044 = vmatpush1.bf16.msra.mxu1 %v2043_v16  ;;  %v986_v19 = vld [vmem:[#allocation2 + $0x40] sm:$0xff] }
 0x3cd   : > { %2047 = vmatprep.subr.msk.bf16.mxu1 %vm2046_vm15, %v2045_v15  ;;  %1185 = vst.msk [vmem:[#allocation2 + $0x40] sm:$0xff] %vm1176_vm9, %v2150_v1  ;;  %v2048_v21 = vpack.c.bf16 %v988_v53, %v986_v19 }
 0x3d0   : > { %2050 = vmatpush1.bf16.msk.msra.mxu1 %vm2046_vm15, %v2048_v21  ;;  %vm1221_vm15 = vcmask 523264  }
 0x3d1   : > { %2051 = vmatprep.subr.bf16.mxu1 %v2160_v24 }
 0x3d3   : > { %1836 = vmatmul.mubr.msk.f32.vlgmr.msra.gmra.mrb[2].mxu1 %vm990_vm12, %v931_v0 }
 0x3d4   : > { %1073 = vmatprep.mubr.f32.mxu1 %v2150_v1  ;;  %2053 = vmatpush1.bf16.msk.msra.mxu1 %vm2253_vm10, %v2152_v13  ;;  %vm2733_vm10 = vnez %v2718_v26 }
 0x3d5   : > { %2054 = vmatprep.subr.bf16.mxu1 %v2160_v24 }
 0x3d7   : > { %1837 = vmatmul.mubr.msk.f32.gmra.mrb[4].mxu1 %vm990_vm12, %v932_v25  ;;  %vm1230_vm12 = vcmask 515072  }
 0x3d8   : > { %2056 = vmatpush1.bf16.msk.msra.mxu1 %vm2265_vm14, %v2152_v13  ;;  %vm2734_vm14 = vnez %v2720_v29 }
 0x3d9   : > { %2057 = vmatprep.subr.bf16.mxu1 %v2160_v24 }
 0x3dc   : > { %2059 = vmatpush1.bf16.msk.msra.mxu1 %vm2729_vm1, %v2152_v13  ;;  %vm2735_vm1 = vnez %v2722_v32 }
 0x3dd   : > { %2060 = vmatprep.subr.bf16.mxu1 %v2160_v24 }
 0x3e0   : > { %2062 = vmatpush1.bf16.msk.msra.mxu1 %vm2730_vm2, %v2152_v13  ;;  %vm2736_vm2 = vnez %v2724_v35 }
 0x3e1   : > { %2063 = vmatprep.subr.bf16.mxu1 %v2160_v24 }
 0x3e4   : > { %2065 = vmatpush1.bf16.msk.msra.mxu1 %vm2733_vm10, %v2152_v13  ;;  %vm1430_vm10 = vcmask 262144  }
 0x3e5   : > { %2066 = vmatprep.subr.bf16.mxu1 %v2160_v24 }
 0x3e8   : > { %2068 = vmatpush1.bf16.msk.msra.mxu1 %vm2734_vm14, %v2152_v13  ;;  %vm2738_vm14 = vcmp.eq.s32.totalorder %v2274_v18, %v2232_v5 }
 0x3e9   : > { %2069 = vmatprep.subr.bf16.mxu1 %v2160_v24  ;;  %v1714_v62 = vsel %vm2738_vm14, 1.0, %v2150_v1 }
 0x3ea   : > { %1951 = vmatprep.subr.msk.mxu0 %vm632_vm6, %v1714_v62 }
 0x3eb   : > { %1952 = vmatpush3.msk.msra.mxu0 %vm632_vm6, %v1714_v62 }
 0x3ec   : > { %2071 = vmatpush1.bf16.msk.msra.mxu1 %vm2735_vm1, %v2152_v13 }
 0x3ed   : > { %2072 = vmatprep.subr.bf16.mxu1 %v2160_v24 }
 0x3f0   : > { %2074 = vmatpush1.bf16.msk.msra.mxu1 %vm2736_vm2, %v2152_v13 }
 0x3f1   : > { %1133 = vmatprep.subr.mxu1 %v2150_v1 }
 0x3f4   : > { %1854 = vmatpush1.msk.msra.mxu1 %vm632_vm6, %v1730_v14 }
 0x4a6   : > { %v1069_v17 = vpop.f32.mrb[2].mxu1 }
 0x4a7   : > { %v1084_v20 = vmul.f32 0.1, %v1069_v17  ;;  %v1071_v23 = vpop.f32.mrb[3].mxu1  ;;  %vm1080_vm5 = vcmp.gt.f32.partialorder %v1069_v17, 0.0 }
 0x4a8   : > { %vm1081_vm0 = vcmp.gt.f32.partialorder %v1071_v23, 0.0  ;;  %v1085_v26 = vmul.f32 0.1, %v1071_v23 }
 0x4a9   : > { %v1088_v35 = vsel %vm1080_vm5, %v1069_v17, %v1084_v20  ;;  %vm1440_vm5 = vcmask 269320  }
 0x4aa   : > { %v1075_v29 = vpop.f32.mrb[4].mxu1  ;;  %v1089_v32 = vsel %vm1081_vm0, %v1071_v23, %v1085_v26  ;;  %vm1451_vm0 = vcmask 261120   ;;  %v1423_v26 = vld [vmem:[%s2694_s4] sm:$0x1] }
 0x4ab   : > { %v1086_v13 = vmul.f32 0.1, %v1075_v29  ;;  %v1077_v27 = vpop.f32.mrb[5].mxu1  ;;  %1855 = vmatprep.mubr.msk.f32.mxu1 %vm629_vm8, %v1089_v32  ;;  %vm1082_vm4 = vcmp.gt.f32.partialorder %v1075_v29, 0.0 }
 0x4ac   : > { %vm1083_vm3 = vcmp.gt.f32.partialorder %v1077_v27, 0.0  ;;  %v1087_v30 = vmul.f32 0.1, %v1077_v27  ;;  %1166 = vmatmul.mubr.f32.vlgmr.msra.gmra.mrb[6].mxu1 %v1088_v35 }
 0x4ad   : > { %v1090_v31 = vsel %vm1082_vm4, %v1075_v29, %v1086_v13  ;;  %vm1462_vm4 = vcmask 400384  }
 0x4ae   : > { %v1091_v28 = vsel %vm1083_vm3, %v1077_v27, %v1087_v30 }
 0x4af   : > { %1856 = vmatprep.mubr.msk.f32.mxu1 %vm629_vm8, %v1091_v28  ;;  %vm1245_vm8 = vcmask 662528  }
 0x4b0   : > { %1171 = vmatmul.mubr.f32.gmra.mrb[8].mxu1 %v1090_v31 }
 0x4b1   : > { %1932 = vmatprep.mubr.msk.f32.mxu1 %vm1245_vm8, %v1179_v37 }
 0x57f   : > { %v1167_v33 = vpop.f32.mrb[6].mxu1 }
 0x580   : > { %1177 = vst.msk [vmem:[%s327_s30] sm:$0xff] %vm1176_vm9, %v1167_v33  ;;  %1213 = vst.msk [vmem:[#allocation2 + $0x40] sm:$0xff] %vm1176_vm9, %v1167_v33  ;;  %1195 = vrot.lane.b32.xlu0 %v1167_v33, %s2151_s11  ;;  %v1169_v34 = vpop.f32.mrb[7].mxu1 }
 0x583   : > { %v1172_v36 = vpop.f32.mrb[8].mxu1 }
 0x584   : > { %1178 = vst.msk [vmem:[%s327_s30 + $0x8] sm:$0xff] %vm1176_vm9, %v1172_v36  ;;  %1214 = vst.msk [vmem:[#allocation2 + $0x50] sm:$0xff] %vm1176_vm9, %v1172_v36  ;;  %1204 = vrot.lane.b32.xlu0 %v1167_v33, %s2158_s15  ;;  %1197 = vrot.lane.b32.xlu1 %v1172_v36, %s2151_s11  ;;  %v1174_v3 = vpop.f32.mrb[9].mxu1 }
 0x587   : > { %v1238_v54 = vld [vmem:[#allocation2 + $0x40] sm:$0xff] }
 0x588   : > { %1215 = vrot.lane.b32.xlu0 %v1167_v33, %s2154_s13  ;;  %1206 = vrot.lane.b32.xlu1 %v1172_v36, %s2158_s15  ;;  %1428 = vst.msk [vmem:[#allocation2 + $0x40] sm:$0xff] %vm1420_vm11, %v2150_v1 }
 0x58b   : > { %v1239_v48 = vld [vmem:[#allocation2 + $0x50] sm:$0xff] }
 0x58c   : > { %1224 = vrot.lane.b32.xlu0 %v1167_v33, %s2153_s12  ;;  %1217 = vrot.lane.b32.xlu1 %v1172_v36, %s2154_s13  ;;  %v2083_v55 = vpack.c.bf16 %v1239_v48, %v1238_v54  ;;  %1429 = vst.msk [vmem:[#allocation2 + $0x50] sm:$0xff] %vm1420_vm11, %v2150_v1 }
 0x590   : > { %1226 = vrot.lane.b32.xlu1 %v1172_v36, %s2153_s12 }
 0x5f2   : > { %v1196_v38 = vpop.permute.xlu0 %1195 }
 0x5f3   : > { %1202 = vst.msk [vmem:[#allocation2] sm:$0xff] %vm1201_vm7, %v1196_v38 }
 0x5f6   : > { %v1205_v39 = vpop.permute.xlu0 %1204  ;;  %v1198_v40 = vpop.permute.xlu1 %1197 }
 0x5f7   : > { %1211 = vst.msk [vmem:[#allocation2 + $0x20] sm:$0xff] %vm1210_vm13, %v1205_v39 }
 0x5f8   : > { %1203 = vst.msk [vmem:[#allocation2 + $0x10] sm:$0xff] %vm1201_vm7, %v1198_v40 }
 0x5fa   : > { %v1216_v41 = vpop.permute.xlu0 %1215  ;;  %v1207_v42 = vpop.permute.xlu1 %1206  ;;  %v1234_v45 = vld [vmem:[#allocation2] sm:$0xff] }
 0x5fb   : > { %1222 = vst.msk [vmem:[#allocation2 + $0x60] sm:$0xff] %vm1221_vm15, %v1216_v41 }
 0x5fc   : > { %1212 = vst.msk [vmem:[#allocation2 + $0x30] sm:$0xff] %vm1210_vm13, %v1207_v42 }
 0x5fd   : > { %1424 = vst.msk [vmem:[#allocation2] sm:$0xff] %vm1420_vm11, %v2150_v1 }
 0x5fe   : > { %v1225_v43 = vpop.permute.xlu0 %1224  ;;  %v1218_v44 = vpop.permute.xlu1 %1217  ;;  %v1236_v51 = vld [vmem:[#allocation2 + $0x20] sm:$0xff] }
 0x5ff   : > { %v1235_v46 = vld [vmem:[#allocation2 + $0x10] sm:$0xff]  ;;  %1231 = vst.msk [vmem:[#allocation2 + $0x80] sm:$0xff] %vm1230_vm12, %v1225_v43 }
 0x600   : > { %1223 = vst.msk [vmem:[#allocation2 + $0x70] sm:$0xff] %vm1221_vm15, %v1218_v44  ;;  %v2075_v47 = vpack.c.bf16 %v1235_v46, %v1234_v45 }
 0x601   : > { %1425 = vst.msk [vmem:[#allocation2 + $0x10] sm:$0xff] %vm1420_vm11, %v2150_v1  ;;  %1426 = vst.msk [vmem:[#allocation2 + $0x20] sm:$0xff] %vm1420_vm11, %v2150_v1 }
 0x602   : > { %2076 = vmatprep.subr.bf16.mxu1 %v2075_v47  ;;  %v1240_v49 = vld [vmem:[#allocation2 + $0x60] sm:$0xff]  ;;  %v1227_v50 = vpop.permute.xlu1 %1226 }
 0x603   : > { %2078 = vmatpush3.bf16.msra.mxu1 %v2075_v47  ;;  %v1237_v52 = vld [vmem:[#allocation2 + $0x30] sm:$0xff]  ;;  %1431 = vst.msk [vmem:[#allocation2 + $0x60] sm:$0x1] %vm1430_vm10, %v2150_v1 }
 0x604   : > { %1232 = vst.msk [vmem:[#allocation2 + $0x90] sm:$0xff] %vm1230_vm12, %v1227_v50  ;;  %v2079_v53 = vpack.c.bf16 %v1237_v52, %v1236_v51 }
 0x605   : > { %1454 = vst.msk [vmem:[#allocation2 + $0x60] sm:$0x1] %vm1430_vm10, %v2156_v22  ;;  %v1180_v22 = vld [vmem:[%s2693_s3 + $0x8] sm:$0xff] }
 0x606   : > { %2080 = vmatprep.subr.bf16.mxu1 %v2079_v53  ;;  %v1242_v59 = vld [vmem:[#allocation2 + $0x80] sm:$0xff]  ;;  %1427 = vst.msk [vmem:[#allocation2 + $0x30] sm:$0xff] %vm1420_vm11, %v2150_v1 }
 0x607   : > { %2082 = vmatpush3.bf16.msra.mxu1 %v2079_v53  ;;  %v1241_v56 = vld [vmem:[#allocation2 + $0x70] sm:$0xff] }
 0x608   : > { %2084 = vmatprep.subr.bf16.mxu1 %v2083_v55  ;;  %v2087_v57 = vpack.c.bf16 %v1241_v56, %v1240_v49 }
 0x60b   : > { %2086 = vmatpush3.bf16.msra.mxu1 %v2083_v55  ;;  %v1243_v58 = vld [vmem:[#allocation2 + $0x90] sm:$0xff] }
 0x60c   : > { %2088 = vmatprep.subr.bf16.mxu1 %v2087_v57  ;;  %v2091_v60 = vpack.c.bf16 %v1243_v58, %v1242_v59  ;;  %v1461_v23 = vld [vmem:[#allocation2 + $0x60] sm:$0x1] }
 0x60f   : > { %2090 = vmatpush3.bf16.msra.mxu1 %v2087_v57 }
 0x610   : > { %2092 = vmatprep.subr.bf16.mxu1 %v2091_v60 }
 0x613   : > { %2094 = vmatpush3.bf16.msra.mxu1 %v2091_v60 }
 0x614   : > { %1930 = vmatprep.subr.msk.mxu1 %vm632_vm6, %v1244_v61 }
 0x617   : > { %1931 = vmatpush3.msk.msra.mxu1 %vm632_vm6, %v1244_v61 }
 0x618   : > { %1933 = vmatmul.mubr.msk.f32.vlgmr.msra.gmra.mrb[10].mxu1 %vm1245_vm8, %v1180_v22  ;;  %2111 = vmatprep.subr.bf16.mxu1 %v2160_v24 }
 0x6eb   : > { %v1934_v63 = vpop.f32.mrb[10].mxu1 }
 0x6ec   : > { %v1333_v2 = vmul.f32 0.1, %v1934_v63  ;;  %v1321_v4 = vpop.f32.mrb[11].mxu1  ;;  %vm1331_vm1 = vcmp.gt.f32.partialorder %v1934_v63, 0.0 }
 0x6ed   : > { %vm1330_vm2 = vcmp.gt.f32.partialorder %v1321_v4, 0.0  ;;  %v1332_v6 = vmul.f32 0.1, %v1321_v4 }
 0x6ee   : > { %v1335_v8 = vsel %vm1331_vm1, %v1934_v63, %v1333_v2 }
 0x6ef   : > { %v1334_v7 = vsel %vm1330_vm2, %v1321_v4, %v1332_v6 }
 0x6f0   : > { %1953 = vmatprep.mubr.msk.f32.mxu0 %vm1176_vm9, %v1334_v7 }
 0x6f1   : > { %1954 = vmatmul.mubr.msk.f32.vlgmr.msra.gmra.mrb[2].mxu0 %vm1176_vm9, %v1335_v8  ;;  %vm2161_vm9 = vmmov 0  }
 0x6f2   : > { %1970 = vmatprep.mubr.msk.f32.mxu1 %vm2161_vm9, %v2150_v1 }
 0x7c4   : > { %v1955_v5 = vpop.f32.mrb[2].mxu0 }
 0x7c5   : > { %1422 = vst.msk [vmem:[%s332_s17 + $0x8] sm:$0xff] %vm1420_vm11, %v1955_v5  ;;  %1444 = vst.msk [vmem:[#allocation2 + $0x30] sm:$0xff] %vm1420_vm11, %v1955_v5  ;;  %1436 = vrot.lane.b32.xlu1 %v1955_v5, %s2158_s15  ;;  %v1411_v18 = vpop.f32.mrb[3].mxu0 }
 0x7c6   : > { %1421 = vst.msk [vmem:[%s332_s17] sm:$0xff] %vm1420_vm11, %v1411_v18  ;;  %1443 = vst.msk [vmem:[#allocation2 + $0x20] sm:$0xff] %vm1420_vm11, %v1411_v18  ;;  %1434 = vrot.lane.b32.xlu0 %v1411_v18, %s2158_s15 }
 0x7c9   : > { %1447 = vrot.lane.b32.xlu1 %v1955_v5, %s2154_s13 }
 0x7ca   : > { %1445 = vrot.lane.b32.xlu0 %v1411_v18, %s2154_s13 }
 0x7cc   : > { %v1458_v0 = vld [vmem:[#allocation2 + $0x30] sm:$0xff] }
 0x7cd   : > { %v1457_v21 = vld [vmem:[#allocation2 + $0x20] sm:$0xff] }
 0x7ce   : > { %v2115_v25 = vpack.c.bf16 %v1458_v0, %v1457_v21 }
 0x837   : > { %v1437_v9 = vpop.permute.xlu1 %1436 }
 0x838   : > { %1442 = vst.msk [vmem:[#allocation2 + $0x10] sm:$0xff] %vm1440_vm5, %v1437_v9  ;;  %v1435_v10 = vpop.permute.xlu0 %1434 }
 0x839   : > { %1441 = vst.msk [vmem:[#allocation2] sm:$0xff] %vm1440_vm5, %v1435_v10 }
 0x83b   : > { %v1448_v11 = vpop.permute.xlu1 %1447 }
 0x83c   : > { %1453 = vst.msk [vmem:[#allocation2 + $0x50] sm:$0xff] %vm1451_vm0, %v1448_v11  ;;  %v1446_v12 = vpop.permute.xlu0 %1445 }
 0x83d   : > { %1452 = vst.msk [vmem:[#allocation2 + $0x40] sm:$0xff] %vm1451_vm0, %v1446_v12 }
 0x83f   : > { %v1456_v15 = vld [vmem:[#allocation2 + $0x10] sm:$0xff] }
 0x840   : > { %v1455_v16 = vld [vmem:[#allocation2] sm:$0xff] }
 0x841   : > { %v2112_v19 = vpack.c.bf16 %v1456_v15, %v1455_v16 }
 0x843   : > { %2113 = vmatpush3.bf16.msra.mxu1 %v2112_v19  ;;  %v1460_v17 = vld [vmem:[#allocation2 + $0x50] sm:$0xff] }
 0x844   : > { %2114 = vmatprep.subr.bf16.mxu1 %v2160_v24  ;;  %v1459_v14 = vld [vmem:[#allocation2 + $0x40] sm:$0xff] }
 0x845   : > { %v2118_v20 = vpack.c.bf16 %v1460_v17, %v1459_v14 }
 0x847   : > { %2116 = vmatpush3.bf16.msra.mxu1 %v2115_v25 }
 0x848   : > { %2117 = vmatprep.subr.bf16.mxu1 %v2160_v24 }
 0x84b   : > { %2119 = vmatpush3.bf16.msra.mxu1 %v2118_v20 }
 0x84c   : > { %1968 = vmatprep.subr.mxu1 %v2150_v1 }
 0x84f   : > { %1969 = vmatpush3.msk.msra.mxu1 %vm632_vm6, %v1461_v23 }
 0x850   : > { %1971 = vmatmul.mubr.msk.f32.vlgmr.msra.gmra.mrb[12].mxu1 %vm1462_vm4, %v1423_v26 }
 0x923   : > { %v1535_v29 = vpop.f32.mrb[12].mxu1 }
 0x924   : > { %1539 = vst.msk [vmem:[%s335_s20] sm:$0x1] %vm1430_vm10, %v1535_v29  ;;  %v1972_v24 = vpop.f32.mrb[13].mxu1 }
 0x925 PF: > { %s19_s27 = sadd.s32 1, %s2148_s27  }
 0x926   : > { %p16_p4 = scmp.ge.s32.totalorder %s19_s27, 6  }
 0x928   :  { %18 = sbr.rel (!%p16_p4) target bundleno = 1 (0x1), region = 109 }

</bundles_post_ra>
